<compile_context>
chip_gen: v7x
topology: tpu7x:2x2x1
jax: 0.10.0
libtpu: 0.0.40
codegen_flags: <defaults>
</compile_context>

<pallas_src>
import jax
import jax.numpy as jnp
from jax.experimental import pallas as pl
from jax.experimental.pallas import tpu as pltpu


# ---------------------------------------------------------------------------
# Fused DecoderBlock kernel (bt images per grid step, (C, H*W) layout)
# ---------------------------------------------------------------------------

def _make_decoder_kernel(bt, h, w, H, W, Cin, Cskip, Cout):
    hw, HW = h * w, H * W
    f32, bf16 = jnp.float32, jnp.bfloat16

    def shift_flat(z, off):
        """result[:, p] = z[:, p + off], zero-filled outside [0, S)."""
        if off == 0:
            return z
        C, S = z.shape
        pad = jnp.zeros((C, abs(off)), z.dtype)
        if off > 0:
            return jnp.concatenate([z[:, off:], pad], axis=1)
        return jnp.concatenate([pad, z[:, :S + off]], axis=1)

    def taps3x3(z, Ws, mask_l, mask_r):
        """9 shifted (C, S) bf16 planes of z (C, S) f32, tap order (dy, dx)."""
        zb = z.astype(bf16)                      # cast once, shift in bf16
        taps = []
        for dy in (-1, 0, 1):
            for dx in (-1, 0, 1):
                t = shift_flat(zb, dy * Ws + dx)
                if dx == -1:
                    t = jnp.where(mask_l, t, jnp.zeros_like(t))
                elif dx == 1:
                    t = jnp.where(mask_r, t, jnp.zeros_like(t))
                taps.append(t)
        return taps

    def kernel(x_ref, skip_ref,
               enc_s_ref, enc_bb_ref, enc_w_ref, enc_b_ref,
               dec_s_ref, dec_bb_ref, dec_w_ref, dec_b_ref,
               att_s_ref, att_bb_ref, att_w_ref, att_b_ref,
               pool_sel_ref, up_sel_ref,
               c1id_w_ref, c1id_b_ref,
               c2_w_ref, c2_b_ref,
               o_ref):
        # Column-validity masks for the two spatial resolutions (built once
        # per grid step, reused by every conv and every image in the block).
        col_hi = jax.lax.broadcasted_iota(jnp.int32, (1, HW), 1) % W
        hi_l, hi_r = col_hi >= 1, col_hi <= W - 2
        col_lo = jax.lax.broadcasted_iota(jnp.int32, (1, hw), 1) % w
        lo_l, lo_r = col_lo >= 1, col_lo <= w - 2

        for bl in range(bt):                     # a few images per grid step
            x = x_ref[bl].astype(f32)            # (Cin,  hw)   low-res input
            skip = skip_ref[bl].astype(f32)      # (Cskip, HW)  high-res skip

            # -- attention0/encoder: BN -> ReLU -> conv3x3(+bias) -> maxpool2x2
            ze = jnp.maximum(skip * enc_s_ref[...] + enc_bb_ref[...], 0.0)
            z9e = jnp.concatenate(taps3x3(ze, W, hi_l, hi_r), axis=0)
            e = (jnp.dot(enc_w_ref[...], z9e, preferred_element_type=f32)
                 + enc_b_ref[...])                            # (Cin, HW)
            # window max at every anchor; shifted-in zeros / row-wrap values
            # only ever land on discarded odd anchors (H, W even).
            m = jnp.maximum(e, shift_flat(e, 1))
            m = jnp.maximum(m, shift_flat(m, W))
            pooled = jnp.dot(m, pool_sel_ref[...])            # (Cin, hw) exact

            # -- attention0/decoder: BN -> ReLU -> conv3x3(+bias) -------------
            zd = jnp.maximum(x * dec_s_ref[...] + dec_bb_ref[...], 0.0)
            z9d = jnp.concatenate(taps3x3(zd, w, lo_l, lo_r), axis=0)
            d = (jnp.dot(dec_w_ref[...], z9d, preferred_element_type=f32)
                 + dec_b_ref[...])                            # (Cin, hw)

            # -- attention0/gate: BN -> ReLU -> 1x1 conv -> global avg pool ---
            out0 = pooled + d
            za = jnp.maximum(out0 * att_s_ref[...] + att_bb_ref[...], 0.0)
            att_t = jnp.dot(att_w_ref[...], za)               # (Cin, hw) f32
            gate = (jnp.sum(att_t, axis=1, keepdims=True) * (1.0 / hw)
                    + att_b_ref[...])                         # (Cin, 1)
            gated = x * gate                                  # gate ORIGINAL x

            # -- nearest-neighbour 2x upsample (exact 0/1 selection matmul) ---
            up = jnp.dot(gated, up_sel_ref[...])              # (Cin, HW) f32

            # -- conv1 over virtual concat [up, skip] fused with identity 1x1
            zcat = jnp.concatenate(taps3x3(up, W, hi_l, hi_r)
                                   + taps3x3(skip, W, hi_l, hi_r), axis=0)
            r = (jnp.dot(c1id_w_ref[...], zcat, preferred_element_type=f32)
                 + c1id_b_ref[...])                           # (2*Cout, HW)
            y1 = jnp.maximum(r[:Cout], 0.0)                   # conv1 -> BN -> ReLU
            idy = r[Cout:]                                    # identity 1x1 (+bias)

            # -- conv2: conv3x3 (post-BN folded) -> ReLU -----------------------
            z9y = jnp.concatenate(taps3x3(y1, W, hi_l, hi_r), axis=0)
            y2 = jnp.maximum(
                jnp.dot(c2_w_ref[...], z9y, preferred_element_type=f32)
                + c2_b_ref[...], 0.0)                         # (Cout, HW)

            # -- residual add, lane-dense store --------------------------------
            o_ref[bl] = (y2 + idy).astype(o_ref.dtype)

    return kernel


# ---------------------------------------------------------------------------
# Public wrapper (NCHW in / NCHW out, only free reshapes at the boundary)
# ---------------------------------------------------------------------------

def _pack3x3(w_hwio, out_scale=None):
    """(3,3,Cin,Cout) HWIO -> (Cout, 9*Cin) bf16, tap-major, BN scale folded."""
    ww = w_hwio if out_scale is None else w_hwio * out_scale.reshape(1, 1, 1, -1)
    cout = ww.shape[-1]
    return jnp.transpose(ww, (3, 0, 1, 2)).reshape(cout, -1).astype(jnp.bfloat16)


def _col(v):
    return v.reshape(-1, 1).astype(jnp.float32)


@jax.jit
def decoder_block_forward(x_nchw, skip_nchw, p):
    B, Cin, h, w = x_nchw.shape
    _, Cskip, H, W = skip_nchw.shape
    Cout = p["c1_w"].shape[-1]
    assert H == 2 * h and W == 2 * w and H % 2 == 0 and W % 2 == 0
    hw, HW = h * w, H * W
    Ccat = Cin + Cskip

    # images per grid step (largest divisor of B that is <= 4)
    bt = next(d for d in (4, 3, 2, 1) if B % d == 0)

    # ---- host-side weight repacking ----------------------------------------
    w9e = _pack3x3(p["enc_w"])                                # (Cin, 9*Cskip)
    w9d = _pack3x3(p["dec_w"])                                # (Cin, 9*Cin)
    w2 = _pack3x3(p["c2_w"], p["c2_bn_s"])                    # (Cout, 9*Cout)
    # conv1 (post-BN folded) + identity 1x1, both over the [up, skip] concat
    w1u = _pack3x3(p["c1_w"][:, :, :Cin, :], p["c1_bn_s"])    # (Cout, 9*Cin)
    w1s = _pack3x3(p["c1_w"][:, :, Cin:, :], p["c1_bn_s"])    # (Cout, 9*Cskip)
    w1 = jnp.concatenate([w1u, w1s], axis=1)
    id_rows = jnp.zeros((Cout, 9 * Ccat), jnp.float32)
    id_rows = id_rows.at[:, 4 * Cin:5 * Cin].set(p["id_w"][:, :Cin])
    id_rows = id_rows.at[:, 9 * Cin + 4 * Cskip:9 * Cin + 5 * Cskip].set(
        p["id_w"][:, Cin:])
    w1id = jnp.concatenate([w1, id_rows.astype(jnp.bfloat16)], axis=0)
    b1id = jnp.concatenate([p["c1_bn_b"], p["id_b"]]).reshape(2 * Cout, 1)

    # exact 0/1 selection matrices: maxpool-2x2 decimation & nearest-2x upsample
    pidx = jnp.arange(HW)
    py, px = pidx // W, pidx % W
    q = jnp.arange(hw)
    pool_src = (2 * (q // w)) * W + 2 * (q % w)                         # (hw,)
    pool_sel = (pidx[:, None] == pool_src[None, :]).astype(jnp.float32)  # (HW, hw)
    up_src = (py // 2) * w + (px // 2)                                  # (HW,)
    up_sel = (q[:, None] == up_src[None, :]).astype(jnp.float32)        # (hw, HW)

    operands = [
        x_nchw.reshape(B, Cin, hw), skip_nchw.reshape(B, Cskip, HW),
        _col(p["enc_bn_s"]), _col(p["enc_bn_b"]), w9e, _col(p["enc_b"]),
        _col(p["dec_bn_s"]), _col(p["dec_bn_b"]), w9d, _col(p["dec_b"]),
        _col(p["attn_bn_s"]), _col(p["attn_bn_b"]),
        p["attn_w"].astype(jnp.float32), _col(p["attn_b"]),
        pool_sel, up_sel,
        w1id, b1id.astype(jnp.float32),
        w2, _col(p["c2_bn_b"]),
    ]

    def bcast_spec(a):   # whole-array block, identical for every grid step
        return pl.BlockSpec(a.shape, lambda b: (0,) * a.ndim)

    in_specs = ([pl.BlockSpec((bt, Cin, hw), lambda b: (b, 0, 0)),
                 pl.BlockSpec((bt, Cskip, HW), lambda b: (b, 0, 0))]
                + [bcast_spec(a) for a in operands[2:]])

    out = pl.pallas_call(
        _make_decoder_kernel(bt, h, w, H, W, Cin, Cskip, Cout),
        out_shape=jax.ShapeDtypeStruct((B, Cout, HW), jnp.float32),
        grid_spec=pltpu.PrefetchScalarGridSpec(
            num_scalar_prefetch=0,
            grid=(B // bt,),
            in_specs=in_specs,
            out_specs=pl.BlockSpec((bt, Cout, HW), lambda b: (b, 0, 0)),
        ),
        compiler_params=pltpu.CompilerParams(
            dimension_semantics=("parallel",)),
    )(*operands)
    return out.reshape(B, Cout, H, W)            # free reshape, still NCHW


# ---------------------------------------------------------------------------
# Pure-JAX reference (f32) for correctness checking
# ---------------------------------------------------------------------------

def _ref_forward(x, skip, p):
    relu = lambda z: jnp.maximum(z, 0.0)

    def bn(z, s, b):
        return z * s.reshape(1, -1, 1, 1) + b.reshape(1, -1, 1, 1)

    def conv3x3(z, w_hwio, bias=None):
        out = jax.lax.conv_general_dilated(
            z, w_hwio, window_strides=(1, 1), padding="SAME",
            dimension_numbers=("NCHW", "HWIO", "NCHW"))
        if bias is not None:
            out = out + bias.reshape(1, -1, 1, 1)
        return out

    ze = relu(bn(skip, p["enc_bn_s"], p["enc_bn_b"]))
    e = conv3x3(ze, p["enc_w"], p["enc_b"])
    pooled = jax.lax.reduce_window(e, -jnp.inf, jax.lax.max,
                                   (1, 1, 2, 2), (1, 1, 2, 2), "VALID")
    zd = relu(bn(x, p["dec_bn_s"], p["dec_bn_b"]))
    d = conv3x3(zd, p["dec_w"], p["dec_b"])
    out0 = pooled + d
    za = relu(bn(out0, p["attn_bn_s"], p["attn_bn_b"]))
    mean = jnp.mean(za, axis=(2, 3))                              # (B, Cin)
    gate = mean @ p["attn_w"].T + p["attn_b"]                     # (B, Cin)
    gated = x * gate[:, :, None, None]
    up = jnp.repeat(jnp.repeat(gated, 2, axis=2), 2, axis=3)
    cat = jnp.concatenate([up, skip], axis=1)
    y1 = relu(bn(conv3x3(cat, p["c1_w"]), p["c1_bn_s"], p["c1_bn_b"]))
    y2 = relu(bn(conv3x3(y1, p["c2_w"]), p["c2_bn_s"], p["c2_bn_b"]))
    identity = (jnp.einsum("oc,bchw->bohw", p["id_w"], cat)
                + p["id_b"].reshape(1, -1, 1, 1))
    return y2 + identity


# ---------------------------------------------------------------------------
# Deterministic synthetic parameters (BN in eval mode, folded to affine)
# ---------------------------------------------------------------------------

def _bn_affine(key, C, eps=1e-5):
    k1, k2, k3, k4 = jax.random.split(key, 4)
    gamma = 1.0 + 0.2 * jax.random.normal(k1, (C,), jnp.float32)
    beta = 0.1 * jax.random.normal(k2, (C,), jnp.float32)
    mean = 0.1 * jax.random.normal(k3, (C,), jnp.float32)
    var = 0.5 + jax.random.uniform(k4, (C,), jnp.float32)
    s = gamma / jnp.sqrt(var + eps)
    return s, beta - mean * s


def init_params(key, Cin, Cskip, Cout):
    ks = jax.random.split(key, 15)
    Ccat = Cin + Cskip
    p = {}
    # attention0.encoder_conv: BN -> ReLU -> conv3x3(bias) -> maxpool
    p["enc_bn_s"], p["enc_bn_b"] = _bn_affine(ks[0], Cskip)
    p["enc_w"] = 0.1 * jax.random.normal(ks[1], (3, 3, Cskip, Cin), jnp.float32)
    p["enc_b"] = 0.1 * jax.random.normal(ks[2], (Cin,), jnp.float32)
    # attention0.decoder_conv: BN -> ReLU -> conv3x3(bias)
    p["dec_bn_s"], p["dec_bn_b"] = _bn_affine(ks[3], Cin)
    p["dec_w"] = 0.1 * jax.random.normal(ks[4], (3, 3, Cin, Cin), jnp.float32)
    p["dec_b"] = 0.1 * jax.random.normal(ks[5], (Cin,), jnp.float32)
    # attention0.attn_conv: BN -> ReLU -> 1x1 conv(bias) -> global avg pool
    p["attn_bn_s"], p["attn_bn_b"] = _bn_affine(ks[6], Cin)
    p["attn_w"] = 0.1 * jax.random.normal(ks[7], (Cin, Cin), jnp.float32)   # [out,in]
    p["attn_b"] = 0.1 * jax.random.normal(ks[8], (Cin,), jnp.float32)
    # conv1 / conv2 (no conv bias; BN after conv)
    p["c1_w"] = 0.1 * jax.random.normal(ks[9], (3, 3, Ccat, Cout), jnp.float32)
    p["c1_bn_s"], p["c1_bn_b"] = _bn_affine(ks[10], Cout)
    p["c2_w"] = 0.1 * jax.random.normal(ks[11], (3, 3, Cout, Cout), jnp.float32)
    p["c2_bn_s"], p["c2_bn_b"] = _bn_affine(ks[12], Cout)
    # identity_conv (1x1 with bias)
    p["id_w"] = 0.1 * jax.random.normal(ks[13], (Cout, Ccat), jnp.float32)  # [out,in]
    p["id_b"] = 0.1 * jax.random.normal(ks[14], (Cout,), jnp.float32)
    return p


# ---------------------------------------------------------------------------

if __name__ == "__main__":
    B, Cin, Cskip, Cout = 2, 8, 8, 16
    h = w = 8          # decoder (low-res) spatial
    H = W = 16         # skip (high-res) spatial; must be 2x of x

    key = jax.random.PRNGKey(0)
    kx, ksk, kp = jax.random.split(key, 3)
    x = jax.random.normal(kx, (B, Cin, h, w), jnp.float32)        # NCHW
    skip = jax.random.normal(ksk, (B, Cskip, H, W), jnp.float32)  # NCHW
    params = init_params(kp, Cin, Cskip, Cout)

    out = decoder_block_forward(x, skip, params)
    out = jax.block_until_ready(out)
    assert out.shape == (B, Cout, H, W), out.shape
    assert bool(jnp.all(jnp.isfinite(out)))

    # Correctness vs. pure-JAX f32 reference (kernel uses bf16 MXU operands).
    ref = _ref_forward(x, skip, params)
    err = float(jnp.max(jnp.abs(out - ref)))
    assert err < 0.2, f"max abs error vs reference: {err}"
    print("KERNEL_OK")
</pallas_src>

<mosaic_0001>
module attributes {stable_mosaic.version = 11 : i64} {
  func.func @kernel(%arg0: i32, %arg1: memref<2x8x64xf32, #tpu.memory_space<vmem>>, %arg2: memref<2x8x256xf32, #tpu.memory_space<vmem>>, %arg3: memref<8x1xf32, #tpu.memory_space<vmem>>, %arg4: memref<8x1xf32, #tpu.memory_space<vmem>>, %arg5: memref<8x72xbf16, #tpu.memory_space<vmem>>, %arg6: memref<8x1xf32, #tpu.memory_space<vmem>>, %arg7: memref<8x1xf32, #tpu.memory_space<vmem>>, %arg8: memref<8x1xf32, #tpu.memory_space<vmem>>, %arg9: memref<8x72xbf16, #tpu.memory_space<vmem>>, %arg10: memref<8x1xf32, #tpu.memory_space<vmem>>, %arg11: memref<8x1xf32, #tpu.memory_space<vmem>>, %arg12: memref<8x1xf32, #tpu.memory_space<vmem>>, %arg13: memref<8x8xf32, #tpu.memory_space<vmem>>, %arg14: memref<8x1xf32, #tpu.memory_space<vmem>>, %arg15: memref<256x64xf32, #tpu.memory_space<vmem>>, %arg16: memref<64x256xf32, #tpu.memory_space<vmem>>, %arg17: memref<32x144xbf16, #tpu.memory_space<vmem>>, %arg18: memref<32x1xf32, #tpu.memory_space<vmem>>, %arg19: memref<16x144xbf16, #tpu.memory_space<vmem>>, %arg20: memref<16x1xf32, #tpu.memory_space<vmem>>, %arg21: memref<2x16x256xf32, #tpu.memory_space<vmem>>) attributes {dimension_semantics = [#tpu.dimension_semantics<parallel>], iteration_bounds = array<i64: 1>, scalar_prefetch = 0 : i64, scratch_operands = 0 : i64, tpu.core_type = #tpu.core_type<tc>, window_params = [{transform_indices = @transform_0, window_bounds = array<i64: 2, 8, 64>}, {transform_indices = @transform_1, window_bounds = array<i64: 2, 8, 256>}, {pipeline_mode = #tpu.pipeline_mode<synchronous>, transform_indices = @transform_2, window_bounds = array<i64: 8, 1>}, {pipeline_mode = #tpu.pipeline_mode<synchronous>, transform_indices = @transform_3, window_bounds = array<i64: 8, 1>}, {pipeline_mode = #tpu.pipeline_mode<synchronous>, transform_indices = @transform_4, window_bounds = array<i64: 8, 72>}, {pipeline_mode = #tpu.pipeline_mode<synchronous>, transform_indices = @transform_5, window_bounds = array<i64: 8, 1>}, {pipeline_mode = #tpu.pipeline_mode<synchronous>, transform_indices = @transform_6, window_bounds = array<i64: 8, 1>}, {pipeline_mode = #tpu.pipeline_mode<synchronous>, transform_indices = @transform_7, window_bounds = array<i64: 8, 1>}, {pipeline_mode = #tpu.pipeline_mode<synchronous>, transform_indices = @transform_8, window_bounds = array<i64: 8, 72>}, {pipeline_mode = #tpu.pipeline_mode<synchronous>, transform_indices = @transform_9, window_bounds = array<i64: 8, 1>}, {pipeline_mode = #tpu.pipeline_mode<synchronous>, transform_indices = @transform_10, window_bounds = array<i64: 8, 1>}, {pipeline_mode = #tpu.pipeline_mode<synchronous>, transform_indices = @transform_11, window_bounds = array<i64: 8, 1>}, {pipeline_mode = #tpu.pipeline_mode<synchronous>, transform_indices = @transform_12, window_bounds = array<i64: 8, 8>}, {pipeline_mode = #tpu.pipeline_mode<synchronous>, transform_indices = @transform_13, window_bounds = array<i64: 8, 1>}, {pipeline_mode = #tpu.pipeline_mode<synchronous>, transform_indices = @transform_14, window_bounds = array<i64: 256, 64>}, {pipeline_mode = #tpu.pipeline_mode<synchronous>, transform_indices = @transform_15, window_bounds = array<i64: 64, 256>}, {pipeline_mode = #tpu.pipeline_mode<synchronous>, transform_indices = @transform_16, window_bounds = array<i64: 32, 144>}, {pipeline_mode = #tpu.pipeline_mode<synchronous>, transform_indices = @transform_17, window_bounds = array<i64: 32, 1>}, {pipeline_mode = #tpu.pipeline_mode<synchronous>, transform_indices = @transform_18, window_bounds = array<i64: 16, 144>}, {pipeline_mode = #tpu.pipeline_mode<synchronous>, transform_indices = @transform_19, window_bounds = array<i64: 16, 1>}, {transform_indices = @transform_20, window_bounds = array<i64: 2, 16, 256>}]} {
    %0 = tpu.iota {dimensions = array<i32: 1>} : vector<1x256xi32>
    %c16_i32 = arith.constant 16 : i32
    %c0_i32 = arith.constant 0 : i32
    %1 = arith.cmpi eq, %c16_i32, %c0_i32 : i32
    %c1_i32 = arith.constant 1 : i32
    %2 = arith.select %1, %c1_i32, %c16_i32 : i32
    %3 = vector.broadcast %2 : i32 to vector<1x256xi32>
    %4 = arith.remsi %0, %3 : vector<1x256xi32>
    %c0_i32_0 = arith.constant 0 : i32
    %5 = vector.broadcast %c0_i32_0 : i32 to vector<1x256xi32>
    %6 = arith.cmpi ne, %4, %5 : vector<1x256xi32>
    %c0_i32_1 = arith.constant 0 : i32
    %7 = vector.broadcast %c0_i32_1 : i32 to vector<1x256xi32>
    %8 = arith.cmpi slt, %4, %7 : vector<1x256xi32>
    %c0_i32_2 = arith.constant 0 : i32
    %9 = arith.cmpi slt, %2, %c0_i32_2 : i32
    %10 = vector.broadcast %9 : i1 to vector<1x256xi1>
    %11 = vector.broadcast %10 : vector<1x256xi1> to vector<1x256xi1>
    %12 = arith.xori %8, %11 : vector<1x256xi1>
    %13 = arith.andi %12, %6 : vector<1x256xi1>
    %14 = vector.broadcast %2 : i32 to vector<1x256xi32>
    %15 = arith.addi %4, %14 : vector<1x256xi32>
    %16 = arith.select %13, %15, %4 : vector<1x256xi1>, vector<1x256xi32>
    %c1_i32_3 = arith.constant 1 : i32
    %17 = vector.broadcast %c1_i32_3 : i32 to vector<1x256xi32>
    %18 = arith.cmpi sge, %16, %17 : vector<1x256xi32>
    %c14_i32 = arith.constant 14 : i32
    %19 = vector.broadcast %c14_i32 : i32 to vector<1x256xi32>
    %20 = arith.cmpi sle, %16, %19 : vector<1x256xi32>
    %21 = tpu.iota {dimensions = array<i32: 1>} : vector<1x64xi32>
    %c8_i32 = arith.constant 8 : i32
    %c0_i32_4 = arith.constant 0 : i32
    %22 = arith.cmpi eq, %c8_i32, %c0_i32_4 : i32
    %c1_i32_5 = arith.constant 1 : i32
    %23 = arith.select %22, %c1_i32_5, %c8_i32 : i32
    %24 = vector.broadcast %23 : i32 to vector<1x64xi32>
    %25 = arith.remsi %21, %24 : vector<1x64xi32>
    %c0_i32_6 = arith.constant 0 : i32
    %26 = vector.broadcast %c0_i32_6 : i32 to vector<1x64xi32>
    %27 = arith.cmpi ne, %25, %26 : vector<1x64xi32>
    %c0_i32_7 = arith.constant 0 : i32
    %28 = vector.broadcast %c0_i32_7 : i32 to vector<1x64xi32>
    %29 = arith.cmpi slt, %25, %28 : vector<1x64xi32>
    %c0_i32_8 = arith.constant 0 : i32
    %30 = arith.cmpi slt, %23, %c0_i32_8 : i32
    %31 = vector.broadcast %30 : i1 to vector<1x64xi1>
    %32 = vector.broadcast %31 : vector<1x64xi1> to vector<1x64xi1>
    %33 = arith.xori %29, %32 : vector<1x64xi1>
    %34 = arith.andi %33, %27 : vector<1x64xi1>
    %35 = vector.broadcast %23 : i32 to vector<1x64xi32>
    %36 = arith.addi %25, %35 : vector<1x64xi32>
    %37 = arith.select %34, %36, %25 : vector<1x64xi1>, vector<1x64xi32>
    %c1_i32_9 = arith.constant 1 : i32
    %38 = vector.broadcast %c1_i32_9 : i32 to vector<1x64xi32>
    %39 = arith.cmpi sge, %37, %38 : vector<1x64xi32>
    %c6_i32 = arith.constant 6 : i32
    %40 = vector.broadcast %c6_i32 : i32 to vector<1x64xi32>
    %41 = arith.cmpi sle, %37, %40 : vector<1x64xi32>
    %c0 = arith.constant 0 : index
    %c0_10 = arith.constant 0 : index
    %c0_11 = arith.constant 0 : index
    %42 = vector.load %arg1[%c0, %c0_10, %c0_11] : memref<2x8x64xf32, #tpu.memory_space<vmem>>, vector<1x8x64xf32>
    %43 = vector.shape_cast %42 : vector<1x8x64xf32> to vector<8x64xf32>
    %c0_12 = arith.constant 0 : index
    %c0_13 = arith.constant 0 : index
    %c0_14 = arith.constant 0 : index
    %44 = vector.load %arg2[%c0_12, %c0_13, %c0_14] : memref<2x8x256xf32, #tpu.memory_space<vmem>>, vector<1x8x256xf32>
    %45 = vector.shape_cast %44 : vector<1x8x256xf32> to vector<8x256xf32>
    %c0_15 = arith.constant 0 : index
    %c0_16 = arith.constant 0 : index
    %46 = vector.load %arg3[%c0_15, %c0_16] : memref<8x1xf32, #tpu.memory_space<vmem>>, vector<8x1xf32>
    %47 = vector.broadcast %46 : vector<8x1xf32> to vector<8x256xf32>
    %48 = arith.mulf %45, %47 : vector<8x256xf32>
    %c0_17 = arith.constant 0 : index
    %c0_18 = arith.constant 0 : index
    %49 = vector.load %arg4[%c0_17, %c0_18] : memref<8x1xf32, #tpu.memory_space<vmem>>, vector<8x1xf32>
    %50 = vector.broadcast %49 : vector<8x1xf32> to vector<8x256xf32>
    %51 = arith.addf %48, %50 : vector<8x256xf32>
    %cst = arith.constant 0.000000e+00 : f32
    %52 = vector.broadcast %cst : f32 to vector<8x256xf32>
    %53 = arith.maximumf %51, %52 : vector<8x256xf32>
    %54 = arith.truncf %53 : vector<8x256xf32> to vector<8x256xbf16>
    %cst_19 = arith.constant 0.000000e+00 : bf16
    %55 = vector.broadcast %cst_19 : bf16 to vector<8x17xbf16>
    %56 = vector.extract_strided_slice %54 {offsets = [0, 0], sizes = [8, 239], strides = [1, 1]} : vector<8x256xbf16> to vector<8x239xbf16>
    %57 = tpu.concatenate %55, %56 in 1 : vector<8x17xbf16>, vector<8x239xbf16> -> vector<8x256xbf16>
    %cst_20 = arith.constant 0.000000e+00 : bf16
    %58 = vector.broadcast %cst_20 : bf16 to vector<8x256xbf16>
    %59 = vector.shape_cast %18 : vector<1x256xi1> to vector<1x256xi1>
    %60 = vector.broadcast %59 : vector<1x256xi1> to vector<8x256xi1>
    %61 = arith.select %60, %57, %58 : vector<8x256xi1>, vector<8x256xbf16>
    %cst_21 = arith.constant 0.000000e+00 : bf16
    %62 = vector.broadcast %cst_21 : bf16 to vector<8x16xbf16>
    %63 = vector.extract_strided_slice %54 {offsets = [0, 0], sizes = [8, 240], strides = [1, 1]} : vector<8x256xbf16> to vector<8x240xbf16>
    %64 = tpu.concatenate %62, %63 in 1 : vector<8x16xbf16>, vector<8x240xbf16> -> vector<8x256xbf16>
    %cst_22 = arith.constant 0.000000e+00 : bf16
    %65 = vector.broadcast %cst_22 : bf16 to vector<8x15xbf16>
    %66 = vector.extract_strided_slice %54 {offsets = [0, 0], sizes = [8, 241], strides = [1, 1]} : vector<8x256xbf16> to vector<8x241xbf16>
    %67 = tpu.concatenate %65, %66 in 1 : vector<8x15xbf16>, vector<8x241xbf16> -> vector<8x256xbf16>
    %cst_23 = arith.constant 0.000000e+00 : bf16
    %68 = vector.broadcast %cst_23 : bf16 to vector<8x256xbf16>
    %69 = vector.shape_cast %20 : vector<1x256xi1> to vector<1x256xi1>
    %70 = vector.broadcast %69 : vector<1x256xi1> to vector<8x256xi1>
    %71 = arith.select %70, %67, %68 : vector<8x256xi1>, vector<8x256xbf16>
    %cst_24 = arith.constant 0.000000e+00 : bf16
    %72 = vector.broadcast %cst_24 : bf16 to vector<8x1xbf16>
    %73 = vector.extract_strided_slice %54 {offsets = [0, 0], sizes = [8, 255], strides = [1, 1]} : vector<8x256xbf16> to vector<8x255xbf16>
    %74 = tpu.concatenate %72, %73 in 1 : vector<8x1xbf16>, vector<8x255xbf16> -> vector<8x256xbf16>
    %cst_25 = arith.constant 0.000000e+00 : bf16
    %75 = vector.broadcast %cst_25 : bf16 to vector<8x256xbf16>
    %76 = vector.shape_cast %18 : vector<1x256xi1> to vector<1x256xi1>
    %77 = vector.broadcast %76 : vector<1x256xi1> to vector<8x256xi1>
    %78 = arith.select %77, %74, %75 : vector<8x256xi1>, vector<8x256xbf16>
    %cst_26 = arith.constant 0.000000e+00 : bf16
    %79 = vector.broadcast %cst_26 : bf16 to vector<8x1xbf16>
    %80 = vector.extract_strided_slice %54 {offsets = [0, 1], sizes = [8, 255], strides = [1, 1]} : vector<8x256xbf16> to vector<8x255xbf16>
    %81 = tpu.concatenate %80, %79 in 1 : vector<8x255xbf16>, vector<8x1xbf16> -> vector<8x256xbf16>
    %cst_27 = arith.constant 0.000000e+00 : bf16
    %82 = vector.broadcast %cst_27 : bf16 to vector<8x256xbf16>
    %83 = vector.shape_cast %20 : vector<1x256xi1> to vector<1x256xi1>
    %84 = vector.broadcast %83 : vector<1x256xi1> to vector<8x256xi1>
    %85 = arith.select %84, %81, %82 : vector<8x256xi1>, vector<8x256xbf16>
    %cst_28 = arith.constant 0.000000e+00 : bf16
    %86 = vector.broadcast %cst_28 : bf16 to vector<8x15xbf16>
    %87 = vector.extract_strided_slice %54 {offsets = [0, 15], sizes = [8, 241], strides = [1, 1]} : vector<8x256xbf16> to vector<8x241xbf16>
    %88 = tpu.concatenate %87, %86 in 1 : vector<8x241xbf16>, vector<8x15xbf16> -> vector<8x256xbf16>
    %cst_29 = arith.constant 0.000000e+00 : bf16
    %89 = vector.broadcast %cst_29 : bf16 to vector<8x256xbf16>
    %90 = vector.shape_cast %18 : vector<1x256xi1> to vector<1x256xi1>
    %91 = vector.broadcast %90 : vector<1x256xi1> to vector<8x256xi1>
    %92 = arith.select %91, %88, %89 : vector<8x256xi1>, vector<8x256xbf16>
    %cst_30 = arith.constant 0.000000e+00 : bf16
    %93 = vector.broadcast %cst_30 : bf16 to vector<8x16xbf16>
    %94 = vector.extract_strided_slice %54 {offsets = [0, 16], sizes = [8, 240], strides = [1, 1]} : vector<8x256xbf16> to vector<8x240xbf16>
    %95 = tpu.concatenate %94, %93 in 1 : vector<8x240xbf16>, vector<8x16xbf16> -> vector<8x256xbf16>
    %cst_31 = arith.constant 0.000000e+00 : bf16
    %96 = vector.broadcast %cst_31 : bf16 to vector<8x17xbf16>
    %97 = vector.extract_strided_slice %54 {offsets = [0, 17], sizes = [8, 239], strides = [1, 1]} : vector<8x256xbf16> to vector<8x239xbf16>
    %98 = tpu.concatenate %97, %96 in 1 : vector<8x239xbf16>, vector<8x17xbf16> -> vector<8x256xbf16>
    %cst_32 = arith.constant 0.000000e+00 : bf16
    %99 = vector.broadcast %cst_32 : bf16 to vector<8x256xbf16>
    %100 = vector.shape_cast %20 : vector<1x256xi1> to vector<1x256xi1>
    %101 = vector.broadcast %100 : vector<1x256xi1> to vector<8x256xi1>
    %102 = arith.select %101, %98, %99 : vector<8x256xi1>, vector<8x256xbf16>
    %103 = tpu.concatenate %61, %64, %71, %78, %54, %85, %92, %95, %102 in 0 : vector<8x256xbf16>, vector<8x256xbf16>, vector<8x256xbf16>, vector<8x256xbf16>, vector<8x256xbf16>, vector<8x256xbf16>, vector<8x256xbf16>, vector<8x256xbf16>, vector<8x256xbf16> -> vector<72x256xbf16>
    %c0_33 = arith.constant 0 : index
    %c0_34 = arith.constant 0 : index
    %104 = vector.load %arg5[%c0_33, %c0_34] : memref<8x72xbf16, #tpu.memory_space<vmem>>, vector<8x72xbf16>
    %cst_35 = arith.constant dense<0.000000e+00> : vector<8x256xf32>
    %105 = tpu.matmul %104, %103, %cst_35 {dimension_numbers = #tpu.dot_dimension_numbers<[1], [0], [0], [1], [0, 0, 1, 1], [], []>} : vector<8x72xbf16>, vector<72x256xbf16>, vector<8x256xf32> -> vector<8x256xf32>
    %c0_36 = arith.constant 0 : index
    %c0_37 = arith.constant 0 : index
    %106 = vector.load %arg6[%c0_36, %c0_37] : memref<8x1xf32, #tpu.memory_space<vmem>>, vector<8x1xf32>
    %107 = vector.broadcast %106 : vector<8x1xf32> to vector<8x256xf32>
    %108 = arith.addf %105, %107 : vector<8x256xf32>
    %cst_38 = arith.constant 0.000000e+00 : f32
    %109 = vector.broadcast %cst_38 : f32 to vector<8x1xf32>
    %110 = vector.extract_strided_slice %108 {offsets = [0, 1], sizes = [8, 255], strides = [1, 1]} : vector<8x256xf32> to vector<8x255xf32>
    %111 = tpu.concatenate %110, %109 in 1 : vector<8x255xf32>, vector<8x1xf32> -> vector<8x256xf32>
    %112 = arith.maximumf %108, %111 : vector<8x256xf32>
    %cst_39 = arith.constant 0.000000e+00 : f32
    %113 = vector.broadcast %cst_39 : f32 to vector<8x16xf32>
    %114 = vector.extract_strided_slice %112 {offsets = [0, 16], sizes = [8, 240], strides = [1, 1]} : vector<8x256xf32> to vector<8x240xf32>
    %115 = tpu.concatenate %114, %113 in 1 : vector<8x240xf32>, vector<8x16xf32> -> vector<8x256xf32>
    %116 = arith.maximumf %112, %115 : vector<8x256xf32>
    %c0_40 = arith.constant 0 : index
    %c0_41 = arith.constant 0 : index
    %117 = vector.load %arg15[%c0_40, %c0_41] : memref<256x64xf32, #tpu.memory_space<vmem>>, vector<256x64xf32>
    %cst_42 = arith.constant dense<0.000000e+00> : vector<8x64xf32>
    %118 = tpu.matmul %116, %117, %cst_42 {dimension_numbers = #tpu.dot_dimension_numbers<[1], [0], [0], [1], [0, 0, 1, 1], [], []>} : vector<8x256xf32>, vector<256x64xf32>, vector<8x64xf32> -> vector<8x64xf32>
    %c0_43 = arith.constant 0 : index
    %c0_44 = arith.constant 0 : index
    %119 = vector.load %arg7[%c0_43, %c0_44] : memref<8x1xf32, #tpu.memory_space<vmem>>, vector<8x1xf32>
    %120 = vector.broadcast %119 : vector<8x1xf32> to vector<8x64xf32>
    %121 = arith.mulf %43, %120 : vector<8x64xf32>
    %c0_45 = arith.constant 0 : index
    %c0_46 = arith.constant 0 : index
    %122 = vector.load %arg8[%c0_45, %c0_46] : memref<8x1xf32, #tpu.memory_space<vmem>>, vector<8x1xf32>
    %123 = vector.broadcast %122 : vector<8x1xf32> to vector<8x64xf32>
    %124 = arith.addf %121, %123 : vector<8x64xf32>
    %cst_47 = arith.constant 0.000000e+00 : f32
    %125 = vector.broadcast %cst_47 : f32 to vector<8x64xf32>
    %126 = arith.maximumf %124, %125 : vector<8x64xf32>
    %127 = arith.truncf %126 : vector<8x64xf32> to vector<8x64xbf16>
    %cst_48 = arith.constant 0.000000e+00 : bf16
    %128 = vector.broadcast %cst_48 : bf16 to vector<8x9xbf16>
    %129 = vector.extract_strided_slice %127 {offsets = [0, 0], sizes = [8, 55], strides = [1, 1]} : vector<8x64xbf16> to vector<8x55xbf16>
    %130 = tpu.concatenate %128, %129 in 1 : vector<8x9xbf16>, vector<8x55xbf16> -> vector<8x64xbf16>
    %cst_49 = arith.constant 0.000000e+00 : bf16
    %131 = vector.broadcast %cst_49 : bf16 to vector<8x64xbf16>
    %132 = vector.shape_cast %39 : vector<1x64xi1> to vector<1x64xi1>
    %133 = vector.broadcast %132 : vector<1x64xi1> to vector<8x64xi1>
    %134 = arith.select %133, %130, %131 : vector<8x64xi1>, vector<8x64xbf16>
    %cst_50 = arith.constant 0.000000e+00 : bf16
    %135 = vector.broadcast %cst_50 : bf16 to vector<8x8xbf16>
    %136 = vector.extract_strided_slice %127 {offsets = [0, 0], sizes = [8, 56], strides = [1, 1]} : vector<8x64xbf16> to vector<8x56xbf16>
    %137 = tpu.concatenate %135, %136 in 1 : vector<8x8xbf16>, vector<8x56xbf16> -> vector<8x64xbf16>
    %cst_51 = arith.constant 0.000000e+00 : bf16
    %138 = vector.broadcast %cst_51 : bf16 to vector<8x7xbf16>
    %139 = vector.extract_strided_slice %127 {offsets = [0, 0], sizes = [8, 57], strides = [1, 1]} : vector<8x64xbf16> to vector<8x57xbf16>
    %140 = tpu.concatenate %138, %139 in 1 : vector<8x7xbf16>, vector<8x57xbf16> -> vector<8x64xbf16>
    %cst_52 = arith.constant 0.000000e+00 : bf16
    %141 = vector.broadcast %cst_52 : bf16 to vector<8x64xbf16>
    %142 = vector.shape_cast %41 : vector<1x64xi1> to vector<1x64xi1>
    %143 = vector.broadcast %142 : vector<1x64xi1> to vector<8x64xi1>
    %144 = arith.select %143, %140, %141 : vector<8x64xi1>, vector<8x64xbf16>
    %cst_53 = arith.constant 0.000000e+00 : bf16
    %145 = vector.broadcast %cst_53 : bf16 to vector<8x1xbf16>
    %146 = vector.extract_strided_slice %127 {offsets = [0, 0], sizes = [8, 63], strides = [1, 1]} : vector<8x64xbf16> to vector<8x63xbf16>
    %147 = tpu.concatenate %145, %146 in 1 : vector<8x1xbf16>, vector<8x63xbf16> -> vector<8x64xbf16>
    %cst_54 = arith.constant 0.000000e+00 : bf16
    %148 = vector.broadcast %cst_54 : bf16 to vector<8x64xbf16>
    %149 = vector.shape_cast %39 : vector<1x64xi1> to vector<1x64xi1>
    %150 = vector.broadcast %149 : vector<1x64xi1> to vector<8x64xi1>
    %151 = arith.select %150, %147, %148 : vector<8x64xi1>, vector<8x64xbf16>
    %cst_55 = arith.constant 0.000000e+00 : bf16
    %152 = vector.broadcast %cst_55 : bf16 to vector<8x1xbf16>
    %153 = vector.extract_strided_slice %127 {offsets = [0, 1], sizes = [8, 63], strides = [1, 1]} : vector<8x64xbf16> to vector<8x63xbf16>
    %154 = tpu.concatenate %153, %152 in 1 : vector<8x63xbf16>, vector<8x1xbf16> -> vector<8x64xbf16>
    %cst_56 = arith.constant 0.000000e+00 : bf16
    %155 = vector.broadcast %cst_56 : bf16 to vector<8x64xbf16>
    %156 = vector.shape_cast %41 : vector<1x64xi1> to vector<1x64xi1>
    %157 = vector.broadcast %156 : vector<1x64xi1> to vector<8x64xi1>
    %158 = arith.select %157, %154, %155 : vector<8x64xi1>, vector<8x64xbf16>
    %cst_57 = arith.constant 0.000000e+00 : bf16
    %159 = vector.broadcast %cst_57 : bf16 to vector<8x7xbf16>
    %160 = vector.extract_strided_slice %127 {offsets = [0, 7], sizes = [8, 57], strides = [1, 1]} : vector<8x64xbf16> to vector<8x57xbf16>
    %161 = tpu.concatenate %160, %159 in 1 : vector<8x57xbf16>, vector<8x7xbf16> -> vector<8x64xbf16>
    %cst_58 = arith.constant 0.000000e+00 : bf16
    %162 = vector.broadcast %cst_58 : bf16 to vector<8x64xbf16>
    %163 = vector.shape_cast %39 : vector<1x64xi1> to vector<1x64xi1>
    %164 = vector.broadcast %163 : vector<1x64xi1> to vector<8x64xi1>
    %165 = arith.select %164, %161, %162 : vector<8x64xi1>, vector<8x64xbf16>
    %cst_59 = arith.constant 0.000000e+00 : bf16
    %166 = vector.broadcast %cst_59 : bf16 to vector<8x8xbf16>
    %167 = vector.extract_strided_slice %127 {offsets = [0, 8], sizes = [8, 56], strides = [1, 1]} : vector<8x64xbf16> to vector<8x56xbf16>
    %168 = tpu.concatenate %167, %166 in 1 : vector<8x56xbf16>, vector<8x8xbf16> -> vector<8x64xbf16>
    %cst_60 = arith.constant 0.000000e+00 : bf16
    %169 = vector.broadcast %cst_60 : bf16 to vector<8x9xbf16>
    %170 = vector.extract_strided_slice %127 {offsets = [0, 9], sizes = [8, 55], strides = [1, 1]} : vector<8x64xbf16> to vector<8x55xbf16>
    %171 = tpu.concatenate %170, %169 in 1 : vector<8x55xbf16>, vector<8x9xbf16> -> vector<8x64xbf16>
    %cst_61 = arith.constant 0.000000e+00 : bf16
    %172 = vector.broadcast %cst_61 : bf16 to vector<8x64xbf16>
    %173 = vector.shape_cast %41 : vector<1x64xi1> to vector<1x64xi1>
    %174 = vector.broadcast %173 : vector<1x64xi1> to vector<8x64xi1>
    %175 = arith.select %174, %171, %172 : vector<8x64xi1>, vector<8x64xbf16>
    %176 = tpu.concatenate %134, %137, %144, %151, %127, %158, %165, %168, %175 in 0 : vector<8x64xbf16>, vector<8x64xbf16>, vector<8x64xbf16>, vector<8x64xbf16>, vector<8x64xbf16>, vector<8x64xbf16>, vector<8x64xbf16>, vector<8x64xbf16>, vector<8x64xbf16> -> vector<72x64xbf16>
    %c0_62 = arith.constant 0 : index
    %c0_63 = arith.constant 0 : index
    %177 = vector.load %arg9[%c0_62, %c0_63] : memref<8x72xbf16, #tpu.memory_space<vmem>>, vector<8x72xbf16>
    %cst_64 = arith.constant dense<0.000000e+00> : vector<8x64xf32>
    %178 = tpu.matmul %177, %176, %cst_64 {dimension_numbers = #tpu.dot_dimension_numbers<[1], [0], [0], [1], [0, 0, 1, 1], [], []>} : vector<8x72xbf16>, vector<72x64xbf16>, vector<8x64xf32> -> vector<8x64xf32>
    %c0_65 = arith.constant 0 : index
    %c0_66 = arith.constant 0 : index
    %179 = vector.load %arg10[%c0_65, %c0_66] : memref<8x1xf32, #tpu.memory_space<vmem>>, vector<8x1xf32>
    %180 = vector.broadcast %179 : vector<8x1xf32> to vector<8x64xf32>
    %181 = arith.addf %178, %180 : vector<8x64xf32>
    %182 = arith.addf %118, %181 : vector<8x64xf32>
    %c0_67 = arith.constant 0 : index
    %c0_68 = arith.constant 0 : index
    %183 = vector.load %arg11[%c0_67, %c0_68] : memref<8x1xf32, #tpu.memory_space<vmem>>, vector<8x1xf32>
    %184 = vector.broadcast %183 : vector<8x1xf32> to vector<8x64xf32>
    %185 = arith.mulf %182, %184 : vector<8x64xf32>
    %c0_69 = arith.constant 0 : index
    %c0_70 = arith.constant 0 : index
    %186 = vector.load %arg12[%c0_69, %c0_70] : memref<8x1xf32, #tpu.memory_space<vmem>>, vector<8x1xf32>
    %187 = vector.broadcast %186 : vector<8x1xf32> to vector<8x64xf32>
    %188 = arith.addf %185, %187 : vector<8x64xf32>
    %cst_71 = arith.constant 0.000000e+00 : f32
    %189 = vector.broadcast %cst_71 : f32 to vector<8x64xf32>
    %190 = arith.maximumf %188, %189 : vector<8x64xf32>
    %c0_72 = arith.constant 0 : index
    %c0_73 = arith.constant 0 : index
    %191 = vector.load %arg13[%c0_72, %c0_73] : memref<8x8xf32, #tpu.memory_space<vmem>>, vector<8x8xf32>
    %cst_74 = arith.constant dense<0.000000e+00> : vector<8x64xf32>
    %192 = tpu.matmul %191, %190, %cst_74 {dimension_numbers = #tpu.dot_dimension_numbers<[1], [0], [0], [1], [0, 0, 1, 1], [], []>} : vector<8x8xf32>, vector<8x64xf32>, vector<8x64xf32> -> vector<8x64xf32>
    %cst_75 = arith.constant dense<0.000000e+00> : vector<8xf32>
    %193 = vector.multi_reduction <add>, %192, %cst_75 [1] : vector<8x64xf32> to vector<8xf32>
    %194 = vector.shape_cast %193 : vector<8xf32> to vector<8x1xf32>
    %cst_76 = arith.constant 1.562500e-02 : f32
    %195 = vector.broadcast %cst_76 : f32 to vector<8x1xf32>
    %196 = arith.mulf %194, %195 : vector<8x1xf32>
    %c0_77 = arith.constant 0 : index
    %c0_78 = arith.constant 0 : index
    %197 = vector.load %arg14[%c0_77, %c0_78] : memref<8x1xf32, #tpu.memory_space<vmem>>, vector<8x1xf32>
    %198 = arith.addf %196, %197 : vector<8x1xf32>
    %199 = vector.broadcast %198 : vector<8x1xf32> to vector<8x64xf32>
    %200 = arith.mulf %43, %199 : vector<8x64xf32>
    %c0_79 = arith.constant 0 : index
    %c0_80 = arith.constant 0 : index
    %201 = vector.load %arg16[%c0_79, %c0_80] : memref<64x256xf32, #tpu.memory_space<vmem>>, vector<64x256xf32>
    %cst_81 = arith.constant dense<0.000000e+00> : vector<8x256xf32>
    %202 = tpu.matmul %200, %201, %cst_81 {dimension_numbers = #tpu.dot_dimension_numbers<[1], [0], [0], [1], [0, 0, 1, 1], [], []>} : vector<8x64xf32>, vector<64x256xf32>, vector<8x256xf32> -> vector<8x256xf32>
    %203 = arith.truncf %202 : vector<8x256xf32> to vector<8x256xbf16>
    %cst_82 = arith.constant 0.000000e+00 : bf16
    %204 = vector.broadcast %cst_82 : bf16 to vector<8x17xbf16>
    %205 = vector.extract_strided_slice %203 {offsets = [0, 0], sizes = [8, 239], strides = [1, 1]} : vector<8x256xbf16> to vector<8x239xbf16>
    %206 = tpu.concatenate %204, %205 in 1 : vector<8x17xbf16>, vector<8x239xbf16> -> vector<8x256xbf16>
    %cst_83 = arith.constant 0.000000e+00 : bf16
    %207 = vector.broadcast %cst_83 : bf16 to vector<8x256xbf16>
    %208 = vector.shape_cast %18 : vector<1x256xi1> to vector<1x256xi1>
    %209 = vector.broadcast %208 : vector<1x256xi1> to vector<8x256xi1>
    %210 = arith.select %209, %206, %207 : vector<8x256xi1>, vector<8x256xbf16>
    %cst_84 = arith.constant 0.000000e+00 : bf16
    %211 = vector.broadcast %cst_84 : bf16 to vector<8x16xbf16>
    %212 = vector.extract_strided_slice %203 {offsets = [0, 0], sizes = [8, 240], strides = [1, 1]} : vector<8x256xbf16> to vector<8x240xbf16>
    %213 = tpu.concatenate %211, %212 in 1 : vector<8x16xbf16>, vector<8x240xbf16> -> vector<8x256xbf16>
    %cst_85 = arith.constant 0.000000e+00 : bf16
    %214 = vector.broadcast %cst_85 : bf16 to vector<8x15xbf16>
    %215 = vector.extract_strided_slice %203 {offsets = [0, 0], sizes = [8, 241], strides = [1, 1]} : vector<8x256xbf16> to vector<8x241xbf16>
    %216 = tpu.concatenate %214, %215 in 1 : vector<8x15xbf16>, vector<8x241xbf16> -> vector<8x256xbf16>
    %cst_86 = arith.constant 0.000000e+00 : bf16
    %217 = vector.broadcast %cst_86 : bf16 to vector<8x256xbf16>
    %218 = vector.shape_cast %20 : vector<1x256xi1> to vector<1x256xi1>
    %219 = vector.broadcast %218 : vector<1x256xi1> to vector<8x256xi1>
    %220 = arith.select %219, %216, %217 : vector<8x256xi1>, vector<8x256xbf16>
    %cst_87 = arith.constant 0.000000e+00 : bf16
    %221 = vector.broadcast %cst_87 : bf16 to vector<8x1xbf16>
    %222 = vector.extract_strided_slice %203 {offsets = [0, 0], sizes = [8, 255], strides = [1, 1]} : vector<8x256xbf16> to vector<8x255xbf16>
    %223 = tpu.concatenate %221, %222 in 1 : vector<8x1xbf16>, vector<8x255xbf16> -> vector<8x256xbf16>
    %cst_88 = arith.constant 0.000000e+00 : bf16
    %224 = vector.broadcast %cst_88 : bf16 to vector<8x256xbf16>
    %225 = vector.shape_cast %18 : vector<1x256xi1> to vector<1x256xi1>
    %226 = vector.broadcast %225 : vector<1x256xi1> to vector<8x256xi1>
    %227 = arith.select %226, %223, %224 : vector<8x256xi1>, vector<8x256xbf16>
    %cst_89 = arith.constant 0.000000e+00 : bf16
    %228 = vector.broadcast %cst_89 : bf16 to vector<8x1xbf16>
    %229 = vector.extract_strided_slice %203 {offsets = [0, 1], sizes = [8, 255], strides = [1, 1]} : vector<8x256xbf16> to vector<8x255xbf16>
    %230 = tpu.concatenate %229, %228 in 1 : vector<8x255xbf16>, vector<8x1xbf16> -> vector<8x256xbf16>
    %cst_90 = arith.constant 0.000000e+00 : bf16
    %231 = vector.broadcast %cst_90 : bf16 to vector<8x256xbf16>
    %232 = vector.shape_cast %20 : vector<1x256xi1> to vector<1x256xi1>
    %233 = vector.broadcast %232 : vector<1x256xi1> to vector<8x256xi1>
    %234 = arith.select %233, %230, %231 : vector<8x256xi1>, vector<8x256xbf16>
    %cst_91 = arith.constant 0.000000e+00 : bf16
    %235 = vector.broadcast %cst_91 : bf16 to vector<8x15xbf16>
    %236 = vector.extract_strided_slice %203 {offsets = [0, 15], sizes = [8, 241], strides = [1, 1]} : vector<8x256xbf16> to vector<8x241xbf16>
    %237 = tpu.concatenate %236, %235 in 1 : vector<8x241xbf16>, vector<8x15xbf16> -> vector<8x256xbf16>
    %cst_92 = arith.constant 0.000000e+00 : bf16
    %238 = vector.broadcast %cst_92 : bf16 to vector<8x256xbf16>
    %239 = vector.shape_cast %18 : vector<1x256xi1> to vector<1x256xi1>
    %240 = vector.broadcast %239 : vector<1x256xi1> to vector<8x256xi1>
    %241 = arith.select %240, %237, %238 : vector<8x256xi1>, vector<8x256xbf16>
    %cst_93 = arith.constant 0.000000e+00 : bf16
    %242 = vector.broadcast %cst_93 : bf16 to vector<8x16xbf16>
    %243 = vector.extract_strided_slice %203 {offsets = [0, 16], sizes = [8, 240], strides = [1, 1]} : vector<8x256xbf16> to vector<8x240xbf16>
    %244 = tpu.concatenate %243, %242 in 1 : vector<8x240xbf16>, vector<8x16xbf16> -> vector<8x256xbf16>
    %cst_94 = arith.constant 0.000000e+00 : bf16
    %245 = vector.broadcast %cst_94 : bf16 to vector<8x17xbf16>
    %246 = vector.extract_strided_slice %203 {offsets = [0, 17], sizes = [8, 239], strides = [1, 1]} : vector<8x256xbf16> to vector<8x239xbf16>
    %247 = tpu.concatenate %246, %245 in 1 : vector<8x239xbf16>, vector<8x17xbf16> -> vector<8x256xbf16>
    %cst_95 = arith.constant 0.000000e+00 : bf16
    %248 = vector.broadcast %cst_95 : bf16 to vector<8x256xbf16>
    %249 = vector.shape_cast %20 : vector<1x256xi1> to vector<1x256xi1>
    %250 = vector.broadcast %249 : vector<1x256xi1> to vector<8x256xi1>
    %251 = arith.select %250, %247, %248 : vector<8x256xi1>, vector<8x256xbf16>
    %252 = arith.truncf %45 : vector<8x256xf32> to vector<8x256xbf16>
    %cst_96 = arith.constant 0.000000e+00 : bf16
    %253 = vector.broadcast %cst_96 : bf16 to vector<8x17xbf16>
    %254 = vector.extract_strided_slice %252 {offsets = [0, 0], sizes = [8, 239], strides = [1, 1]} : vector<8x256xbf16> to vector<8x239xbf16>
    %255 = tpu.concatenate %253, %254 in 1 : vector<8x17xbf16>, vector<8x239xbf16> -> vector<8x256xbf16>
    %cst_97 = arith.constant 0.000000e+00 : bf16
    %256 = vector.broadcast %cst_97 : bf16 to vector<8x256xbf16>
    %257 = vector.shape_cast %18 : vector<1x256xi1> to vector<1x256xi1>
    %258 = vector.broadcast %257 : vector<1x256xi1> to vector<8x256xi1>
    %259 = arith.select %258, %255, %256 : vector<8x256xi1>, vector<8x256xbf16>
    %cst_98 = arith.constant 0.000000e+00 : bf16
    %260 = vector.broadcast %cst_98 : bf16 to vector<8x16xbf16>
    %261 = vector.extract_strided_slice %252 {offsets = [0, 0], sizes = [8, 240], strides = [1, 1]} : vector<8x256xbf16> to vector<8x240xbf16>
    %262 = tpu.concatenate %260, %261 in 1 : vector<8x16xbf16>, vector<8x240xbf16> -> vector<8x256xbf16>
    %cst_99 = arith.constant 0.000000e+00 : bf16
    %263 = vector.broadcast %cst_99 : bf16 to vector<8x15xbf16>
    %264 = vector.extract_strided_slice %252 {offsets = [0, 0], sizes = [8, 241], strides = [1, 1]} : vector<8x256xbf16> to vector<8x241xbf16>
    %265 = tpu.concatenate %263, %264 in 1 : vector<8x15xbf16>, vector<8x241xbf16> -> vector<8x256xbf16>
    %cst_100 = arith.constant 0.000000e+00 : bf16
    %266 = vector.broadcast %cst_100 : bf16 to vector<8x256xbf16>
    %267 = vector.shape_cast %20 : vector<1x256xi1> to vector<1x256xi1>
    %268 = vector.broadcast %267 : vector<1x256xi1> to vector<8x256xi1>
    %269 = arith.select %268, %265, %266 : vector<8x256xi1>, vector<8x256xbf16>
    %cst_101 = arith.constant 0.000000e+00 : bf16
    %270 = vector.broadcast %cst_101 : bf16 to vector<8x1xbf16>
    %271 = vector.extract_strided_slice %252 {offsets = [0, 0], sizes = [8, 255], strides = [1, 1]} : vector<8x256xbf16> to vector<8x255xbf16>
    %272 = tpu.concatenate %270, %271 in 1 : vector<8x1xbf16>, vector<8x255xbf16> -> vector<8x256xbf16>
    %cst_102 = arith.constant 0.000000e+00 : bf16
    %273 = vector.broadcast %cst_102 : bf16 to vector<8x256xbf16>
    %274 = vector.shape_cast %18 : vector<1x256xi1> to vector<1x256xi1>
    %275 = vector.broadcast %274 : vector<1x256xi1> to vector<8x256xi1>
    %276 = arith.select %275, %272, %273 : vector<8x256xi1>, vector<8x256xbf16>
    %cst_103 = arith.constant 0.000000e+00 : bf16
    %277 = vector.broadcast %cst_103 : bf16 to vector<8x1xbf16>
    %278 = vector.extract_strided_slice %252 {offsets = [0, 1], sizes = [8, 255], strides = [1, 1]} : vector<8x256xbf16> to vector<8x255xbf16>
    %279 = tpu.concatenate %278, %277 in 1 : vector<8x255xbf16>, vector<8x1xbf16> -> vector<8x256xbf16>
    %cst_104 = arith.constant 0.000000e+00 : bf16
    %280 = vector.broadcast %cst_104 : bf16 to vector<8x256xbf16>
    %281 = vector.shape_cast %20 : vector<1x256xi1> to vector<1x256xi1>
    %282 = vector.broadcast %281 : vector<1x256xi1> to vector<8x256xi1>
    %283 = arith.select %282, %279, %280 : vector<8x256xi1>, vector<8x256xbf16>
    %cst_105 = arith.constant 0.000000e+00 : bf16
    %284 = vector.broadcast %cst_105 : bf16 to vector<8x15xbf16>
    %285 = vector.extract_strided_slice %252 {offsets = [0, 15], sizes = [8, 241], strides = [1, 1]} : vector<8x256xbf16> to vector<8x241xbf16>
    %286 = tpu.concatenate %285, %284 in 1 : vector<8x241xbf16>, vector<8x15xbf16> -> vector<8x256xbf16>
    %cst_106 = arith.constant 0.000000e+00 : bf16
    %287 = vector.broadcast %cst_106 : bf16 to vector<8x256xbf16>
    %288 = vector.shape_cast %18 : vector<1x256xi1> to vector<1x256xi1>
    %289 = vector.broadcast %288 : vector<1x256xi1> to vector<8x256xi1>
    %290 = arith.select %289, %286, %287 : vector<8x256xi1>, vector<8x256xbf16>
    %cst_107 = arith.constant 0.000000e+00 : bf16
    %291 = vector.broadcast %cst_107 : bf16 to vector<8x16xbf16>
    %292 = vector.extract_strided_slice %252 {offsets = [0, 16], sizes = [8, 240], strides = [1, 1]} : vector<8x256xbf16> to vector<8x240xbf16>
    %293 = tpu.concatenate %292, %291 in 1 : vector<8x240xbf16>, vector<8x16xbf16> -> vector<8x256xbf16>
    %cst_108 = arith.constant 0.000000e+00 : bf16
    %294 = vector.broadcast %cst_108 : bf16 to vector<8x17xbf16>
    %295 = vector.extract_strided_slice %252 {offsets = [0, 17], sizes = [8, 239], strides = [1, 1]} : vector<8x256xbf16> to vector<8x239xbf16>
    %296 = tpu.concatenate %295, %294 in 1 : vector<8x239xbf16>, vector<8x17xbf16> -> vector<8x256xbf16>
    %cst_109 = arith.constant 0.000000e+00 : bf16
    %297 = vector.broadcast %cst_109 : bf16 to vector<8x256xbf16>
    %298 = vector.shape_cast %20 : vector<1x256xi1> to vector<1x256xi1>
    %299 = vector.broadcast %298 : vector<1x256xi1> to vector<8x256xi1>
    %300 = arith.select %299, %296, %297 : vector<8x256xi1>, vector<8x256xbf16>
    %301 = tpu.concatenate %210, %213, %220, %227, %203, %234, %241, %244, %251, %259, %262, %269, %276, %252, %283, %290 in 0 : vector<8x256xbf16>, vector<8x256xbf16>, vector<8x256xbf16>, vector<8x256xbf16>, vector<8x256xbf16>, vector<8x256xbf16>, vector<8x256xbf16>, vector<8x256xbf16>, vector<8x256xbf16>, vector<8x256xbf16>, vector<8x256xbf16>, vector<8x256xbf16>, vector<8x256xbf16>, vector<8x256xbf16>, vector<8x256xbf16>, vector<8x256xbf16> -> vector<128x256xbf16>
    %302 = tpu.concatenate %293, %300 in 0 : vector<8x256xbf16>, vector<8x256xbf16> -> vector<16x256xbf16>
    %303 = tpu.concatenate %301, %302 in 0 : vector<128x256xbf16>, vector<16x256xbf16> -> vector<144x256xbf16>
    %c0_110 = arith.constant 0 : index
    %c0_111 = arith.constant 0 : index
    %304 = vector.load %arg17[%c0_110, %c0_111] : memref<32x144xbf16, #tpu.memory_space<vmem>>, vector<32x144xbf16>
    %cst_112 = arith.constant dense<0.000000e+00> : vector<32x256xf32>
    %305 = tpu.matmul %304, %303, %cst_112 {dimension_numbers = #tpu.dot_dimension_numbers<[1], [0], [0], [1], [0, 0, 1, 1], [], []>} : vector<32x144xbf16>, vector<144x256xbf16>, vector<32x256xf32> -> vector<32x256xf32>
    %c0_113 = arith.constant 0 : index
    %c0_114 = arith.constant 0 : index
    %306 = vector.load %arg18[%c0_113, %c0_114] : memref<32x1xf32, #tpu.memory_space<vmem>>, vector<32x1xf32>
    %307 = vector.broadcast %306 : vector<32x1xf32> to vector<32x256xf32>
    %308 = arith.addf %305, %307 : vector<32x256xf32>
    %309 = vector.extract_strided_slice %308 {offsets = [0, 0], sizes = [16, 256], strides = [1, 1]} : vector<32x256xf32> to vector<16x256xf32>
    %cst_115 = arith.constant 0.000000e+00 : f32
    %310 = vector.broadcast %cst_115 : f32 to vector<16x256xf32>
    %311 = arith.maximumf %309, %310 : vector<16x256xf32>
    %312 = vector.extract_strided_slice %308 {offsets = [16, 0], sizes = [16, 256], strides = [1, 1]} : vector<32x256xf32> to vector<16x256xf32>
    %313 = arith.truncf %311 : vector<16x256xf32> to vector<16x256xbf16>
    %cst_116 = arith.constant 0.000000e+00 : bf16
    %314 = vector.broadcast %cst_116 : bf16 to vector<16x17xbf16>
    %315 = vector.extract_strided_slice %313 {offsets = [0, 0], sizes = [16, 239], strides = [1, 1]} : vector<16x256xbf16> to vector<16x239xbf16>
    %316 = tpu.concatenate %314, %315 in 1 : vector<16x17xbf16>, vector<16x239xbf16> -> vector<16x256xbf16>
    %cst_117 = arith.constant 0.000000e+00 : bf16
    %317 = vector.broadcast %cst_117 : bf16 to vector<16x256xbf16>
    %318 = vector.shape_cast %18 : vector<1x256xi1> to vector<1x256xi1>
    %319 = vector.broadcast %318 : vector<1x256xi1> to vector<16x256xi1>
    %320 = arith.select %319, %316, %317 : vector<16x256xi1>, vector<16x256xbf16>
    %cst_118 = arith.constant 0.000000e+00 : bf16
    %321 = vector.broadcast %cst_118 : bf16 to vector<16x16xbf16>
    %322 = vector.extract_strided_slice %313 {offsets = [0, 0], sizes = [16, 240], strides = [1, 1]} : vector<16x256xbf16> to vector<16x240xbf16>
    %323 = tpu.concatenate %321, %322 in 1 : vector<16x16xbf16>, vector<16x240xbf16> -> vector<16x256xbf16>
    %cst_119 = arith.constant 0.000000e+00 : bf16
    %324 = vector.broadcast %cst_119 : bf16 to vector<16x15xbf16>
    %325 = vector.extract_strided_slice %313 {offsets = [0, 0], sizes = [16, 241], strides = [1, 1]} : vector<16x256xbf16> to vector<16x241xbf16>
    %326 = tpu.concatenate %324, %325 in 1 : vector<16x15xbf16>, vector<16x241xbf16> -> vector<16x256xbf16>
    %cst_120 = arith.constant 0.000000e+00 : bf16
    %327 = vector.broadcast %cst_120 : bf16 to vector<16x256xbf16>
    %328 = vector.shape_cast %20 : vector<1x256xi1> to vector<1x256xi1>
    %329 = vector.broadcast %328 : vector<1x256xi1> to vector<16x256xi1>
    %330 = arith.select %329, %326, %327 : vector<16x256xi1>, vector<16x256xbf16>
    %cst_121 = arith.constant 0.000000e+00 : bf16
    %331 = vector.broadcast %cst_121 : bf16 to vector<16x1xbf16>
    %332 = vector.extract_strided_slice %313 {offsets = [0, 0], sizes = [16, 255], strides = [1, 1]} : vector<16x256xbf16> to vector<16x255xbf16>
    %333 = tpu.concatenate %331, %332 in 1 : vector<16x1xbf16>, vector<16x255xbf16> -> vector<16x256xbf16>
    %cst_122 = arith.constant 0.000000e+00 : bf16
    %334 = vector.broadcast %cst_122 : bf16 to vector<16x256xbf16>
    %335 = vector.shape_cast %18 : vector<1x256xi1> to vector<1x256xi1>
    %336 = vector.broadcast %335 : vector<1x256xi1> to vector<16x256xi1>
    %337 = arith.select %336, %333, %334 : vector<16x256xi1>, vector<16x256xbf16>
    %cst_123 = arith.constant 0.000000e+00 : bf16
    %338 = vector.broadcast %cst_123 : bf16 to vector<16x1xbf16>
    %339 = vector.extract_strided_slice %313 {offsets = [0, 1], sizes = [16, 255], strides = [1, 1]} : vector<16x256xbf16> to vector<16x255xbf16>
    %340 = tpu.concatenate %339, %338 in 1 : vector<16x255xbf16>, vector<16x1xbf16> -> vector<16x256xbf16>
    %cst_124 = arith.constant 0.000000e+00 : bf16
    %341 = vector.broadcast %cst_124 : bf16 to vector<16x256xbf16>
    %342 = vector.shape_cast %20 : vector<1x256xi1> to vector<1x256xi1>
    %343 = vector.broadcast %342 : vector<1x256xi1> to vector<16x256xi1>
    %344 = arith.select %343, %340, %341 : vector<16x256xi1>, vector<16x256xbf16>
    %cst_125 = arith.constant 0.000000e+00 : bf16
    %345 = vector.broadcast %cst_125 : bf16 to vector<16x15xbf16>
    %346 = vector.extract_strided_slice %313 {offsets = [0, 15], sizes = [16, 241], strides = [1, 1]} : vector<16x256xbf16> to vector<16x241xbf16>
    %347 = tpu.concatenate %346, %345 in 1 : vector<16x241xbf16>, vector<16x15xbf16> -> vector<16x256xbf16>
    %cst_126 = arith.constant 0.000000e+00 : bf16
    %348 = vector.broadcast %cst_126 : bf16 to vector<16x256xbf16>
    %349 = vector.shape_cast %18 : vector<1x256xi1> to vector<1x256xi1>
    %350 = vector.broadcast %349 : vector<1x256xi1> to vector<16x256xi1>
    %351 = arith.select %350, %347, %348 : vector<16x256xi1>, vector<16x256xbf16>
    %cst_127 = arith.constant 0.000000e+00 : bf16
    %352 = vector.broadcast %cst_127 : bf16 to vector<16x16xbf16>
    %353 = vector.extract_strided_slice %313 {offsets = [0, 16], sizes = [16, 240], strides = [1, 1]} : vector<16x256xbf16> to vector<16x240xbf16>
    %354 = tpu.concatenate %353, %352 in 1 : vector<16x240xbf16>, vector<16x16xbf16> -> vector<16x256xbf16>
    %cst_128 = arith.constant 0.000000e+00 : bf16
    %355 = vector.broadcast %cst_128 : bf16 to vector<16x17xbf16>
    %356 = vector.extract_strided_slice %313 {offsets = [0, 17], sizes = [16, 239], strides = [1, 1]} : vector<16x256xbf16> to vector<16x239xbf16>
    %357 = tpu.concatenate %356, %355 in 1 : vector<16x239xbf16>, vector<16x17xbf16> -> vector<16x256xbf16>
    %cst_129 = arith.constant 0.000000e+00 : bf16
    %358 = vector.broadcast %cst_129 : bf16 to vector<16x256xbf16>
    %359 = vector.shape_cast %20 : vector<1x256xi1> to vector<1x256xi1>
    %360 = vector.broadcast %359 : vector<1x256xi1> to vector<16x256xi1>
    %361 = arith.select %360, %357, %358 : vector<16x256xi1>, vector<16x256xbf16>
    %362 = tpu.concatenate %320, %323, %330, %337, %313, %344, %351, %354, %361 in 0 : vector<16x256xbf16>, vector<16x256xbf16>, vector<16x256xbf16>, vector<16x256xbf16>, vector<16x256xbf16>, vector<16x256xbf16>, vector<16x256xbf16>, vector<16x256xbf16>, vector<16x256xbf16> -> vector<144x256xbf16>
    %c0_130 = arith.constant 0 : index
    %c0_131 = arith.constant 0 : index
    %363 = vector.load %arg19[%c0_130, %c0_131] : memref<16x144xbf16, #tpu.memory_space<vmem>>, vector<16x144xbf16>
    %cst_132 = arith.constant dense<0.000000e+00> : vector<16x256xf32>
    %364 = tpu.matmul %363, %362, %cst_132 {dimension_numbers = #tpu.dot_dimension_numbers<[1], [0], [0], [1], [0, 0, 1, 1], [], []>} : vector<16x144xbf16>, vector<144x256xbf16>, vector<16x256xf32> -> vector<16x256xf32>
    %c0_133 = arith.constant 0 : index
    %c0_134 = arith.constant 0 : index
    %365 = vector.load %arg20[%c0_133, %c0_134] : memref<16x1xf32, #tpu.memory_space<vmem>>, vector<16x1xf32>
    %366 = vector.broadcast %365 : vector<16x1xf32> to vector<16x256xf32>
    %367 = arith.addf %364, %366 : vector<16x256xf32>
    %cst_135 = arith.constant 0.000000e+00 : f32
    %368 = vector.broadcast %cst_135 : f32 to vector<16x256xf32>
    %369 = arith.maximumf %367, %368 : vector<16x256xf32>
    %370 = arith.addf %369, %312 : vector<16x256xf32>
    %c0_136 = arith.constant 0 : index
    %c0_137 = arith.constant 0 : index
    %c0_138 = arith.constant 0 : index
    %371 = vector.load %arg21[%c0_136, %c0_137, %c0_138] : memref<2x16x256xf32, #tpu.memory_space<vmem>>, vector<1x16x256xf32>
    %372 = vector.shape_cast %371 : vector<1x16x256xf32> to vector<16x256xf32>
    %373 = vector.shape_cast %370 : vector<16x256xf32> to vector<1x16x256xf32>
    tpu.vector_store %arg21[%c0_136, %c0_137, %c0_138], %373 {strides = array<i32>} : memref<2x16x256xf32, #tpu.memory_space<vmem>>, vector<1x16x256xf32>,
    %c1 = arith.constant 1 : index
    %c0_139 = arith.constant 0 : index
    %c0_140 = arith.constant 0 : index
    %374 = vector.load %arg1[%c1, %c0_139, %c0_140] : memref<2x8x64xf32, #tpu.memory_space<vmem>>, vector<1x8x64xf32>
    %375 = vector.shape_cast %374 : vector<1x8x64xf32> to vector<8x64xf32>
    %c1_141 = arith.constant 1 : index
    %c0_142 = arith.constant 0 : index
    %c0_143 = arith.constant 0 : index
    %376 = vector.load %arg2[%c1_141, %c0_142, %c0_143] : memref<2x8x256xf32, #tpu.memory_space<vmem>>, vector<1x8x256xf32>
    %377 = vector.shape_cast %376 : vector<1x8x256xf32> to vector<8x256xf32>
    %c0_144 = arith.constant 0 : index
    %c0_145 = arith.constant 0 : index
    %378 = vector.load %arg3[%c0_144, %c0_145] : memref<8x1xf32, #tpu.memory_space<vmem>>, vector<8x1xf32>
    %379 = vector.broadcast %378 : vector<8x1xf32> to vector<8x256xf32>
    %380 = arith.mulf %377, %379 : vector<8x256xf32>
    %c0_146 = arith.constant 0 : index
    %c0_147 = arith.constant 0 : index
    %381 = vector.load %arg4[%c0_146, %c0_147] : memref<8x1xf32, #tpu.memory_space<vmem>>, vector<8x1xf32>
    %382 = vector.broadcast %381 : vector<8x1xf32> to vector<8x256xf32>
    %383 = arith.addf %380, %382 : vector<8x256xf32>
    %cst_148 = arith.constant 0.000000e+00 : f32
    %384 = vector.broadcast %cst_148 : f32 to vector<8x256xf32>
    %385 = arith.maximumf %383, %384 : vector<8x256xf32>
    %386 = arith.truncf %385 : vector<8x256xf32> to vector<8x256xbf16>
    %cst_149 = arith.constant 0.000000e+00 : bf16
    %387 = vector.broadcast %cst_149 : bf16 to vector<8x17xbf16>
    %388 = vector.extract_strided_slice %386 {offsets = [0, 0], sizes = [8, 239], strides = [1, 1]} : vector<8x256xbf16> to vector<8x239xbf16>
    %389 = tpu.concatenate %387, %388 in 1 : vector<8x17xbf16>, vector<8x239xbf16> -> vector<8x256xbf16>
    %cst_150 = arith.constant 0.000000e+00 : bf16
    %390 = vector.broadcast %cst_150 : bf16 to vector<8x256xbf16>
    %391 = vector.shape_cast %18 : vector<1x256xi1> to vector<1x256xi1>
    %392 = vector.broadcast %391 : vector<1x256xi1> to vector<8x256xi1>
    %393 = arith.select %392, %389, %390 : vector<8x256xi1>, vector<8x256xbf16>
    %cst_151 = arith.constant 0.000000e+00 : bf16
    %394 = vector.broadcast %cst_151 : bf16 to vector<8x16xbf16>
    %395 = vector.extract_strided_slice %386 {offsets = [0, 0], sizes = [8, 240], strides = [1, 1]} : vector<8x256xbf16> to vector<8x240xbf16>
    %396 = tpu.concatenate %394, %395 in 1 : vector<8x16xbf16>, vector<8x240xbf16> -> vector<8x256xbf16>
    %cst_152 = arith.constant 0.000000e+00 : bf16
    %397 = vector.broadcast %cst_152 : bf16 to vector<8x15xbf16>
    %398 = vector.extract_strided_slice %386 {offsets = [0, 0], sizes = [8, 241], strides = [1, 1]} : vector<8x256xbf16> to vector<8x241xbf16>
    %399 = tpu.concatenate %397, %398 in 1 : vector<8x15xbf16>, vector<8x241xbf16> -> vector<8x256xbf16>
    %cst_153 = arith.constant 0.000000e+00 : bf16
    %400 = vector.broadcast %cst_153 : bf16 to vector<8x256xbf16>
    %401 = vector.shape_cast %20 : vector<1x256xi1> to vector<1x256xi1>
    %402 = vector.broadcast %401 : vector<1x256xi1> to vector<8x256xi1>
    %403 = arith.select %402, %399, %400 : vector<8x256xi1>, vector<8x256xbf16>
    %cst_154 = arith.constant 0.000000e+00 : bf16
    %404 = vector.broadcast %cst_154 : bf16 to vector<8x1xbf16>
    %405 = vector.extract_strided_slice %386 {offsets = [0, 0], sizes = [8, 255], strides = [1, 1]} : vector<8x256xbf16> to vector<8x255xbf16>
    %406 = tpu.concatenate %404, %405 in 1 : vector<8x1xbf16>, vector<8x255xbf16> -> vector<8x256xbf16>
    %cst_155 = arith.constant 0.000000e+00 : bf16
    %407 = vector.broadcast %cst_155 : bf16 to vector<8x256xbf16>
    %408 = vector.shape_cast %18 : vector<1x256xi1> to vector<1x256xi1>
    %409 = vector.broadcast %408 : vector<1x256xi1> to vector<8x256xi1>
    %410 = arith.select %409, %406, %407 : vector<8x256xi1>, vector<8x256xbf16>
    %cst_156 = arith.constant 0.000000e+00 : bf16
    %411 = vector.broadcast %cst_156 : bf16 to vector<8x1xbf16>
    %412 = vector.extract_strided_slice %386 {offsets = [0, 1], sizes = [8, 255], strides = [1, 1]} : vector<8x256xbf16> to vector<8x255xbf16>
    %413 = tpu.concatenate %412, %411 in 1 : vector<8x255xbf16>, vector<8x1xbf16> -> vector<8x256xbf16>
    %cst_157 = arith.constant 0.000000e+00 : bf16
    %414 = vector.broadcast %cst_157 : bf16 to vector<8x256xbf16>
    %415 = vector.shape_cast %20 : vector<1x256xi1> to vector<1x256xi1>
    %416 = vector.broadcast %415 : vector<1x256xi1> to vector<8x256xi1>
    %417 = arith.select %416, %413, %414 : vector<8x256xi1>, vector<8x256xbf16>
    %cst_158 = arith.constant 0.000000e+00 : bf16
    %418 = vector.broadcast %cst_158 : bf16 to vector<8x15xbf16>
    %419 = vector.extract_strided_slice %386 {offsets = [0, 15], sizes = [8, 241], strides = [1, 1]} : vector<8x256xbf16> to vector<8x241xbf16>
    %420 = tpu.concatenate %419, %418 in 1 : vector<8x241xbf16>, vector<8x15xbf16> -> vector<8x256xbf16>
    %cst_159 = arith.constant 0.000000e+00 : bf16
    %421 = vector.broadcast %cst_159 : bf16 to vector<8x256xbf16>
    %422 = vector.shape_cast %18 : vector<1x256xi1> to vector<1x256xi1>
    %423 = vector.broadcast %422 : vector<1x256xi1> to vector<8x256xi1>
    %424 = arith.select %423, %420, %421 : vector<8x256xi1>, vector<8x256xbf16>
    %cst_160 = arith.constant 0.000000e+00 : bf16
    %425 = vector.broadcast %cst_160 : bf16 to vector<8x16xbf16>
    %426 = vector.extract_strided_slice %386 {offsets = [0, 16], sizes = [8, 240], strides = [1, 1]} : vector<8x256xbf16> to vector<8x240xbf16>
    %427 = tpu.concatenate %426, %425 in 1 : vector<8x240xbf16>, vector<8x16xbf16> -> vector<8x256xbf16>
    %cst_161 = arith.constant 0.000000e+00 : bf16
    %428 = vector.broadcast %cst_161 : bf16 to vector<8x17xbf16>
    %429 = vector.extract_strided_slice %386 {offsets = [0, 17], sizes = [8, 239], strides = [1, 1]} : vector<8x256xbf16> to vector<8x239xbf16>
    %430 = tpu.concatenate %429, %428 in 1 : vector<8x239xbf16>, vector<8x17xbf16> -> vector<8x256xbf16>
    %cst_162 = arith.constant 0.000000e+00 : bf16
    %431 = vector.broadcast %cst_162 : bf16 to vector<8x256xbf16>
    %432 = vector.shape_cast %20 : vector<1x256xi1> to vector<1x256xi1>
    %433 = vector.broadcast %432 : vector<1x256xi1> to vector<8x256xi1>
    %434 = arith.select %433, %430, %431 : vector<8x256xi1>, vector<8x256xbf16>
    %435 = tpu.concatenate %393, %396, %403, %410, %386, %417, %424, %427, %434 in 0 : vector<8x256xbf16>, vector<8x256xbf16>, vector<8x256xbf16>, vector<8x256xbf16>, vector<8x256xbf16>, vector<8x256xbf16>, vector<8x256xbf16>, vector<8x256xbf16>, vector<8x256xbf16> -> vector<72x256xbf16>
    %c0_163 = arith.constant 0 : index
    %c0_164 = arith.constant 0 : index
    %436 = vector.load %arg5[%c0_163, %c0_164] : memref<8x72xbf16, #tpu.memory_space<vmem>>, vector<8x72xbf16>
    %cst_165 = arith.constant dense<0.000000e+00> : vector<8x256xf32>
    %437 = tpu.matmul %436, %435, %cst_165 {dimension_numbers = #tpu.dot_dimension_numbers<[1], [0], [0], [1], [0, 0, 1, 1], [], []>} : vector<8x72xbf16>, vector<72x256xbf16>, vector<8x256xf32> -> vector<8x256xf32>
    %c0_166 = arith.constant 0 : index
    %c0_167 = arith.constant 0 : index
    %438 = vector.load %arg6[%c0_166, %c0_167] : memref<8x1xf32, #tpu.memory_space<vmem>>, vector<8x1xf32>
    %439 = vector.broadcast %438 : vector<8x1xf32> to vector<8x256xf32>
    %440 = arith.addf %437, %439 : vector<8x256xf32>
    %cst_168 = arith.constant 0.000000e+00 : f32
    %441 = vector.broadcast %cst_168 : f32 to vector<8x1xf32>
    %442 = vector.extract_strided_slice %440 {offsets = [0, 1], sizes = [8, 255], strides = [1, 1]} : vector<8x256xf32> to vector<8x255xf32>
    %443 = tpu.concatenate %442, %441 in 1 : vector<8x255xf32>, vector<8x1xf32> -> vector<8x256xf32>
    %444 = arith.maximumf %440, %443 : vector<8x256xf32>
    %cst_169 = arith.constant 0.000000e+00 : f32
    %445 = vector.broadcast %cst_169 : f32 to vector<8x16xf32>
    %446 = vector.extract_strided_slice %444 {offsets = [0, 16], sizes = [8, 240], strides = [1, 1]} : vector<8x256xf32> to vector<8x240xf32>
    %447 = tpu.concatenate %446, %445 in 1 : vector<8x240xf32>, vector<8x16xf32> -> vector<8x256xf32>
    %448 = arith.maximumf %444, %447 : vector<8x256xf32>
    %c0_170 = arith.constant 0 : index
    %c0_171 = arith.constant 0 : index
    %449 = vector.load %arg15[%c0_170, %c0_171] : memref<256x64xf32, #tpu.memory_space<vmem>>, vector<256x64xf32>
    %cst_172 = arith.constant dense<0.000000e+00> : vector<8x64xf32>
    %450 = tpu.matmul %448, %449, %cst_172 {dimension_numbers = #tpu.dot_dimension_numbers<[1], [0], [0], [1], [0, 0, 1, 1], [], []>} : vector<8x256xf32>, vector<256x64xf32>, vector<8x64xf32> -> vector<8x64xf32>
    %c0_173 = arith.constant 0 : index
    %c0_174 = arith.constant 0 : index
    %451 = vector.load %arg7[%c0_173, %c0_174] : memref<8x1xf32, #tpu.memory_space<vmem>>, vector<8x1xf32>
    %452 = vector.broadcast %451 : vector<8x1xf32> to vector<8x64xf32>
    %453 = arith.mulf %375, %452 : vector<8x64xf32>
    %c0_175 = arith.constant 0 : index
    %c0_176 = arith.constant 0 : index
    %454 = vector.load %arg8[%c0_175, %c0_176] : memref<8x1xf32, #tpu.memory_space<vmem>>, vector<8x1xf32>
    %455 = vector.broadcast %454 : vector<8x1xf32> to vector<8x64xf32>
    %456 = arith.addf %453, %455 : vector<8x64xf32>
    %cst_177 = arith.constant 0.000000e+00 : f32
    %457 = vector.broadcast %cst_177 : f32 to vector<8x64xf32>
    %458 = arith.maximumf %456, %457 : vector<8x64xf32>
    %459 = arith.truncf %458 : vector<8x64xf32> to vector<8x64xbf16>
    %cst_178 = arith.constant 0.000000e+00 : bf16
    %460 = vector.broadcast %cst_178 : bf16 to vector<8x9xbf16>
    %461 = vector.extract_strided_slice %459 {offsets = [0, 0], sizes = [8, 55], strides = [1, 1]} : vector<8x64xbf16> to vector<8x55xbf16>
    %462 = tpu.concatenate %460, %461 in 1 : vector<8x9xbf16>, vector<8x55xbf16> -> vector<8x64xbf16>
    %cst_179 = arith.constant 0.000000e+00 : bf16
    %463 = vector.broadcast %cst_179 : bf16 to vector<8x64xbf16>
    %464 = vector.shape_cast %39 : vector<1x64xi1> to vector<1x64xi1>
    %465 = vector.broadcast %464 : vector<1x64xi1> to vector<8x64xi1>
    %466 = arith.select %465, %462, %463 : vector<8x64xi1>, vector<8x64xbf16>
    %cst_180 = arith.constant 0.000000e+00 : bf16
    %467 = vector.broadcast %cst_180 : bf16 to vector<8x8xbf16>
    %468 = vector.extract_strided_slice %459 {offsets = [0, 0], sizes = [8, 56], strides = [1, 1]} : vector<8x64xbf16> to vector<8x56xbf16>
    %469 = tpu.concatenate %467, %468 in 1 : vector<8x8xbf16>, vector<8x56xbf16> -> vector<8x64xbf16>
    %cst_181 = arith.constant 0.000000e+00 : bf16
    %470 = vector.broadcast %cst_181 : bf16 to vector<8x7xbf16>
    %471 = vector.extract_strided_slice %459 {offsets = [0, 0], sizes = [8, 57], strides = [1, 1]} : vector<8x64xbf16> to vector<8x57xbf16>
    %472 = tpu.concatenate %470, %471 in 1 : vector<8x7xbf16>, vector<8x57xbf16> -> vector<8x64xbf16>
    %cst_182 = arith.constant 0.000000e+00 : bf16
    %473 = vector.broadcast %cst_182 : bf16 to vector<8x64xbf16>
    %474 = vector.shape_cast %41 : vector<1x64xi1> to vector<1x64xi1>
    %475 = vector.broadcast %474 : vector<1x64xi1> to vector<8x64xi1>
    %476 = arith.select %475, %472, %473 : vector<8x64xi1>, vector<8x64xbf16>
    %cst_183 = arith.constant 0.000000e+00 : bf16
    %477 = vector.broadcast %cst_183 : bf16 to vector<8x1xbf16>
    %478 = vector.extract_strided_slice %459 {offsets = [0, 0], sizes = [8, 63], strides = [1, 1]} : vector<8x64xbf16> to vector<8x63xbf16>
    %479 = tpu.concatenate %477, %478 in 1 : vector<8x1xbf16>, vector<8x63xbf16> -> vector<8x64xbf16>
    %cst_184 = arith.constant 0.000000e+00 : bf16
    %480 = vector.broadcast %cst_184 : bf16 to vector<8x64xbf16>
    %481 = vector.shape_cast %39 : vector<1x64xi1> to vector<1x64xi1>
    %482 = vector.broadcast %481 : vector<1x64xi1> to vector<8x64xi1>
    %483 = arith.select %482, %479, %480 : vector<8x64xi1>, vector<8x64xbf16>
    %cst_185 = arith.constant 0.000000e+00 : bf16
    %484 = vector.broadcast %cst_185 : bf16 to vector<8x1xbf16>
    %485 = vector.extract_strided_slice %459 {offsets = [0, 1], sizes = [8, 63], strides = [1, 1]} : vector<8x64xbf16> to vector<8x63xbf16>
    %486 = tpu.concatenate %485, %484 in 1 : vector<8x63xbf16>, vector<8x1xbf16> -> vector<8x64xbf16>
    %cst_186 = arith.constant 0.000000e+00 : bf16
    %487 = vector.broadcast %cst_186 : bf16 to vector<8x64xbf16>
    %488 = vector.shape_cast %41 : vector<1x64xi1> to vector<1x64xi1>
    %489 = vector.broadcast %488 : vector<1x64xi1> to vector<8x64xi1>
    %490 = arith.select %489, %486, %487 : vector<8x64xi1>, vector<8x64xbf16>
    %cst_187 = arith.constant 0.000000e+00 : bf16
    %491 = vector.broadcast %cst_187 : bf16 to vector<8x7xbf16>
    %492 = vector.extract_strided_slice %459 {offsets = [0, 7], sizes = [8, 57], strides = [1, 1]} : vector<8x64xbf16> to vector<8x57xbf16>
    %493 = tpu.concatenate %492, %491 in 1 : vector<8x57xbf16>, vector<8x7xbf16> -> vector<8x64xbf16>
    %cst_188 = arith.constant 0.000000e+00 : bf16
    %494 = vector.broadcast %cst_188 : bf16 to vector<8x64xbf16>
    %495 = vector.shape_cast %39 : vector<1x64xi1> to vector<1x64xi1>
    %496 = vector.broadcast %495 : vector<1x64xi1> to vector<8x64xi1>
    %497 = arith.select %496, %493, %494 : vector<8x64xi1>, vector<8x64xbf16>
    %cst_189 = arith.constant 0.000000e+00 : bf16
    %498 = vector.broadcast %cst_189 : bf16 to vector<8x8xbf16>
    %499 = vector.extract_strided_slice %459 {offsets = [0, 8], sizes = [8, 56], strides = [1, 1]} : vector<8x64xbf16> to vector<8x56xbf16>
    %500 = tpu.concatenate %499, %498 in 1 : vector<8x56xbf16>, vector<8x8xbf16> -> vector<8x64xbf16>
    %cst_190 = arith.constant 0.000000e+00 : bf16
    %501 = vector.broadcast %cst_190 : bf16 to vector<8x9xbf16>
    %502 = vector.extract_strided_slice %459 {offsets = [0, 9], sizes = [8, 55], strides = [1, 1]} : vector<8x64xbf16> to vector<8x55xbf16>
    %503 = tpu.concatenate %502, %501 in 1 : vector<8x55xbf16>, vector<8x9xbf16> -> vector<8x64xbf16>
    %cst_191 = arith.constant 0.000000e+00 : bf16
    %504 = vector.broadcast %cst_191 : bf16 to vector<8x64xbf16>
    %505 = vector.shape_cast %41 : vector<1x64xi1> to vector<1x64xi1>
    %506 = vector.broadcast %505 : vector<1x64xi1> to vector<8x64xi1>
    %507 = arith.select %506, %503, %504 : vector<8x64xi1>, vector<8x64xbf16>
    %508 = tpu.concatenate %466, %469, %476, %483, %459, %490, %497, %500, %507 in 0 : vector<8x64xbf16>, vector<8x64xbf16>, vector<8x64xbf16>, vector<8x64xbf16>, vector<8x64xbf16>, vector<8x64xbf16>, vector<8x64xbf16>, vector<8x64xbf16>, vector<8x64xbf16> -> vector<72x64xbf16>
    %c0_192 = arith.constant 0 : index
    %c0_193 = arith.constant 0 : index
    %509 = vector.load %arg9[%c0_192, %c0_193] : memref<8x72xbf16, #tpu.memory_space<vmem>>, vector<8x72xbf16>
    %cst_194 = arith.constant dense<0.000000e+00> : vector<8x64xf32>
    %510 = tpu.matmul %509, %508, %cst_194 {dimension_numbers = #tpu.dot_dimension_numbers<[1], [0], [0], [1], [0, 0, 1, 1], [], []>} : vector<8x72xbf16>, vector<72x64xbf16>, vector<8x64xf32> -> vector<8x64xf32>
    %c0_195 = arith.constant 0 : index
    %c0_196 = arith.constant 0 : index
    %511 = vector.load %arg10[%c0_195, %c0_196] : memref<8x1xf32, #tpu.memory_space<vmem>>, vector<8x1xf32>
    %512 = vector.broadcast %511 : vector<8x1xf32> to vector<8x64xf32>
    %513 = arith.addf %510, %512 : vector<8x64xf32>
    %514 = arith.addf %450, %513 : vector<8x64xf32>
    %c0_197 = arith.constant 0 : index
    %c0_198 = arith.constant 0 : index
    %515 = vector.load %arg11[%c0_197, %c0_198] : memref<8x1xf32, #tpu.memory_space<vmem>>, vector<8x1xf32>
    %516 = vector.broadcast %515 : vector<8x1xf32> to vector<8x64xf32>
    %517 = arith.mulf %514, %516 : vector<8x64xf32>
    %c0_199 = arith.constant 0 : index
    %c0_200 = arith.constant 0 : index
    %518 = vector.load %arg12[%c0_199, %c0_200] : memref<8x1xf32, #tpu.memory_space<vmem>>, vector<8x1xf32>
    %519 = vector.broadcast %518 : vector<8x1xf32> to vector<8x64xf32>
    %520 = arith.addf %517, %519 : vector<8x64xf32>
    %cst_201 = arith.constant 0.000000e+00 : f32
    %521 = vector.broadcast %cst_201 : f32 to vector<8x64xf32>
    %522 = arith.maximumf %520, %521 : vector<8x64xf32>
    %c0_202 = arith.constant 0 : index
    %c0_203 = arith.constant 0 : index
    %523 = vector.load %arg13[%c0_202, %c0_203] : memref<8x8xf32, #tpu.memory_space<vmem>>, vector<8x8xf32>
    %cst_204 = arith.constant dense<0.000000e+00> : vector<8x64xf32>
    %524 = tpu.matmul %523, %522, %cst_204 {dimension_numbers = #tpu.dot_dimension_numbers<[1], [0], [0], [1], [0, 0, 1, 1], [], []>} : vector<8x8xf32>, vector<8x64xf32>, vector<8x64xf32> -> vector<8x64xf32>
    %cst_205 = arith.constant dense<0.000000e+00> : vector<8xf32>
    %525 = vector.multi_reduction <add>, %524, %cst_205 [1] : vector<8x64xf32> to vector<8xf32>
    %526 = vector.shape_cast %525 : vector<8xf32> to vector<8x1xf32>
    %cst_206 = arith.constant 1.562500e-02 : f32
    %527 = vector.broadcast %cst_206 : f32 to vector<8x1xf32>
    %528 = arith.mulf %526, %527 : vector<8x1xf32>
    %c0_207 = arith.constant 0 : index
    %c0_208 = arith.constant 0 : index
    %529 = vector.load %arg14[%c0_207, %c0_208] : memref<8x1xf32, #tpu.memory_space<vmem>>, vector<8x1xf32>
    %530 = arith.addf %528, %529 : vector<8x1xf32>
    %531 = vector.broadcast %530 : vector<8x1xf32> to vector<8x64xf32>
    %532 = arith.mulf %375, %531 : vector<8x64xf32>
    %c0_209 = arith.constant 0 : index
    %c0_210 = arith.constant 0 : index
    %533 = vector.load %arg16[%c0_209, %c0_210] : memref<64x256xf32, #tpu.memory_space<vmem>>, vector<64x256xf32>
    %cst_211 = arith.constant dense<0.000000e+00> : vector<8x256xf32>
    %534 = tpu.matmul %532, %533, %cst_211 {dimension_numbers = #tpu.dot_dimension_numbers<[1], [0], [0], [1], [0, 0, 1, 1], [], []>} : vector<8x64xf32>, vector<64x256xf32>, vector<8x256xf32> -> vector<8x256xf32>
    %535 = arith.truncf %534 : vector<8x256xf32> to vector<8x256xbf16>
    %cst_212 = arith.constant 0.000000e+00 : bf16
    %536 = vector.broadcast %cst_212 : bf16 to vector<8x17xbf16>
    %537 = vector.extract_strided_slice %535 {offsets = [0, 0], sizes = [8, 239], strides = [1, 1]} : vector<8x256xbf16> to vector<8x239xbf16>
    %538 = tpu.concatenate %536, %537 in 1 : vector<8x17xbf16>, vector<8x239xbf16> -> vector<8x256xbf16>
    %cst_213 = arith.constant 0.000000e+00 : bf16
    %539 = vector.broadcast %cst_213 : bf16 to vector<8x256xbf16>
    %540 = vector.shape_cast %18 : vector<1x256xi1> to vector<1x256xi1>
    %541 = vector.broadcast %540 : vector<1x256xi1> to vector<8x256xi1>
    %542 = arith.select %541, %538, %539 : vector<8x256xi1>, vector<8x256xbf16>
    %cst_214 = arith.constant 0.000000e+00 : bf16
    %543 = vector.broadcast %cst_214 : bf16 to vector<8x16xbf16>
    %544 = vector.extract_strided_slice %535 {offsets = [0, 0], sizes = [8, 240], strides = [1, 1]} : vector<8x256xbf16> to vector<8x240xbf16>
    %545 = tpu.concatenate %543, %544 in 1 : vector<8x16xbf16>, vector<8x240xbf16> -> vector<8x256xbf16>
    %cst_215 = arith.constant 0.000000e+00 : bf16
    %546 = vector.broadcast %cst_215 : bf16 to vector<8x15xbf16>
    %547 = vector.extract_strided_slice %535 {offsets = [0, 0], sizes = [8, 241], strides = [1, 1]} : vector<8x256xbf16> to vector<8x241xbf16>
    %548 = tpu.concatenate %546, %547 in 1 : vector<8x15xbf16>, vector<8x241xbf16> -> vector<8x256xbf16>
    %cst_216 = arith.constant 0.000000e+00 : bf16
    %549 = vector.broadcast %cst_216 : bf16 to vector<8x256xbf16>
    %550 = vector.shape_cast %20 : vector<1x256xi1> to vector<1x256xi1>
    %551 = vector.broadcast %550 : vector<1x256xi1> to vector<8x256xi1>
    %552 = arith.select %551, %548, %549 : vector<8x256xi1>, vector<8x256xbf16>
    %cst_217 = arith.constant 0.000000e+00 : bf16
    %553 = vector.broadcast %cst_217 : bf16 to vector<8x1xbf16>
    %554 = vector.extract_strided_slice %535 {offsets = [0, 0], sizes = [8, 255], strides = [1, 1]} : vector<8x256xbf16> to vector<8x255xbf16>
    %555 = tpu.concatenate %553, %554 in 1 : vector<8x1xbf16>, vector<8x255xbf16> -> vector<8x256xbf16>
    %cst_218 = arith.constant 0.000000e+00 : bf16
    %556 = vector.broadcast %cst_218 : bf16 to vector<8x256xbf16>
    %557 = vector.shape_cast %18 : vector<1x256xi1> to vector<1x256xi1>
    %558 = vector.broadcast %557 : vector<1x256xi1> to vector<8x256xi1>
    %559 = arith.select %558, %555, %556 : vector<8x256xi1>, vector<8x256xbf16>
    %cst_219 = arith.constant 0.000000e+00 : bf16
    %560 = vector.broadcast %cst_219 : bf16 to vector<8x1xbf16>
    %561 = vector.extract_strided_slice %535 {offsets = [0, 1], sizes = [8, 255], strides = [1, 1]} : vector<8x256xbf16> to vector<8x255xbf16>
    %562 = tpu.concatenate %561, %560 in 1 : vector<8x255xbf16>, vector<8x1xbf16> -> vector<8x256xbf16>
    %cst_220 = arith.constant 0.000000e+00 : bf16
    %563 = vector.broadcast %cst_220 : bf16 to vector<8x256xbf16>
    %564 = vector.shape_cast %20 : vector<1x256xi1> to vector<1x256xi1>
    %565 = vector.broadcast %564 : vector<1x256xi1> to vector<8x256xi1>
    %566 = arith.select %565, %562, %563 : vector<8x256xi1>, vector<8x256xbf16>
    %cst_221 = arith.constant 0.000000e+00 : bf16
    %567 = vector.broadcast %cst_221 : bf16 to vector<8x15xbf16>
    %568 = vector.extract_strided_slice %535 {offsets = [0, 15], sizes = [8, 241], strides = [1, 1]} : vector<8x256xbf16> to vector<8x241xbf16>
    %569 = tpu.concatenate %568, %567 in 1 : vector<8x241xbf16>, vector<8x15xbf16> -> vector<8x256xbf16>
    %cst_222 = arith.constant 0.000000e+00 : bf16
    %570 = vector.broadcast %cst_222 : bf16 to vector<8x256xbf16>
    %571 = vector.shape_cast %18 : vector<1x256xi1> to vector<1x256xi1>
    %572 = vector.broadcast %571 : vector<1x256xi1> to vector<8x256xi1>
    %573 = arith.select %572, %569, %570 : vector<8x256xi1>, vector<8x256xbf16>
    %cst_223 = arith.constant 0.000000e+00 : bf16
    %574 = vector.broadcast %cst_223 : bf16 to vector<8x16xbf16>
    %575 = vector.extract_strided_slice %535 {offsets = [0, 16], sizes = [8, 240], strides = [1, 1]} : vector<8x256xbf16> to vector<8x240xbf16>
    %576 = tpu.concatenate %575, %574 in 1 : vector<8x240xbf16>, vector<8x16xbf16> -> vector<8x256xbf16>
    %cst_224 = arith.constant 0.000000e+00 : bf16
    %577 = vector.broadcast %cst_224 : bf16 to vector<8x17xbf16>
    %578 = vector.extract_strided_slice %535 {offsets = [0, 17], sizes = [8, 239], strides = [1, 1]} : vector<8x256xbf16> to vector<8x239xbf16>
    %579 = tpu.concatenate %578, %577 in 1 : vector<8x239xbf16>, vector<8x17xbf16> -> vector<8x256xbf16>
    %cst_225 = arith.constant 0.000000e+00 : bf16
    %580 = vector.broadcast %cst_225 : bf16 to vector<8x256xbf16>
    %581 = vector.shape_cast %20 : vector<1x256xi1> to vector<1x256xi1>
    %582 = vector.broadcast %581 : vector<1x256xi1> to vector<8x256xi1>
    %583 = arith.select %582, %579, %580 : vector<8x256xi1>, vector<8x256xbf16>
    %584 = arith.truncf %377 : vector<8x256xf32> to vector<8x256xbf16>
    %cst_226 = arith.constant 0.000000e+00 : bf16
    %585 = vector.broadcast %cst_226 : bf16 to vector<8x17xbf16>
    %586 = vector.extract_strided_slice %584 {offsets = [0, 0], sizes = [8, 239], strides = [1, 1]} : vector<8x256xbf16> to vector<8x239xbf16>
    %587 = tpu.concatenate %585, %586 in 1 : vector<8x17xbf16>, vector<8x239xbf16> -> vector<8x256xbf16>
    %cst_227 = arith.constant 0.000000e+00 : bf16
    %588 = vector.broadcast %cst_227 : bf16 to vector<8x256xbf16>
    %589 = vector.shape_cast %18 : vector<1x256xi1> to vector<1x256xi1>
    %590 = vector.broadcast %589 : vector<1x256xi1> to vector<8x256xi1>
    %591 = arith.select %590, %587, %588 : vector<8x256xi1>, vector<8x256xbf16>
    %cst_228 = arith.constant 0.000000e+00 : bf16
    %592 = vector.broadcast %cst_228 : bf16 to vector<8x16xbf16>
    %593 = vector.extract_strided_slice %584 {offsets = [0, 0], sizes = [8, 240], strides = [1, 1]} : vector<8x256xbf16> to vector<8x240xbf16>
    %594 = tpu.concatenate %592, %593 in 1 : vector<8x16xbf16>, vector<8x240xbf16> -> vector<8x256xbf16>
    %cst_229 = arith.constant 0.000000e+00 : bf16
    %595 = vector.broadcast %cst_229 : bf16 to vector<8x15xbf16>
    %596 = vector.extract_strided_slice %584 {offsets = [0, 0], sizes = [8, 241], strides = [1, 1]} : vector<8x256xbf16> to vector<8x241xbf16>
    %597 = tpu.concatenate %595, %596 in 1 : vector<8x15xbf16>, vector<8x241xbf16> -> vector<8x256xbf16>
    %cst_230 = arith.constant 0.000000e+00 : bf16
    %598 = vector.broadcast %cst_230 : bf16 to vector<8x256xbf16>
    %599 = vector.shape_cast %20 : vector<1x256xi1> to vector<1x256xi1>
    %600 = vector.broadcast %599 : vector<1x256xi1> to vector<8x256xi1>
    %601 = arith.select %600, %597, %598 : vector<8x256xi1>, vector<8x256xbf16>
    %cst_231 = arith.constant 0.000000e+00 : bf16
    %602 = vector.broadcast %cst_231 : bf16 to vector<8x1xbf16>
    %603 = vector.extract_strided_slice %584 {offsets = [0, 0], sizes = [8, 255], strides = [1, 1]} : vector<8x256xbf16> to vector<8x255xbf16>
    %604 = tpu.concatenate %602, %603 in 1 : vector<8x1xbf16>, vector<8x255xbf16> -> vector<8x256xbf16>
    %cst_232 = arith.constant 0.000000e+00 : bf16
    %605 = vector.broadcast %cst_232 : bf16 to vector<8x256xbf16>
    %606 = vector.shape_cast %18 : vector<1x256xi1> to vector<1x256xi1>
    %607 = vector.broadcast %606 : vector<1x256xi1> to vector<8x256xi1>
    %608 = arith.select %607, %604, %605 : vector<8x256xi1>, vector<8x256xbf16>
    %cst_233 = arith.constant 0.000000e+00 : bf16
    %609 = vector.broadcast %cst_233 : bf16 to vector<8x1xbf16>
    %610 = vector.extract_strided_slice %584 {offsets = [0, 1], sizes = [8, 255], strides = [1, 1]} : vector<8x256xbf16> to vector<8x255xbf16>
    %611 = tpu.concatenate %610, %609 in 1 : vector<8x255xbf16>, vector<8x1xbf16> -> vector<8x256xbf16>
    %cst_234 = arith.constant 0.000000e+00 : bf16
    %612 = vector.broadcast %cst_234 : bf16 to vector<8x256xbf16>
    %613 = vector.shape_cast %20 : vector<1x256xi1> to vector<1x256xi1>
    %614 = vector.broadcast %613 : vector<1x256xi1> to vector<8x256xi1>
    %615 = arith.select %614, %611, %612 : vector<8x256xi1>, vector<8x256xbf16>
    %cst_235 = arith.constant 0.000000e+00 : bf16
    %616 = vector.broadcast %cst_235 : bf16 to vector<8x15xbf16>
    %617 = vector.extract_strided_slice %584 {offsets = [0, 15], sizes = [8, 241], strides = [1, 1]} : vector<8x256xbf16> to vector<8x241xbf16>
    %618 = tpu.concatenate %617, %616 in 1 : vector<8x241xbf16>, vector<8x15xbf16> -> vector<8x256xbf16>
    %cst_236 = arith.constant 0.000000e+00 : bf16
    %619 = vector.broadcast %cst_236 : bf16 to vector<8x256xbf16>
    %620 = vector.shape_cast %18 : vector<1x256xi1> to vector<1x256xi1>
    %621 = vector.broadcast %620 : vector<1x256xi1> to vector<8x256xi1>
    %622 = arith.select %621, %618, %619 : vector<8x256xi1>, vector<8x256xbf16>
    %cst_237 = arith.constant 0.000000e+00 : bf16
    %623 = vector.broadcast %cst_237 : bf16 to vector<8x16xbf16>
    %624 = vector.extract_strided_slice %584 {offsets = [0, 16], sizes = [8, 240], strides = [1, 1]} : vector<8x256xbf16> to vector<8x240xbf16>
    %625 = tpu.concatenate %624, %623 in 1 : vector<8x240xbf16>, vector<8x16xbf16> -> vector<8x256xbf16>
    %cst_238 = arith.constant 0.000000e+00 : bf16
    %626 = vector.broadcast %cst_238 : bf16 to vector<8x17xbf16>
    %627 = vector.extract_strided_slice %584 {offsets = [0, 17], sizes = [8, 239], strides = [1, 1]} : vector<8x256xbf16> to vector<8x239xbf16>
    %628 = tpu.concatenate %627, %626 in 1 : vector<8x239xbf16>, vector<8x17xbf16> -> vector<8x256xbf16>
    %cst_239 = arith.constant 0.000000e+00 : bf16
    %629 = vector.broadcast %cst_239 : bf16 to vector<8x256xbf16>
    %630 = vector.shape_cast %20 : vector<1x256xi1> to vector<1x256xi1>
    %631 = vector.broadcast %630 : vector<1x256xi1> to vector<8x256xi1>
    %632 = arith.select %631, %628, %629 : vector<8x256xi1>, vector<8x256xbf16>
    %633 = tpu.concatenate %542, %545, %552, %559, %535, %566, %573, %576, %583, %591, %594, %601, %608, %584, %615, %622 in 0 : vector<8x256xbf16>, vector<8x256xbf16>, vector<8x256xbf16>, vector<8x256xbf16>, vector<8x256xbf16>, vector<8x256xbf16>, vector<8x256xbf16>, vector<8x256xbf16>, vector<8x256xbf16>, vector<8x256xbf16>, vector<8x256xbf16>, vector<8x256xbf16>, vector<8x256xbf16>, vector<8x256xbf16>, vector<8x256xbf16>, vector<8x256xbf16> -> vector<128x256xbf16>
    %634 = tpu.concatenate %625, %632 in 0 : vector<8x256xbf16>, vector<8x256xbf16> -> vector<16x256xbf16>
    %635 = tpu.concatenate %633, %634 in 0 : vector<128x256xbf16>, vector<16x256xbf16> -> vector<144x256xbf16>
    %c0_240 = arith.constant 0 : index
    %c0_241 = arith.constant 0 : index
    %636 = vector.load %arg17[%c0_240, %c0_241] : memref<32x144xbf16, #tpu.memory_space<vmem>>, vector<32x144xbf16>
    %cst_242 = arith.constant dense<0.000000e+00> : vector<32x256xf32>
    %637 = tpu.matmul %636, %635, %cst_242 {dimension_numbers = #tpu.dot_dimension_numbers<[1], [0], [0], [1], [0, 0, 1, 1], [], []>} : vector<32x144xbf16>, vector<144x256xbf16>, vector<32x256xf32> -> vector<32x256xf32>
    %c0_243 = arith.constant 0 : index
    %c0_244 = arith.constant 0 : index
    %638 = vector.load %arg18[%c0_243, %c0_244] : memref<32x1xf32, #tpu.memory_space<vmem>>, vector<32x1xf32>
    %639 = vector.broadcast %638 : vector<32x1xf32> to vector<32x256xf32>
    %640 = arith.addf %637, %639 : vector<32x256xf32>
    %641 = vector.extract_strided_slice %640 {offsets = [0, 0], sizes = [16, 256], strides = [1, 1]} : vector<32x256xf32> to vector<16x256xf32>
    %cst_245 = arith.constant 0.000000e+00 : f32
    %642 = vector.broadcast %cst_245 : f32 to vector<16x256xf32>
    %643 = arith.maximumf %641, %642 : vector<16x256xf32>
    %644 = vector.extract_strided_slice %640 {offsets = [16, 0], sizes = [16, 256], strides = [1, 1]} : vector<32x256xf32> to vector<16x256xf32>
    %645 = arith.truncf %643 : vector<16x256xf32> to vector<16x256xbf16>
    %cst_246 = arith.constant 0.000000e+00 : bf16
    %646 = vector.broadcast %cst_246 : bf16 to vector<16x17xbf16>
    %647 = vector.extract_strided_slice %645 {offsets = [0, 0], sizes = [16, 239], strides = [1, 1]} : vector<16x256xbf16> to vector<16x239xbf16>
    %648 = tpu.concatenate %646, %647 in 1 : vector<16x17xbf16>, vector<16x239xbf16> -> vector<16x256xbf16>
    %cst_247 = arith.constant 0.000000e+00 : bf16
    %649 = vector.broadcast %cst_247 : bf16 to vector<16x256xbf16>
    %650 = vector.shape_cast %18 : vector<1x256xi1> to vector<1x256xi1>
    %651 = vector.broadcast %650 : vector<1x256xi1> to vector<16x256xi1>
    %652 = arith.select %651, %648, %649 : vector<16x256xi1>, vector<16x256xbf16>
    %cst_248 = arith.constant 0.000000e+00 : bf16
    %653 = vector.broadcast %cst_248 : bf16 to vector<16x16xbf16>
    %654 = vector.extract_strided_slice %645 {offsets = [0, 0], sizes = [16, 240], strides = [1, 1]} : vector<16x256xbf16> to vector<16x240xbf16>
    %655 = tpu.concatenate %653, %654 in 1 : vector<16x16xbf16>, vector<16x240xbf16> -> vector<16x256xbf16>
    %cst_249 = arith.constant 0.000000e+00 : bf16
    %656 = vector.broadcast %cst_249 : bf16 to vector<16x15xbf16>
    %657 = vector.extract_strided_slice %645 {offsets = [0, 0], sizes = [16, 241], strides = [1, 1]} : vector<16x256xbf16> to vector<16x241xbf16>
    %658 = tpu.concatenate %656, %657 in 1 : vector<16x15xbf16>, vector<16x241xbf16> -> vector<16x256xbf16>
    %cst_250 = arith.constant 0.000000e+00 : bf16
    %659 = vector.broadcast %cst_250 : bf16 to vector<16x256xbf16>
    %660 = vector.shape_cast %20 : vector<1x256xi1> to vector<1x256xi1>
    %661 = vector.broadcast %660 : vector<1x256xi1> to vector<16x256xi1>
    %662 = arith.select %661, %658, %659 : vector<16x256xi1>, vector<16x256xbf16>
    %cst_251 = arith.constant 0.000000e+00 : bf16
    %663 = vector.broadcast %cst_251 : bf16 to vector<16x1xbf16>
    %664 = vector.extract_strided_slice %645 {offsets = [0, 0], sizes = [16, 255], strides = [1, 1]} : vector<16x256xbf16> to vector<16x255xbf16>
    %665 = tpu.concatenate %663, %664 in 1 : vector<16x1xbf16>, vector<16x255xbf16> -> vector<16x256xbf16>
    %cst_252 = arith.constant 0.000000e+00 : bf16
    %666 = vector.broadcast %cst_252 : bf16 to vector<16x256xbf16>
    %667 = vector.shape_cast %18 : vector<1x256xi1> to vector<1x256xi1>
    %668 = vector.broadcast %667 : vector<1x256xi1> to vector<16x256xi1>
    %669 = arith.select %668, %665, %666 : vector<16x256xi1>, vector<16x256xbf16>
    %cst_253 = arith.constant 0.000000e+00 : bf16
    %670 = vector.broadcast %cst_253 : bf16 to vector<16x1xbf16>
    %671 = vector.extract_strided_slice %645 {offsets = [0, 1], sizes = [16, 255], strides = [1, 1]} : vector<16x256xbf16> to vector<16x255xbf16>
    %672 = tpu.concatenate %671, %670 in 1 : vector<16x255xbf16>, vector<16x1xbf16> -> vector<16x256xbf16>
    %cst_254 = arith.constant 0.000000e+00 : bf16
    %673 = vector.broadcast %cst_254 : bf16 to vector<16x256xbf16>
    %674 = vector.shape_cast %20 : vector<1x256xi1> to vector<1x256xi1>
    %675 = vector.broadcast %674 : vector<1x256xi1> to vector<16x256xi1>
    %676 = arith.select %675, %672, %673 : vector<16x256xi1>, vector<16x256xbf16>
    %cst_255 = arith.constant 0.000000e+00 : bf16
    %677 = vector.broadcast %cst_255 : bf16 to vector<16x15xbf16>
    %678 = vector.extract_strided_slice %645 {offsets = [0, 15], sizes = [16, 241], strides = [1, 1]} : vector<16x256xbf16> to vector<16x241xbf16>
    %679 = tpu.concatenate %678, %677 in 1 : vector<16x241xbf16>, vector<16x15xbf16> -> vector<16x256xbf16>
    %cst_256 = arith.constant 0.000000e+00 : bf16
    %680 = vector.broadcast %cst_256 : bf16 to vector<16x256xbf16>
    %681 = vector.shape_cast %18 : vector<1x256xi1> to vector<1x256xi1>
    %682 = vector.broadcast %681 : vector<1x256xi1> to vector<16x256xi1>
    %683 = arith.select %682, %679, %680 : vector<16x256xi1>, vector<16x256xbf16>
    %cst_257 = arith.constant 0.000000e+00 : bf16
    %684 = vector.broadcast %cst_257 : bf16 to vector<16x16xbf16>
    %685 = vector.extract_strided_slice %645 {offsets = [0, 16], sizes = [16, 240], strides = [1, 1]} : vector<16x256xbf16> to vector<16x240xbf16>
    %686 = tpu.concatenate %685, %684 in 1 : vector<16x240xbf16>, vector<16x16xbf16> -> vector<16x256xbf16>
    %cst_258 = arith.constant 0.000000e+00 : bf16
    %687 = vector.broadcast %cst_258 : bf16 to vector<16x17xbf16>
    %688 = vector.extract_strided_slice %645 {offsets = [0, 17], sizes = [16, 239], strides = [1, 1]} : vector<16x256xbf16> to vector<16x239xbf16>
    %689 = tpu.concatenate %688, %687 in 1 : vector<16x239xbf16>, vector<16x17xbf16> -> vector<16x256xbf16>
    %cst_259 = arith.constant 0.000000e+00 : bf16
    %690 = vector.broadcast %cst_259 : bf16 to vector<16x256xbf16>
    %691 = vector.shape_cast %20 : vector<1x256xi1> to vector<1x256xi1>
    %692 = vector.broadcast %691 : vector<1x256xi1> to vector<16x256xi1>
    %693 = arith.select %692, %689, %690 : vector<16x256xi1>, vector<16x256xbf16>
    %694 = tpu.concatenate %652, %655, %662, %669, %645, %676, %683, %686, %693 in 0 : vector<16x256xbf16>, vector<16x256xbf16>, vector<16x256xbf16>, vector<16x256xbf16>, vector<16x256xbf16>, vector<16x256xbf16>, vector<16x256xbf16>, vector<16x256xbf16>, vector<16x256xbf16> -> vector<144x256xbf16>
    %c0_260 = arith.constant 0 : index
    %c0_261 = arith.constant 0 : index
    %695 = vector.load %arg19[%c0_260, %c0_261] : memref<16x144xbf16, #tpu.memory_space<vmem>>, vector<16x144xbf16>
    %cst_262 = arith.constant dense<0.000000e+00> : vector<16x256xf32>
    %696 = tpu.matmul %695, %694, %cst_262 {dimension_numbers = #tpu.dot_dimension_numbers<[1], [0], [0], [1], [0, 0, 1, 1], [], []>} : vector<16x144xbf16>, vector<144x256xbf16>, vector<16x256xf32> -> vector<16x256xf32>
    %c0_263 = arith.constant 0 : index
    %c0_264 = arith.constant 0 : index
    %697 = vector.load %arg20[%c0_263, %c0_264] : memref<16x1xf32, #tpu.memory_space<vmem>>, vector<16x1xf32>
    %698 = vector.broadcast %697 : vector<16x1xf32> to vector<16x256xf32>
    %699 = arith.addf %696, %698 : vector<16x256xf32>
    %cst_265 = arith.constant 0.000000e+00 : f32
    %700 = vector.broadcast %cst_265 : f32 to vector<16x256xf32>
    %701 = arith.maximumf %699, %700 : vector<16x256xf32>
    %702 = arith.addf %701, %644 : vector<16x256xf32>
    %c1_266 = arith.constant 1 : index
    %c0_267 = arith.constant 0 : index
    %c0_268 = arith.constant 0 : index
    %703 = vector.load %arg21[%c1_266, %c0_267, %c0_268] : memref<2x16x256xf32, #tpu.memory_space<vmem>>, vector<1x16x256xf32>
    %704 = vector.shape_cast %703 : vector<1x16x256xf32> to vector<16x256xf32>
    %705 = vector.shape_cast %702 : vector<16x256xf32> to vector<1x16x256xf32>
    tpu.vector_store %arg21[%c1_266, %c0_267, %c0_268], %705 {strides = array<i32>} : memref<2x16x256xf32, #tpu.memory_space<vmem>>, vector<1x16x256xf32>,
    return
  }
  func.func @transform_0(%arg0: i32) -> (i32, i32, i32) {
    %c0_i32 = arith.constant 0 : i32
    %c0_i32_0 = arith.constant 0 : i32
    %c0_i32_1 = arith.constant 0 : i32
    return %arg0, %c0_i32, %c0_i32_0 : i32, i32, i32
  }
  func.func @transform_1(%arg0: i32) -> (i32, i32, i32) {
    %c0_i32 = arith.constant 0 : i32
    %c0_i32_0 = arith.constant 0 : i32
    %c0_i32_1 = arith.constant 0 : i32
    return %arg0, %c0_i32, %c0_i32_0 : i32, i32, i32
  }
  func.func @transform_2(%arg0: i32) -> (i32, i32) {
    %c0_i32 = arith.constant 0 : i32
    %c0_i32_0 = arith.constant 0 : i32
    %c0_i32_1 = arith.constant 0 : i32
    return %c0_i32, %c0_i32_0 : i32, i32
  }
  func.func @transform_3(%arg0: i32) -> (i32, i32) {
    %c0_i32 = arith.constant 0 : i32
    %c0_i32_0 = arith.constant 0 : i32
    %c0_i32_1 = arith.constant 0 : i32
    return %c0_i32, %c0_i32_0 : i32, i32
  }
  func.func @transform_4(%arg0: i32) -> (i32, i32) {
    %c0_i32 = arith.constant 0 : i32
    %c0_i32_0 = arith.constant 0 : i32
    %c0_i32_1 = arith.constant 0 : i32
    return %c0_i32, %c0_i32_0 : i32, i32
  }
  func.func @transform_5(%arg0: i32) -> (i32, i32) {
    %c0_i32 = arith.constant 0 : i32
    %c0_i32_0 = arith.constant 0 : i32
    %c0_i32_1 = arith.constant 0 : i32
    return %c0_i32, %c0_i32_0 : i32, i32
  }
  func.func @transform_6(%arg0: i32) -> (i32, i32) {
    %c0_i32 = arith.constant 0 : i32
    %c0_i32_0 = arith.constant 0 : i32
    %c0_i32_1 = arith.constant 0 : i32
    return %c0_i32, %c0_i32_0 : i32, i32
  }
  func.func @transform_7(%arg0: i32) -> (i32, i32) {
    %c0_i32 = arith.constant 0 : i32
    %c0_i32_0 = arith.constant 0 : i32
    %c0_i32_1 = arith.constant 0 : i32
    return %c0_i32, %c0_i32_0 : i32, i32
  }
  func.func @transform_8(%arg0: i32) -> (i32, i32) {
    %c0_i32 = arith.constant 0 : i32
    %c0_i32_0 = arith.constant 0 : i32
    %c0_i32_1 = arith.constant 0 : i32
    return %c0_i32, %c0_i32_0 : i32, i32
  }
  func.func @transform_9(%arg0: i32) -> (i32, i32) {
    %c0_i32 = arith.constant 0 : i32
    %c0_i32_0 = arith.constant 0 : i32
    %c0_i32_1 = arith.constant 0 : i32
    return %c0_i32, %c0_i32_0 : i32, i32
  }
  func.func @transform_10(%arg0: i32) -> (i32, i32) {
    %c0_i32 = arith.constant 0 : i32
    %c0_i32_0 = arith.constant 0 : i32
    %c0_i32_1 = arith.constant 0 : i32
    return %c0_i32, %c0_i32_0 : i32, i32
  }
  func.func @transform_11(%arg0: i32) -> (i32, i32) {
    %c0_i32 = arith.constant 0 : i32
    %c0_i32_0 = arith.constant 0 : i32
    %c0_i32_1 = arith.constant 0 : i32
    return %c0_i32, %c0_i32_0 : i32, i32
  }
  func.func @transform_12(%arg0: i32) -> (i32, i32) {
    %c0_i32 = arith.constant 0 : i32
    %c0_i32_0 = arith.constant 0 : i32
    %c0_i32_1 = arith.constant 0 : i32
    return %c0_i32, %c0_i32_0 : i32, i32
  }
  func.func @transform_13(%arg0: i32) -> (i32, i32) {
    %c0_i32 = arith.constant 0 : i32
    %c0_i32_0 = arith.constant 0 : i32
    %c0_i32_1 = arith.constant 0 : i32
    return %c0_i32, %c0_i32_0 : i32, i32
  }
  func.func @transform_14(%arg0: i32) -> (i32, i32) {
    %c0_i32 = arith.constant 0 : i32
    %c0_i32_0 = arith.constant 0 : i32
    %c0_i32_1 = arith.constant 0 : i32
    return %c0_i32, %c0_i32_0 : i32, i32
  }
  func.func @transform_15(%arg0: i32) -> (i32, i32) {
    %c0_i32 = arith.constant 0 : i32
    %c0_i32_0 = arith.constant 0 : i32
    %c0_i32_1 = arith.constant 0 : i32
    return %c0_i32, %c0_i32_0 : i32, i32
  }
  func.func @transform_16(%arg0: i32) -> (i32, i32) {
    %c0_i32 = arith.constant 0 : i32
    %c0_i32_0 = arith.constant 0 : i32
    %c0_i32_1 = arith.constant 0 : i32
    return %c0_i32, %c0_i32_0 : i32, i32
  }
  func.func @transform_17(%arg0: i32) -> (i32, i32) {
    %c0_i32 = arith.constant 0 : i32
    %c0_i32_0 = arith.constant 0 : i32
    %c0_i32_1 = arith.constant 0 : i32
    return %c0_i32, %c0_i32_0 : i32, i32
  }
  func.func @transform_18(%arg0: i32) -> (i32, i32) {
    %c0_i32 = arith.constant 0 : i32
    %c0_i32_0 = arith.constant 0 : i32
    %c0_i32_1 = arith.constant 0 : i32
    return %c0_i32, %c0_i32_0 : i32, i32
  }
  func.func @transform_19(%arg0: i32) -> (i32, i32) {
    %c0_i32 = arith.constant 0 : i32
    %c0_i32_0 = arith.constant 0 : i32
    %c0_i32_1 = arith.constant 0 : i32
    return %c0_i32, %c0_i32_0 : i32, i32
  }
  func.func @transform_20(%arg0: i32) -> (i32, i32, i32) {
    %c0_i32 = arith.constant 0 : i32
    %c0_i32_0 = arith.constant 0 : i32
    %c0_i32_1 = arith.constant 0 : i32
    return %arg0, %c0_i32, %c0_i32_0 : i32, i32, i32
  }
}

</mosaic_0001>

<bundles_post_ra>
// kernel: decoder_block_forward.1
= control target key start
LH: loop header
LB: loop body
LE: loop exit
PB: predicated region body
PF: predicated region fallthrough
CT: control target
= control target key end

     0   :  { %v2936_v0 = vmov 0   ;;  %s4581_s29 = smov 17   ;;  %s4547_s30 = smov 16   ;;  %v68_v18 = vlaneseq  ;;  %vm172_vm5 = vcmask 130048   ;;  %vm142_vm7 = vcmask 138240   ;;  %s4525_s2 = inlined_call_operand.vmem [shape: f32[8,1], index: 2, kind: input, shape index: {}]   ;;  %s4526_s3 = inlined_call_operand.vmem [shape: f32[8,1], index: 3, kind: input, shape index: {}]   ;;  %s4527_s1 = inlined_call_operand.vmem [shape: f32[2,8,256], index: 1, kind: input, shape index: {}]   ;;  %s4528_s5 = inlined_call_operand.vmem [shape: f32[8,1], index: 5, kind: input, shape index: {}]   ;;  %s4529_s7 = inlined_call_operand.vmem [shape: f32[8,1], index: 7, kind: input, shape index: {}]   ;;  %s4530_s6 = inlined_call_operand.vmem [shape: f32[8,1], index: 6, kind: input, shape index: {}]   ;;  %s4531_s4 = inlined_call_operand.vmem [shape: bf16[8,72], index: 4, kind: input, shape index: {}]   ;;  %s4532_s0 = inlined_call_operand.vmem [shape: f32[2,8,64], index: 0, kind: input, shape index: {}]   ;;  %s4533_s9 = inlined_call_operand.vmem [shape: f32[8,1], index: 9, kind: input, shape index: {}]   ;;  %s4534_s11 = inlined_call_operand.vmem [shape: f32[8,1], index: 11, kind: input, shape index: {}]   ;;  %s4535_s14 = inlined_call_operand.vmem [shape: f32[256,64], index: 14, kind: input, shape index: {}]   ;;  %s4536_s10 = inlined_call_operand.vmem [shape: f32[8,1], index: 10, kind: input, shape index: {}]   ;;  %s4537_s8 = inlined_call_operand.vmem [shape: bf16[8,72], index: 8, kind: input, shape index: {}]   ;;  %s4538_s12 = inlined_call_operand.vmem [shape: f32[8,8], index: 12, kind: input, shape index: {}]   ;;  %s4539_s15 = inlined_call_operand.vmem [shape: f32[64,256], index: 15, kind: input, shape index: {}]   ;;  %s4540_s13 = inlined_call_operand.vmem [shape: f32[8,1], index: 13, kind: input, shape index: {}]   ;;  %s4541_s17 = inlined_call_operand.vmem [shape: f32[32,1], index: 17, kind: input, shape index: {}]   ;;  %s4542_s16 = inlined_call_operand.vmem [shape: bf16[32,144], index: 16, kind: input, shape index: {}]   ;;  %s4543_s18 = inlined_call_operand.vmem [shape: bf16[16,144], index: 18, kind: input, shape index: {}]   ;;  %s4544_s19 = inlined_call_operand.vmem [shape: f32[16,1], index: 19, kind: input, shape index: {}]   ;;  %s4545_s20 = inlined_call_operand.vmem [shape: f32[2,16,256], index: 20, kind: output, shape index: {}]  }
   0x1   :  { %4584 = sst [smem:[#allocation2_spill]] %s4525_s2  ;;  %2897 = vset.pattern.permute.xlu0 %v2936_v0  ;;  %2898 = vset.pattern.permute.xlu1 %v2936_v0  ;;  %s4579_s2 = smov 1   ;;  %v3136_v17 = vld [vmem:[%s4530_s6] sm:$0xff]  ;;  %vm210_vm10 = vcmask 7168   ;;  %vm281_vm11 = vcmask 1043456   ;;  %vm4583_vm12 = vcmask 1039360  }
   0x2   :  { %4585 = sst [smem:[#allocation3_spill]] %s4526_s3  ;;  %s4589_s23 = sld [smem:[#allocation2_spill]]  ;;  %363 = vmatprep.mubr.bf16.mxu0 %v2936_v0  ;;  %v3139_v19 = vand.u32 127, %v68_v18  ;;  %v157_v23 = vshrl.u32 %v68_v18, 7  ;;  %vm4565_vm14 = vcmask 121856  }
   0x3   :  { %4586 = sst [smem:[#allocation4_spill]] %s4527_s1  ;;  %s4590_s25 = sld [smem:[#allocation3_spill]] }
   0x4   :  { %4587 = sst [smem:[#allocation5_spill]] %s4528_s5  ;;  %s4591_s27 = sld [smem:[#allocation4_spill]]  ;;  %v70_v20 = vadd.s32 128, %v3139_v19  ;;  %v75_v21 = vand.u32 15, %v3139_v19  ;;  %v158_v24 = vsub.s32 0, %v157_v23  ;;  %v162_v26 = vsub.s32 4, %v157_v23 }
   0x5   :  { %4588 = sst [smem:[#allocation6_spill]] %s4529_s7  ;;  %s4549_s21 = smov 15  }
   0x6   :  { %s4559_s3 = smov 127   ;;  %s2942_s22 = smov 112   ;;  %v82_v22 = vand.u32 15, %v70_v20  ;;  %vm95_vm0 = vcmp.ge.s32.totalorder %v75_v21, 1  ;;  %vm97_vm3 = vcmp.le.s32.totalorder %v75_v21, 14 }
   0x7   :  { %s4570_s24 = smov 113   ;;  %s4592_s5 = sld [smem:[#allocation5_spill]] }
   0x8   :  { %v3062_v1 = vld [vmem:[%s4589_s23] sm:$0xff]  ;;  %s4556_s23 = smov 111   ;;  %s4593_s7 = sld [smem:[#allocation6_spill]]  ;;  %vm96_vm1 = vcmp.ge.s32.totalorder %v82_v22, 1  ;;  %vm98_vm4 = vcmp.le.s32.totalorder %v82_v22, 14 }
   0x9   :  { %119 = vperm.xlu0 %2897, %v3062_v1   ;;  %v3070_v2 = vld [vmem:[%s4590_s25] sm:$0xff]  ;;  %vm154_vm2 = vmpackc.low %vm96_vm1, %vm95_vm0  ;;  %vm249_vm0 = vcmask 916480   ;;  %vm4561_vm1 = vcmask 924672   ;;  %s4554_s25 = smov 8   ;;  %s4551_s26 = smov 9  }
   0xa   :  { %v3076_v4 = vld [vmem:[%s4591_s27] sm:$0xff]  ;;  %v3081_v5 = vld [vmem:[%s4591_s27 + $0x8] sm:$0xff]  ;;  %v155_v25 = vsel %vm154_vm2, 65537, %v2936_v0  ;;  %vm192_vm6 = vmpackc.low %vm98_vm4, %vm97_vm3  ;;  %vm4562_vm2 = vcmask 908288   ;;  %vm321_vm3 = vcmask 588800   ;;  %s4552_s28 = smov 7  }
   0xb   :  { %v3144_v29 = vrot.slane %v155_v25, %v158_v24  ;;  %v3146_v30 = vrot.slane %v155_v25, %v162_v26  ;;  %v193_v34 = vsel %vm192_vm6, 65537, %v2936_v0  ;;  %vm4575_vm4 = vmmov 0   ;;  %s4558_s6 = smov 119  }
   0xc   :  { %v3154_v37 = vrot.slane %v193_v34, %v162_v26  ;;  %v3159_v44 = vrot.slane %v193_v34, %v158_v24  ;;  %vm4578_vm6 = vcmask 64512  }
   0xd   :  { %127 = vperm.xlu0 %2897, %v3070_v2   ;;  %v3120_v15 = vld [vmem:[%s4592_s5] sm:$0xff]  ;;  %vm164_vm8 = vcmp.ne.s16.totalorder %v3144_v29, 0  ;;  %vm4566_vm9 = vcmp.ne.s16.totalorder %v3146_v30, 0  ;;  %s4553_s5 = smov 121  }
   0xe   :  { %v3128_v16 = vld [vmem:[%s4593_s7] sm:$0xff]  ;;  %vm4563_vm13 = vcmp.ne.s16.totalorder %v3154_v37, 0  ;;  %vm4564_vm15 = vcmp.ne.s16.totalorder %v3159_v44, 0  ;;  %s4555_s7 = smov 120  }
  0x88   :  { %v120_v3 = vpop.permute.xlu0 %119 }
  0x89   :  { %v122_v6 = vmul.f32 %v120_v3, %v3076_v4  ;;  %v123_v7 = vmul.f32 %v120_v3, %v3081_v5 }
  0x8c   :  { %v128_v8 = vpop.permute.xlu0 %127 }
  0x8d   :  { %v130_v9 = vadd.f32 %v128_v8, %v122_v6  ;;  %v131_v10 = vadd.f32 %v128_v8, %v123_v7 }
  0x8f   :  { %v132_v11 = vmax.f32 %v130_v9, 0.0  ;;  %v133_v12 = vmax.f32 %v131_v10, 0.0 }
  0x91   :  { %v3085_v13 = vpack.c.bf16 %v132_v11, %v132_v11  ;;  %v3091_v14 = vpack.c.bf16 %v133_v12, %v133_v12 }
  0x93   :  { %138 = vrot.lane.b32.xlu0 %v3085_v13, %s4581_s29  ;;  %168 = vrot.lane.b32.xlu1 %v3085_v13, %s4547_s30 }
  0x97   :  { %206 = vrot.lane.b32.xlu0 %v3085_v13, %s4579_s2  ;;  %170 = vrot.lane.b32.xlu1 %v3091_v14, %s4547_s30  ;;  %s4644_s30 = smov 121  }
  0x9b   :  { %177 = vrot.lane.b32.xlu0 %v3085_v13, %s4549_s21  ;;  %140 = vrot.lane.b32.xlu1 %v3091_v14, %s4581_s29 }
  0x9f   :  { %221 = vrot.lane.b32.xlu0 %v3091_v14, %s4559_s3  ;;  %208 = vrot.lane.b32.xlu1 %v3091_v14, %s4579_s2 }
  0xa3   :  { %247 = vrot.lane.b32.xlu0 %v3091_v14, %s2942_s22  ;;  %179 = vrot.lane.b32.xlu1 %v3091_v14, %s4549_s21 }
  0xa7   :  { %245 = vrot.lane.b32.xlu0 %v3085_v13, %s2942_s22  ;;  %219 = vrot.lane.b32.xlu1 %v3085_v13, %s4559_s3 }
  0xab   :  { %254 = vrot.lane.b32.xlu0 %v3085_v13, %s4556_s23  ;;  %234 = vrot.lane.b32.xlu1 %v3091_v14, %s4570_s24 }
  0xaf   :  { %318 = vperm.xlu0 %2897, %v3120_v15   ;;  %232 = vrot.lane.b32.xlu1 %v3085_v13, %s4570_s24  ;;  %s4599_s24 = smov 16  }
  0xb3   :  { %438 = vperm.xlu0 %2897, %v3128_v16   ;;  %256 = vrot.lane.b32.xlu1 %v3091_v14, %s4556_s23  ;;  %s4647_s23 = smov 120  }
  0xb7   :  { %431 = vperm.xlu1 %2898, %v3136_v17  }
 0x105   :  { %v139_v27 = vpop.permute.xlu0 %138  ;;  %v169_v28 = vpop.permute.xlu1 %168 }
 0x106   :  { %v176_v33 = vsel %vm172_vm5, 0, %v169_v28  ;;  %v148_v35 = vsel %vm142_vm7, 0, %v139_v27 }
 0x107   :  { %v268_v38 = vrot.slane %v176_v33, 4  ;;  %v166_v43 = vsel %vm164_vm8, %v148_v35, 0 }
 0x109   :  { %v207_v31 = vpop.permute.xlu0 %206  ;;  %v171_v32 = vpop.permute.xlu1 %170  ;;  %v284_v50 = vsel %vm281_vm11, %v166_v43, %v268_v38  ;;  %v3216_v43 = vld [vmem:[%s4532_s0] sm:$0xff] }
 0x10a   :  { %v173_v36 = vsel %vm172_vm5, %v169_v28, %v171_v32  ;;  %v215_v47 = vsel %vm210_vm10, 0, %v207_v31 }
 0x10b   :  { %v269_v41 = vrot.slane %v173_v36, 4  ;;  %v217_v56 = vsel %vm164_vm8, %v215_v47, 0 }
 0x10c   :  { %v272_v63 = vrot.slane %v217_v56, 4 }
 0x10d   :  { %v178_v39 = vpop.permute.xlu0 %177  ;;  %v141_v40 = vpop.permute.xlu1 %140 }
 0x10e   :  { %v143_v42 = vsel %vm142_vm7, %v139_v27, %v141_v40  ;;  %v186_v53 = vsel %vm4565_vm14, 0, %v178_v39 }
 0x10f   :  { %v167_v45 = vsel %vm4566_vm9, %v143_v42, 0  ;;  %v204_v62 = vsel %vm4564_vm15, %v186_v53, 0 }
 0x110   :  { %v288_v46 = vsel %vm281_vm11, %v167_v45, %v269_v41  ;;  %v292_v8 = vsel %vm281_vm11, %v204_v62, %v272_v63  ;;  %v314_v41 = vld [vmem:[%s4531_s4] sm:$0xf]  ;;  %v413_v62 = vld [vmem:[%s4535_s14 + $0x88] sm:$0xff] }
 0x111   :  { %v222_v48 = vpop.permute.xlu0 %221  ;;  %331 = vmatprep.subr.bf16.mxu0 %v288_v46  ;;  %v209_v49 = vpop.permute.xlu1 %208  ;;  %v396_v63 = vld [vmem:[%s4535_s14] sm:$0xff] }
 0x112   :  { %v228_v51 = vsel %vm4583_vm12, %v222_v48, 0  ;;  %v211_v52 = vsel %vm210_vm10, %v207_v31, %v209_v49  ;;  %332 = vmatpush1.bf16.msra.mxu0 %v284_v50 }
 0x113   :  { %v231_v54 = vsel %vm4563_vm13, %v228_v51, 0  ;;  %v218_v55 = vsel %vm4566_vm9, %v211_v52, 0  ;;  %v2947_v51 = vmov 0.0  }
 0x114   :  { %v277_v58 = vrot.slane %v231_v54, 4  ;;  %v273_v59 = vrot.slane %v218_v55, 4  ;;  %2746 = vmatprep.subr.bf16.mxu1 %v2947_v51  ;;  %2756 = vmatprep.mubr.msk.bf16.mxu1 %vm4575_vm4, %v2947_v51 }
 0x115   :  { %v180_v57 = vpop.permute.xlu1 %179  ;;  %v248_v60 = vpop.permute.xlu0 %247 }
 0x116   :  { %v182_v61 = vsel %vm4565_vm14, %v178_v39, %v180_v57  ;;  %v304_v10 = vsel %vm281_vm11, %v3091_v14, %v277_v58  ;;  %v253_v11 = vsel %vm249_vm0, %v248_v60, 0 }
 0x117   :  { %v205_v3 = vsel %vm4563_vm13, %v182_v61, 0  ;;  %v280_v22 = vrot.slane %v253_v11, 4  ;;  %v412_v61 = vld [vmem:[%s4535_s14 + $0x80] sm:$0xff]  ;;  %v398_v11 = vld [vmem:[%s4535_s14 + $0x10] sm:$0xff] }
 0x118   :  { %v296_v6 = vsel %vm281_vm11, %v205_v3, %v273_v59  ;;  %v527_v59 = vld [vmem:[%s4533_s9] sm:$0xff]  ;;  %v2784_v3 = vpack.c.bf16 %v413_v62, %v412_v61  ;;  %v410_v61 = vld [vmem:[%s4535_s14 + $0x70] sm:$0xff]  ;;  %v411_v62 = vld [vmem:[%s4535_s14 + $0x78] sm:$0xff] }
 0x119   :  { %333 = vmatprep.subr.bf16.mxu0 %v296_v6  ;;  %v220_v7 = vpop.permute.xlu1 %219  ;;  %v246_v18 = vpop.permute.xlu0 %245  ;;  %v397_v6 = vld [vmem:[%s4535_s14 + $0x8] sm:$0xff] }
 0x11a   :  { %v224_v9 = vsel %vm4583_vm12, %v220_v7, %v222_v48  ;;  %334 = vmatpush1.bf16.msra.mxu0 %v292_v8  ;;  %v250_v25 = vsel %vm249_vm0, %v246_v18, %v248_v60  ;;  %v656_v60 = vld [vmem:[%s4534_s11] sm:$0xff]  ;;  %v414_v7 = vld [vmem:[%s4535_s14 + $0x90] sm:$0xff]  ;;  %v415_v8 = vld [vmem:[%s4535_s14 + $0x98] sm:$0xff] }
 0x11b   :  { %v230_v12 = vsel %vm4564_vm15, %v224_v9, 0  ;;  %335 = vmatprep.subr.bf16.mxu0 %v304_v10  ;;  %v279_v28 = vrot.slane %v250_v25, 4  ;;  %v2786_v9 = vpack.c.bf16 %v397_v6, %v396_v63  ;;  %v2788_v10 = vpack.c.bf16 %v415_v8, %v414_v7  ;;  %v416_v18 = vld [vmem:[%s4535_s14 + $0xa0] sm:$0xff]  ;;  %v418_v25 = vld [vmem:[%s4535_s14 + $0xb0] sm:$0xff] }
 0x11c   :  { %v276_v20 = vrot.slane %v230_v12, 4  ;;  %v399_v12 = vld [vmem:[%s4535_s14 + $0x18] sm:$0xff]  ;;  %v103_v63 = vand.u32 7, %v3139_v19  ;;  %v2814_v6 = vpack.c.bf16 %v411_v62, %v410_v61 }
 0x11d   :  { %v235_v21 = vpop.permute.xlu1 %234 }
 0x11e   :  { %v241_v23 = vsel %vm4561_vm1, %v235_v21, 0  ;;  %v300_v24 = vsel %vm281_vm11, %v3085_v13, %v276_v20  ;;  %v255_v13 = vpop.permute.xlu0 %254  ;;  %v417_v20 = vld [vmem:[%s4535_s14 + $0xa8] sm:$0xff] }
 0x11f   :  { %336 = vmatpush1.bf16.msra.mxu0 %v300_v24  ;;  %v244_v14 = vsel %vm4566_vm9, %v241_v23, 0  ;;  %v400_v23 = vld [vmem:[%s4535_s14 + $0x20] sm:$0xff]  ;;  %v401_v24 = vld [vmem:[%s4535_s14 + $0x28] sm:$0xff] }
 0x120   :  { %v312_v26 = vsel %vm281_vm11, %v244_v14, %v280_v22  ;;  %v2792_v22 = vpack.c.bf16 %v417_v20, %v416_v18  ;;  %v419_v14 = vld [vmem:[%s4535_s14 + $0xb8] sm:$0xff] }
 0x121   :  { %337 = vmatprep.subr.bf16.mxu0 %v312_v26  ;;  %v233_v27 = vpop.permute.xlu1 %232  ;;  %v2794_v26 = vpack.c.bf16 %v401_v24, %v400_v23 }
 0x122   :  { %v237_v31 = vsel %vm4561_vm1, %v233_v27, %v235_v21  ;;  %v2790_v21 = vpack.c.bf16 %v399_v12, %v398_v11  ;;  %v2796_v27 = vpack.c.bf16 %v419_v14, %v418_v25  ;;  %vm111_vm1 = vcmp.ge.s32.totalorder %v103_v63, 1 }
 0x123   :  { %v243_v32 = vsel %vm164_vm8, %v237_v31, 0  ;;  %v403_v31 = vld [vmem:[%s4535_s14 + $0x38] sm:$0xff]  ;;  %vm3351_vm14 = vmpackc.low %vm111_vm1, %vm111_vm1  ;;  %vm4568_vm1 = vcmask 56320  }
 0x124   :  { %v308_v33 = vsel %vm281_vm11, %v243_v32, %v279_v28  ;;  %v402_v28 = vld [vmem:[%s4535_s14 + $0x30] sm:$0xff]  ;;  %v420_v32 = vld [vmem:[%s4535_s14 + $0xc0] sm:$0xff] }
 0x125   :  { %338 = vmatpush1.bf16.msra.mxu0 %v308_v33  ;;  %v257_v34 = vpop.permute.xlu1 %256  ;;  %v421_v33 = vld [vmem:[%s4535_s14 + $0xc8] sm:$0xff] }
 0x126   :  { %v259_v35 = vsel %vm4562_vm2, %v255_v13, %v257_v34  ;;  %v263_v36 = vsel %vm4562_vm2, %v257_v34, 0  ;;  %v2798_v13 = vpack.c.bf16 %v403_v31, %v402_v28  ;;  %v2800_v34 = vpack.c.bf16 %v421_v33, %v420_v32 }
 0x127   :  { %v266_v38 = vsel %vm4563_vm13, %v263_v36, 0  ;;  %v265_v39 = vsel %vm4564_vm15, %v259_v35, 0  ;;  %v404_v35 = vld [vmem:[%s4535_s14 + $0x40] sm:$0xff]  ;;  %v405_v36 = vld [vmem:[%s4535_s14 + $0x48] sm:$0xff]  ;;  %vm112_vm2 = vcmp.le.s32.totalorder %v103_v63, 6  ;;  %vm4567_vm13 = vcmask 515072  }
 0x128   :  { %2607 = vmatprep.subr.msk.bf16.mxu0 %vm281_vm11, %v266_v38  ;;  %v326_v40 = vsel %vm281_vm11, %v265_v39, 0  ;;  %v422_v38 = vld [vmem:[%s4535_s14 + $0xd0] sm:$0xff]  ;;  %v423_v39 = vld [vmem:[%s4535_s14 + $0xd8] sm:$0xff]  ;;  %vm4577_vm15 = vcmask 72704   ;;  %vm3360_vm9 = vmpackc.low %vm112_vm2, %vm112_vm2  ;;  %vm4574_vm2 = vcmask 457728  }
 0x129   :  { %340 = vmatpush1.bf16.msra.mxu0 %v326_v40  ;;  %v2802_v40 = vpack.c.bf16 %v405_v36, %v404_v35 }
 0x12a   :  { %2785 = vmatprep.subr.bf16.mxu0 %v2784_v3 }
 0x12c   :  { %2608 = vmatmul.mubr.msk.bf16.vlgmr.msra.gmra.mrb[0].mxu0 %vm321_vm3, %v314_v41  ;;  %v2804_v41 = vpack.c.bf16 %v423_v39, %v422_v38 }
 0x12d   :  { %2787 = vmatpush3.bf16.msra.mxu0 %v2786_v9 }
 0x12e   :  { %v319_v42 = vpop.permute.xlu0 %318  ;;  %2789 = vmatprep.subr.bf16.mxu0 %v2788_v10 }
 0x131   :  { %2791 = vmatpush3.bf16.msra.mxu0 %v2790_v21 }
 0x132   :  { %v439_v47 = vpop.permute.xlu0 %438  ;;  %2793 = vmatprep.subr.bf16.mxu0 %v2792_v22 }
 0x135   :  { %2795 = vmatpush3.bf16.msra.mxu0 %v2794_v26 }
 0x136   :  { %v432_v45 = vpop.permute.xlu1 %431  ;;  %2797 = vmatprep.subr.bf16.mxu0 %v2796_v27 }
 0x137   :  { %v434_v46 = vmul.f32 %v432_v45, %v3216_v43  ;;  %v407_v45 = vld [vmem:[%s4535_s14 + $0x58] sm:$0xff] }
 0x139   :  { %v441_v48 = vadd.f32 %v439_v47, %v434_v46  ;;  %2799 = vmatpush3.bf16.msra.mxu0 %v2798_v13  ;;  %v424_v46 = vld [vmem:[%s4535_s14 + $0xe0] sm:$0xff]  ;;  %v425_v47 = vld [vmem:[%s4535_s14 + $0xe8] sm:$0xff] }
 0x13a   :  { %2801 = vmatprep.subr.bf16.mxu0 %v2800_v34  ;;  %v649_v34 = vld [vmem:[%s4536_s10] sm:$0xff] }
 0x13b   :  { %v442_v49 = vmax.f32 %v441_v48, 0.0 }
 0x13d   :  { %v3219_v50 = vpack.c.bf16 %v442_v49, %v442_v49  ;;  %2803 = vmatpush3.bf16.msra.mxu0 %v2802_v40  ;;  %v2808_v49 = vpack.c.bf16 %v425_v47, %v424_v46 }
 0x13e   :  { %2805 = vmatprep.subr.bf16.mxu0 %v2804_v41 }
 0x13f   :  { %455 = vrot.lane.b32.xlu0 %v3219_v50, %s4554_s25  ;;  %s4602_s25 = smov 111  }
 0x143   :  { %470 = vrot.lane.b32.xlu0 %v3219_v50, %s4579_s2 }
 0x147   :  { %476 = vrot.lane.b32.xlu0 %v3219_v50, %s4559_s3 }
 0x14b   :  { %483 = vrot.lane.b32.xlu0 %v3219_v50, %s4553_s5  ;;  %s4645_s5 = smov 9  }
 0x1ff   :  { %v365_v52 = vpop.f32.mrb[0].mxu0 }
 0x200   :  { %v3230_v53 = vadd.f32 %v365_v52, %v319_v42  ;;  %v367_v54 = vpop.f32.mrb[1].mxu0  ;;  %v408_v52 = vld [vmem:[%s4535_s14 + $0x60] sm:$0xff] }
 0x201   :  { %v3232_v55 = vadd.f32 %v367_v54, %v319_v42  ;;  %v369_v56 = vpop.f32.mrb[2].mxu0  ;;  %v406_v42 = vld [vmem:[%s4535_s14 + $0x50] sm:$0xff]  ;;  %v409_v54 = vld [vmem:[%s4535_s14 + $0x68] sm:$0xff] }
 0x202   :  { %v370_v57 = vpop.f32.mrb[3].mxu0  ;;  %v2806_v48 = vpack.c.bf16 %v407_v45, %v406_v42  ;;  %v2810_v56 = vpack.c.bf16 %v409_v54, %v408_v52 }
 0x203   :  { %v2899_v58 = vpack.i.bf16 %v3230_v53, %v3232_v55  ;;  %v456_v57 = vpop.permute.xlu0 %455 }
 0x204   :  { %2807 = vmatpush3.bf16.msra.mxu0 %v2806_v48  ;;  %v459_v10 = vsel %vm4578_vm6, 0, %v456_v57 }
 0x205   :  { %2900 = vrot.lane.b32.xlu1 %v2899_v58, %s4559_s3  ;;  %2809 = vmatprep.subr.bf16.mxu0 %v2808_v49  ;;  %v426_v58 = vld [vmem:[%s4535_s14 + $0xf0] sm:$0xff]  ;;  %v503_v24 = vrot.slane %v459_v10, 4  ;;  %s4601_s3 = smov 127  }
 0x207   :  { %v471_v3 = vpop.permute.xlu0 %470 }
 0x208   :  { %2811 = vmatpush3.bf16.msra.mxu0 %v2810_v56  ;;  %v473_v19 = vsel %vm210_vm10, 0, %v471_v3 }
 0x209   :  { %445 = vrot.lane.b32.xlu1 %v3219_v50, %s4551_s26  ;;  %v475_v27 = vsel %vm3351_vm14, %v473_v19, 0  ;;  %s4600_s26 = smov 113  }
 0x20a   :  { %v505_v33 = vrot.slane %v475_v27, 4 }
 0x20b   :  { %v477_v11 = vpop.permute.xlu0 %476 }
 0x20c   :  { %v480_v14 = vsel %vm4567_vm13, %v477_v11, 0  ;;  %vm4573_vm13 = vcmask 465920  }
 0x20d   :  { %460 = vrot.lane.b32.xlu1 %v3219_v50, %s4552_s28  ;;  %s4646_s28 = smov 7  }
 0x20f   :  { %v484_v39 = vpop.permute.xlu0 %483 }
 0x210   :  { %v487_v42 = vsel %vm4573_vm13, %v484_v39, 0  ;;  %v755_v39 = vld [vmem:[%s4539_s15 + $0x20] sm:$0xff] }
 0x211   :  { %490 = vrot.lane.b32.xlu1 %v3219_v50, %s4555_s7  ;;  %v489_v49 = vsel %vm3351_vm14, %v487_v42, 0  ;;  %s4598_s7 = smov 15   ;;  %v762_v42 = vld [vmem:[%s4539_s15 + $0x58] sm:$0xff] }
 0x215   :  { %495 = vrot.lane.b32.xlu1 %v3219_v50, %s4558_s6 }
 0x219   :  { %530 = vperm.xlu1 %2898, %v527_v59   ;;  %v427_v59 = vld [vmem:[%s4535_s14 + $0xf8] sm:$0xff] }
 0x21d   :  { %659 = vperm.xlu1 %2898, %v656_v60   ;;  %v2812_v60 = vpack.c.bf16 %v427_v59, %v426_v58 }
 0x21f   :  { %2813 = vmatprep.subr.bf16.mxu0 %v2812_v60 }
 0x220   :  { %2815 = vmatpush3.bf16.msra.mxu0 %v2814_v6 }
 0x277   :  { %v2901_v7 = vpop.permute.xlu1 %2900 }
 0x278   :  { %v2903_v8 = vunpack.i.h.bf16 %v2901_v7  ;;  %v2902_v9 = vunpack.i.l.bf16 %v2901_v7 }
 0x27a   :  { %v381_v18 = vsel %vm4583_vm12, %v2902_v9, 0.0  ;;  %v378_v20 = vsel %vm4583_vm12, %v2903_v8, %v2902_v9 }
 0x27b   :  { %v446_v21 = vpop.permute.xlu1 %445  ;;  %v382_v22 = vmax.f32 %v3230_v53, %v378_v20  ;;  %v383_v23 = vmax.f32 %v3232_v55, %v381_v18  ;;  %v482_v55 = vsel %vm3360_vm9, %v480_v14, 0 }
 0x27c   :  { %v449_v26 = vsel %vm4577_vm15, 0, %v446_v21  ;;  %v507_v36 = vrot.slane %v482_v55, 4  ;;  %v752_v55 = vld [vmem:[%s4539_s15 + $0x8] sm:$0xff]  ;;  %vm4608_vm15 = vcmp.ne.s16.totalorder %v3154_v37, 0 }
 0x27d   :  { %v2904_v28 = vpack.i.bf16 %v382_v22, %v383_v23  ;;  %v454_v31 = vsel %vm3351_vm14, %v449_v26, 0 }
 0x27e   :  { %v512_v53 = vsel %vm281_vm11, %v454_v31, %v503_v24  ;;  %v520_v46 = vsel %vm281_vm11, %v3219_v50, %v507_v36  ;;  %v526_v50 = vld [vmem:[%s4537_s8] sm:$0xf] }
 0x27f   :  { %v461_v32 = vpop.permute.xlu1 %460  ;;  %2905 = vrot.lane.b32.xlu0 %v2904_v28, %s2942_s22  ;;  %2747 = vmatpush3.bf16.msra.mxu1 %v512_v53  ;;  %v3413_v53 = vpack.c.bf16 %v3076_v4, %v3076_v4 }
 0x280   :  { %v464_v13 = vsel %vm4568_vm1, 0, %v461_v32  ;;  %2748 = vmatprep.subr.bf16.mxu1 %v2947_v51  ;;  %vm4569_vm1 = vcmask 449536   ;;  %v754_v32 = vld [vmem:[%s4539_s15 + $0x18] sm:$0xff] }
 0x281   :  { %v469_v35 = vsel %vm3360_vm9, %v464_v13, 0  ;;  %v2816_v4 = vpack.c.bf16 %v754_v32, %v752_v55  ;;  %v753_v13 = vld [vmem:[%s4539_s15 + $0x10] sm:$0xff] }
 0x282   :  { %v516_v38 = vsel %vm281_vm11, %v469_v35, %v505_v33  ;;  %v751_v33 = vld [vmem:[%s4539_s15] sm:$0xff]  ;;  %v758_v35 = vld [vmem:[%s4539_s15 + $0x38] sm:$0xff] }
 0x283   :  { %v491_v40 = vpop.permute.xlu1 %490  ;;  %652 = vperm.xlu0 %2897, %v649_v34   ;;  %2749 = vmatpush3.bf16.msra.mxu1 %v516_v38  ;;  %v756_v34 = vld [vmem:[%s4539_s15 + $0x28] sm:$0xff]  ;;  %v2818_v36 = vpack.c.bf16 %v753_v13, %v751_v33 }
 0x284   :  { %v494_v41 = vsel %vm4574_vm2, %v491_v40, 0  ;;  %2750 = vmatprep.subr.bf16.mxu1 %v2947_v51  ;;  %v2820_v38 = vpack.c.bf16 %v758_v35, %v756_v34  ;;  %v757_v40 = vld [vmem:[%s4539_s15 + $0x30] sm:$0xff]  ;;  %vm4605_vm2 = vcmask 121856  }
 0x285   :  { %v509_v45 = vrot.slane %v494_v41, 4  ;;  %v760_v41 = vld [vmem:[%s4539_s15 + $0x48] sm:$0xff] }
 0x287   :  { %v496_v47 = vpop.permute.xlu1 %495  ;;  %2751 = vmatpush3.bf16.msra.mxu1 %v520_v46  ;;  %v524_v52 = vsel %vm281_vm11, %v489_v49, %v509_v45  ;;  %v2822_v45 = vpack.c.bf16 %v757_v40, %v755_v39  ;;  %v2824_v46 = vpack.c.bf16 %v762_v42, %v760_v41  ;;  %v764_v49 = vld [vmem:[%s4539_s15 + $0x68] sm:$0xff] }
 0x288   :  { %v499_v48 = vsel %vm4569_vm1, %v496_v47, 0  ;;  %2752 = vmatprep.subr.bf16.mxu1 %v2947_v51  ;;  %vm4572_vm1 = vcmask 523264   ;;  %v759_v47 = vld [vmem:[%s4539_s15 + $0x40] sm:$0xff] }
 0x289   :  { %v501_v54 = vsel %vm3360_vm9, %v499_v48, 0  ;;  %v761_v48 = vld [vmem:[%s4539_s15 + $0x50] sm:$0xff] }
 0x28a   :  { %v537_v56 = vsel %vm281_vm11, %v501_v54, 0  ;;  %v2826_v54 = vpack.c.bf16 %v761_v48, %v759_v47 }
 0x28b   :  { %2753 = vmatpush3.bf16.msra.mxu1 %v524_v52  ;;  %v766_v52 = vld [vmem:[%s4539_s15 + $0x78] sm:$0xff] }
 0x28c   :  { %2754 = vmatprep.subr.bf16.mxu1 %v2947_v51 }
 0x28f   :  { %2755 = vmatpush3.bf16.msra.mxu1 %v537_v56  ;;  %v2828_v56 = vpack.c.bf16 %v766_v52, %v764_v49 }
 0x290   :  { %2760 = vmatprep.subr.mxu1 %v2947_v51 }
 0x292   :  { %2757 = vmatmul.mubr.msk.bf16.vlgmr.msra.gmra.mrb[0].mxu1 %vm321_vm3, %v526_v50  ;;  %v763_v50 = vld [vmem:[%s4539_s15 + $0x60] sm:$0xff] }
 0x293   :  { %2762 = vmatprep.mubr.msk.f32.mxu1 %vm4575_vm4, %v2947_v51  ;;  %vm4607_vm4 = vmmov %vm4605_vm2 }
 0x298   :  { %v531_v10 = vpop.permute.xlu1 %530 }
 0x29c   :  { %v660_v14 = vpop.permute.xlu1 %659 }
 0x2f1   :  { %v2906_v57 = vpop.permute.xlu0 %2905 }
 0x2f2   :  { %v2908_v58 = vunpack.i.h.bf16 %v2906_v57  ;;  %v2907_v59 = vunpack.i.l.bf16 %v2906_v57  ;;  %v765_v57 = vld [vmem:[%s4539_s15 + $0x70] sm:$0xff] }
 0x2f4   :  { %v390_v60 = vsel %vm249_vm0, %v2908_v58, %v2907_v59  ;;  %v393_v61 = vsel %vm249_vm0, %v2907_v59, 0.0  ;;  %v2830_v58 = vpack.c.bf16 %v765_v57, %v763_v50  ;;  %v743_v59 = vld [vmem:[%s4540_s13] sm:$0xff] }
 0x2f5   :  { %v395_v62 = vmax.f32 %v383_v23, %v393_v61  ;;  %v394_v63 = vmax.f32 %v382_v22, %v390_v60  ;;  %v664_v22 = vld [vmem:[%s4538_s12] sm:$0xff] }
 0x2f7   :  { %643 = vmatprep.mubr.f32.mxu0 %v395_v62 }
 0x2f8   :  { %644 = vmatmul.mubr.f32.vlgmr.msra.gmra.mrb[4].mxu0 %v394_v63  ;;  %v3477_v63 = vpack.c.bf16 %v3081_v5, %v3081_v5 }
 0x302   :  { %v653_v21 = vpop.permute.xlu0 %652 }
 0x365   :  { %v573_v3 = vpop.f32.mrb[0].mxu1 }
 0x366   :  { %v2758_v6 = vpop.f32.mrb[1].mxu1  ;;  %v574_v19 = vadd.f32 %v573_v3, %v531_v10 }
 0x367   :  { %v576_v7 = vpop.f32.mrb[2].mxu1 }
 0x368   :  { %v2759_v8 = vpop.f32.mrb[3].mxu1 }
 0x369   :  { %v2631_v8 = vld [vmem:[%s4591_s27 + $0x10] sm:$0xff] }
 0x3cb   :  { %v2698_v9 = vpop.f32.mrb[4].mxu0 }
 0x3cc   :  { %v2699_v11 = vpop.f32.mrb[5].mxu0 }
 0x3cd   :  { %v2700_v18 = vadd.f32 %v2699_v11, %v2698_v9 }
 0x3cf   :  { %v646_v20 = vadd.f32 %v2700_v18, %v574_v19 }
 0x3d1   :  { %v655_v24 = vmul.f32 %v653_v21, %v646_v20  ;;  %v2632_v20 = vld [vmem:[%s4591_s27 + $0x18] sm:$0xff] }
 0x3d3   :  { %v662_v26 = vadd.f32 %v660_v14, %v655_v24 }
 0x3d5   :  { %v663_v27 = vmax.f32 %v662_v26, 0.0 }
 0x3d7   :  { %2761 = vmatpush3.msra.mxu1 %v663_v27  ;;  %v1116_v27 = vld [vmem:[%s4541_s17 + $0x8] sm:$0xff] }
 0x3d8   :  { %2763 = vmatmul.mubr.msk.f32.vlgmr.msra.gmra.mrb[4].mxu1 %vm4578_vm6, %v664_v22  ;;  %2817 = vmatprep.subr.bf16.mxu1 %v2816_v4  ;;  %v2919_v22 = vld [vmem:[%s4542_s16 + $0x4] ss:$8 sps:$4 sm:$0xff]   ;;  %vm4617_vm6 = vcmask 908288  }
 0x3d9   :  { %834 = vmatprep.mubr.f32.mxu1 %v2947_v51  ;;  %2819 = vmatpush1.bf16.msra.mxu1 %v2818_v36 }
 0x3da   :  { %2821 = vmatprep.subr.bf16.mxu1 %v2820_v38 }
 0x3dd   :  { %2823 = vmatpush1.bf16.msra.mxu1 %v2822_v45 }
 0x3de   :  { %2825 = vmatprep.subr.bf16.mxu1 %v2824_v46 }
 0x3e1   :  { %2827 = vmatpush1.bf16.msra.mxu1 %v2826_v54 }
 0x3e2   :  { %2829 = vmatprep.subr.bf16.mxu1 %v2828_v56 }
 0x3e5   :  { %2831 = vmatpush1.bf16.msra.mxu1 %v2830_v58 }
 0x4ab   :  { %v734_v23 = vpop.f32.mrb[4].mxu1 }
 0x4ac   :  { %v739_v28 = vsel %vm4572_vm1, %v734_v23, 0.0  ;;  %v2764_v31 = vpop.f32.mrb[5].mxu1 }
 0x4ad   :  { %740 = vadd.xlane.f32.xlu0 %v739_v28  ;;  %v1115_v28 = vld [vmem:[%s4541_s17] sm:$0xff] }
 0x4c3   :  { %929 = vrot.lane.b32.xlu0 %v3413_v53, %s4581_s29 }
 0x4c7   :  { %947 = vrot.lane.b32.xlu0 %v3413_v53, %s4598_s7 }
 0x4cb   :  { %940 = vrot.lane.b32.xlu0 %v3413_v53, %s4599_s24 }
 0x4cf   :  { %958 = vrot.lane.b32.xlu0 %v3413_v53, %s4579_s2 }
 0x53a   :  { %v741_v60 = vpop.xlane.xlu0 %740 }
 0x53b   :  { %v742_v61 = vmul.f32 0.015625, %v741_v60 }
 0x53d   :  { %v744_v62 = vadd.f32 %v743_v59, %v742_v61 }
 0x53f   :  { %747 = vperm.xlu1 %2898, %v744_v62  }
 0x543   :  { %1397 = vperm.xlu1 %2898, %v3062_v1  }
 0x547   :  { %1405 = vperm.xlu1 %2898, %v3070_v2  }
 0x54b   :  { %931 = vrot.lane.b32.xlu1 %v3477_v63, %s4581_s29 }
 0x54f   :  { %949 = vrot.lane.b32.xlu1 %v3477_v63, %s4598_s7 }
 0x553   :  { %942 = vrot.lane.b32.xlu1 %v3477_v63, %s4599_s24 }
 0x557   :  { %960 = vrot.lane.b32.xlu1 %v3477_v63, %s4579_s2 }
 0x5be   :  { %v748_v3 = vpop.permute.xlu1 %747 }
 0x5bf   :  { %v750_v1 = vmul.f32 %v748_v3, %v3216_v43 }
 0x5c1   :  { %2611 = vmatmul.mubr.msk.f32.vlgmr.msra.gmra.mrb[6].mxu1 %vm4572_vm1, %v750_v1  ;;  %vm4603_vm1 = vcmp.ne.s16.totalorder %v3146_v30, 0 }
 0x5c2   :  { %v1398_v43 = vpop.permute.xlu1 %1397  ;;  %2616 = vmatprep.mubr.msk.bf16.mxu1 %vm172_vm5, %v2919_v22  ;;  %vm4604_vm13 = vmmov %vm4603_vm1 }
 0x5c3   :  { %v1400_v10 = vmul.f32 %v2631_v8, %v1398_v43  ;;  %v1401_v21 = vmul.f32 %v2632_v20, %v1398_v43 }
 0x5c6   :  { %v1406_v9 = vpop.permute.xlu1 %1405 }
 0x5c7   :  { %v1408_v11 = vadd.f32 %v1406_v9, %v1400_v10  ;;  %v1409_v24 = vadd.f32 %v1406_v9, %v1401_v21 }
 0x5c9   :  { %v1410_v19 = vmax.f32 %v1408_v11, 0.0  ;;  %v1411_v14 = vmax.f32 %v1409_v24, 0.0 }
 0x5cb   :  { %v3525_v18 = vpack.c.bf16 %v1410_v19, %v1410_v19  ;;  %v3546_v26 = vpack.c.bf16 %v1411_v14, %v1411_v14 }
 0x694   :  { %v836_v5 = vpop.f32.mrb[6].mxu1 }
 0x695   :  { %v3490_v6 = vpack.c.bf16 %v836_v5, %v836_v5  ;;  %v838_v2 = vpop.f32.mrb[7].mxu1 }
 0x696   :  { %v3496_v7 = vpack.c.bf16 %v838_v2, %v838_v2 }
 0x697   :  { %907 = vrot.lane.b32.xlu0 %v3490_v6, %s2942_s22  ;;  %856 = vrot.lane.b32.xlu1 %v3490_v6, %s4599_s24 }
 0x69b   :  { %845 = vrot.lane.b32.xlu1 %v3490_v6, %s4581_s29  ;;  %876 = vrot.lane.b32.xlu0 %v3496_v7, %s4579_s2 }
 0x69f   :  { %874 = vrot.lane.b32.xlu1 %v3490_v6, %s4579_s2  ;;  %982 = vrot.lane.b32.xlu0 %v3477_v63, %s4600_s26 }
 0x6a3   :  { %863 = vrot.lane.b32.xlu1 %v3490_v6, %s4598_s7  ;;  %971 = vrot.lane.b32.xlu0 %v3477_v63, %s4601_s3 }
 0x6a7   :  { %885 = vrot.lane.b32.xlu1 %v3490_v6, %s4601_s3  ;;  %1000 = vrot.lane.b32.xlu0 %v3477_v63, %s4602_s25 }
 0x6ab   :  { %896 = vrot.lane.b32.xlu1 %v3490_v6, %s4600_s26  ;;  %916 = vrot.lane.b32.xlu0 %v3496_v7, %s4602_s25 }
 0x6af   :  { %914 = vrot.lane.b32.xlu1 %v3490_v6, %s4602_s25  ;;  %993 = vrot.lane.b32.xlu0 %v3477_v63, %s2942_s22 }
 0x6b3   :  { %1427 = vrot.lane.b32.xlu0 %v3525_v18, %s4599_s24  ;;  %858 = vrot.lane.b32.xlu1 %v3496_v7, %s4599_s24 }
 0x6b7   :  { %1416 = vrot.lane.b32.xlu0 %v3525_v18, %s4581_s29  ;;  %847 = vrot.lane.b32.xlu1 %v3496_v7, %s4581_s29 }
 0x6bb   :  { %1445 = vrot.lane.b32.xlu0 %v3525_v18, %s4579_s2  ;;  %980 = vrot.lane.b32.xlu1 %v3413_v53, %s4600_s26 }
 0x6bf   :  { %1434 = vrot.lane.b32.xlu0 %v3525_v18, %s4598_s7  ;;  %865 = vrot.lane.b32.xlu1 %v3496_v7, %s4598_s7 }
 0x6c3   :  { %1458 = vrot.lane.b32.xlu0 %v3546_v26, %s4601_s3  ;;  %887 = vrot.lane.b32.xlu1 %v3496_v7, %s4601_s3 }
 0x6c7   :  { %1480 = vrot.lane.b32.xlu0 %v3546_v26, %s2942_s22  ;;  %909 = vrot.lane.b32.xlu1 %v3496_v7, %s2942_s22 }
 0x6cb   :  { %1478 = vrot.lane.b32.xlu0 %v3525_v18, %s2942_s22  ;;  %898 = vrot.lane.b32.xlu1 %v3496_v7, %s4600_s26 }
 0x6cf   :  { %1485 = vrot.lane.b32.xlu0 %v3525_v18, %s4602_s25  ;;  %969 = vrot.lane.b32.xlu1 %v3413_v53, %s4601_s3 }
 0x6d3   :  { %1546 = vperm.xlu0 %2897, %v3120_v15   ;;  %998 = vrot.lane.b32.xlu1 %v3413_v53, %s4602_s25  ;;  %v3589_v15 = vpop.permute.xlu1 %931 }
 0x6d7   :  { %1126 = vperm.xlu0 %2897, %v1116_v27   ;;  %991 = vrot.lane.b32.xlu1 %v3413_v53, %s2942_s22  ;;  %v3597_v23 = vpop.permute.xlu1 %949 }
 0x6db   :  { %1665 = vperm.xlu0 %2897, %v3128_v16   ;;  %1429 = vrot.lane.b32.xlu1 %v3546_v26, %s4599_s24  ;;  %v3595_v16 = vpop.permute.xlu0 %929  ;;  %v3604_v55 = vpop.permute.xlu1 %942 }
 0x6df   :  { %1418 = vrot.lane.b32.xlu1 %v3546_v26, %s4581_s29  ;;  %v3602_v31 = vpop.permute.xlu0 %947  ;;  %v3609_v33 = vpop.permute.xlu1 %960 }
 0x6e3   :  { %1447 = vrot.lane.b32.xlu1 %v3546_v26, %s4579_s2  ;;  %v3607_v32 = vpop.permute.xlu0 %940 }
 0x6e7   :  { %1436 = vrot.lane.b32.xlu1 %v3546_v26, %s4598_s7  ;;  %v3611_v4 = vpop.permute.xlu0 %958 }
 0x6eb   :  { %1456 = vrot.lane.b32.xlu1 %v3525_v18, %s4601_s3 }
 0x6ef   :  { %1469 = vrot.lane.b32.xlu1 %v3546_v26, %s4600_s26 }
 0x6f3   :  { %1467 = vrot.lane.b32.xlu1 %v3525_v18, %s4600_s26 }
 0x6f7   :  { %1487 = vrot.lane.b32.xlu1 %v3546_v26, %s4602_s25 }
 0x6fb   :  { %1121 = vperm.xlu1 %2898, %v1115_v28  }
 0x6ff   :  { %1658 = vperm.xlu1 %2898, %v3136_v17  }
 0x709   :  { %v857_v13 = vpop.permute.xlu1 %856  ;;  %v908_v35 = vpop.permute.xlu0 %907 }
 0x70a   :  { %v862_v52 = vsel %vm172_vm5, 0, %v857_v13 }
 0x70b   :  { %v1010_v58 = vrot.slane %v862_v52, 4 }
 0x70d   :  { %v846_v34 = vpop.permute.xlu1 %845  ;;  %v877_v38 = vpop.permute.xlu0 %876 }
 0x70e   :  { %v852_v47 = vsel %vm142_vm7, 0, %v846_v34 }
 0x70f   :  { %v854_v56 = vsel %vm164_vm8, %v852_v47, 0 }
 0x710   :  { %v1039_v5 = vsel %vm281_vm11, %v854_v56, %v1010_v58 }
 0x711   :  { %v875_v36 = vpop.permute.xlu1 %874  ;;  %v3613_v41 = vpop.permute.xlu0 %982 }
 0x712   :  { %v878_v60 = vsel %vm210_vm10, %v875_v36, %v877_v38  ;;  %v881_v62 = vsel %vm210_vm10, 0, %v875_v36 }
 0x713   :  { %v884_v2 = vsel %vm4604_vm13, %v878_v60, 0  ;;  %v883_v8 = vsel %vm164_vm8, %v881_v62, 0 }
 0x714   :  { %v1015_v10 = vrot.slane %v884_v2, 4  ;;  %v1014_v20 = vrot.slane %v883_v8, 4 }
 0x715   :  { %v864_v39 = vpop.permute.xlu1 %863  ;;  %v3617_v45 = vpop.permute.xlu0 %971 }
 0x716   :  { %v870_v43 = vsel %vm4605_vm2, 0, %v864_v39 }
 0x719   :  { %v886_v40 = vpop.permute.xlu1 %885  ;;  %v3622_v48 = vpop.permute.xlu0 %1000 }
 0x71d   :  { %v3615_v42 = vpop.permute.xlu1 %896  ;;  %v917_v3 = vpop.permute.xlu0 %916 }
 0x721   :  { %v3619_v17 = vpop.permute.xlu1 %914  ;;  %v3645_v21 = vpop.permute.xlu0 %993 }
 0x722   :  { %v918_v62 = vsel %vm4617_vm6, %v3619_v17, %v917_v3  ;;  %vm4619_vm6 = vcmp.ne.s16.totalorder %v3159_v44, 0 }
 0x725   :  { %v859_v46 = vpop.permute.xlu1 %858 }
 0x726   :  { %v860_v49 = vsel %vm172_vm5, %v857_v13, %v859_v46  ;;  %v3657_v46 = vpop.permute.xlu0 %1427 }
 0x727   :  { %v1011_v50 = vrot.slane %v860_v49, 4  ;;  %v933_v49 = vsel %vm142_vm7, %v3595_v16, %v3589_v15 }
 0x729   :  { %v848_v54 = vpop.permute.xlu1 %847 }
 0x72a   :  { %v849_v57 = vsel %vm142_vm7, %v846_v34, %v848_v54 }
 0x72b   :  { %v855_v59 = vsel %vm4603_vm1, %v849_v57, 0  ;;  %vm4606_vm1 = vcmp.ne.s16.totalorder %v3159_v44, 0 }
 0x72c   :  { %v1043_v61 = vsel %vm281_vm11, %v855_v59, %v1011_v50  ;;  %v872_v11 = vsel %vm4606_vm1, %v870_v43, 0  ;;  %vm4609_vm13 = vmmov %vm4606_vm1  ;;  %vm4613_vm1 = vcmp.ne.s16.totalorder %v3146_v30, 0 }
 0x72d   :  { %1163 = vmatprep.subr.bf16.mxu1 %v1043_v61  ;;  %v3634_v1 = vpop.permute.xlu1 %980  ;;  %v1047_v22 = vsel %vm281_vm11, %v872_v11, %v1014_v20 }
 0x72e   :  { %1164 = vmatpush1.bf16.msra.mxu1 %v1039_v5  ;;  %v3687_v5 = vpop.permute.xlu0 %1416 }
 0x731   :  { %v866_v9 = vpop.permute.xlu1 %865 }
 0x732   :  { %v867_v19 = vsel %vm4607_vm4, %v864_v39, %v866_v9  ;;  %vm4610_vm4 = vmmov %vm4608_vm15 }
 0x733   :  { %v873_v24 = vsel %vm4608_vm15, %v867_v19, 0  ;;  %vm4611_vm15 = vmmov %vm4605_vm2  ;;  %vm4612_vm2 = vcmask 908288  }
 0x734   :  { %v1051_v14 = vsel %vm281_vm11, %v873_v24, %v1015_v10  ;;  %v951_v52 = vsel %vm4611_vm15, %v3602_v31, %v3597_v23  ;;  %v921_v15 = vsel %vm4612_vm2, %v917_v3, 0  ;;  %v939_v23 = vsel %vm4613_vm1, %v933_v49, 0 }
 0x735   :  { %1165 = vmatprep.subr.bf16.mxu1 %v1051_v14  ;;  %v888_v27 = vpop.permute.xlu1 %887  ;;  %v1026_v8 = vrot.slane %v939_v23, 4  ;;  %v944_v24 = vsel %vm172_vm5, %v3607_v32, %v3604_v55  ;;  %v962_v14 = vsel %vm210_vm10, %v3611_v4, %v3609_v33  ;;  %v1032_v55 = vrot.slane %v3477_v63, 4 }
 0x736   :  { %v889_v28 = vsel %vm4583_vm12, %v886_v40, %v888_v27  ;;  %v892_v13 = vsel %vm4583_vm12, %v888_v27, 0  ;;  %1166 = vmatpush1.bf16.msra.mxu1 %v1047_v22  ;;  %v936_v40 = vsel %vm142_vm7, 0, %v3595_v16  ;;  %v976_v49 = vsel %vm4583_vm12, %v3617_v45, 0 }
 0x737   :  { %v894_v34 = vsel %vm4609_vm13, %v889_v28, 0  ;;  %v895_v36 = vsel %vm4610_vm4, %v892_v13, 0  ;;  %v938_v16 = vsel %vm164_vm8, %v936_v40, 0  ;;  %vm4614_vm13 = vmmov %vm4611_vm15  ;;  %vm4615_vm15 = vcmask 924672   ;;  %v1446_v28 = vpop.permute.xlu0 %1445 }
 0x738   :  { %v1018_v38 = vrot.slane %v894_v34, 4  ;;  %v1019_v39 = vrot.slane %v895_v36, 4  ;;  %vm4616_vm2 = vmmov %vm4615_vm15  ;;  %v1025_v10 = vrot.slane %v938_v16, 4  ;;  %v946_v36 = vsel %vm172_vm5, 0, %v3607_v32 }
 0x739   :  { %v910_v47 = vpop.permute.xlu1 %909 }
 0x73a   :  { %v1059_v54 = vsel %vm281_vm11, %v3496_v7, %v1019_v39  ;;  %v911_v56 = vsel %vm249_vm0, %v908_v35, %v910_v47  ;;  %v913_v50 = vsel %vm249_vm0, %v910_v47, 0  ;;  %v1055_v57 = vsel %vm281_vm11, %v3490_v6, %v1018_v38 }
 0x73b   :  { %1167 = vmatprep.subr.bf16.mxu1 %v1059_v54  ;;  %v954_v7 = vsel %vm4614_vm13, 0, %v3602_v31  ;;  %v957_v35 = vsel %vm4610_vm4, %v951_v52, 0  ;;  %v1021_v59 = vrot.slane %v911_v56, 4  ;;  %v1022_v60 = vrot.slane %v913_v50, 4  ;;  %vm4618_vm13 = vmmov %vm4610_vm4 }
 0x73c   :  { %1168 = vmatpush1.bf16.msra.mxu1 %v1055_v57  ;;  %v924_v43 = vsel %vm4618_vm13, %v921_v15, 0  ;;  %v956_v17 = vsel %vm4619_vm6, %v954_v7, 0  ;;  %v1030_v3 = vrot.slane %v957_v35, 4  ;;  %vm4620_vm4 = vmmov %vm4619_vm6  ;;  %v965_v39 = vsel %vm210_vm10, 0, %v3611_v4  ;;  %v1435_v15 = vpop.permute.xlu0 %1434 }
 0x73d   :  { %v899_v58 = vpop.permute.xlu1 %898  ;;  %v923_v19 = vsel %vm4620_vm4, %v918_v62, 0  ;;  %v1075_v20 = vsel %vm281_vm11, %v924_v43, %v1026_v8  ;;  %v1029_v22 = vrot.slane %v956_v17, 4  ;;  %v968_v47 = vsel %vm4613_vm1, %v962_v14, 0 }
 0x73e   :  { %v900_v6 = vsel %vm4615_vm15, %v3615_v42, %v899_v58  ;;  %v903_v61 = vsel %vm4616_vm2, %v899_v58, 0  ;;  %vm4621_vm15 = vmmov %vm4616_vm2  ;;  %v1071_v34 = vsel %vm281_vm11, %v923_v19, %v1025_v10  ;;  %v1082_v38 = vsel %vm281_vm11, %v944_v24, %v1030_v3  ;;  %v2921_v24 = vld [vmem:[%s4542_s16] ss:$8 sps:$4 sm:$0xff]  }
 0x73f   :  { %v905_v2 = vsel %vm164_vm8, %v900_v6, 0  ;;  %v906_v31 = vsel %vm4613_vm1, %v903_v61, 0  ;;  %v987_v27 = vsel %vm4621_vm15, %v3613_v41, 0  ;;  %vm4622_vm2 = vmmov %vm4613_vm1  ;;  %vm4623_vm13 = vcmask 908288  }
 0x740   :  { %v1067_v9 = vsel %vm281_vm11, %v906_v31, %v1022_v60  ;;  %v1063_v42 = vsel %vm281_vm11, %v905_v2, %v1021_v59  ;;  %v990_v33 = vsel %vm4622_vm2, %v987_v27, 0  ;;  %v1005_v32 = vsel %vm4623_vm13, %v3622_v48, 0  ;;  %vm4624_vm6 = vmmov %vm4621_vm15  ;;  %v1459_v6 = vpop.permute.xlu0 %1458  ;;  %v2922_v27 = vld [vmem:[%s4542_s16 + $0x14] ss:$8 sps:$4 sm:$0xff]  }
 0x741   :  { %1169 = vmatprep.subr.bf16.mxu1 %v1067_v9  ;;  %v970_v11 = vpop.permute.xlu1 %969  ;;  %v984_v63 = vsel %vm4624_vm6, %v3634_v1, %v3613_v41  ;;  %v1078_v4 = vsel %vm281_vm11, %v946_v36, %v1029_v22  ;;  %v1031_v52 = vrot.slane %v3413_v53, 4  ;;  %v967_v54 = vsel %vm164_vm8, %v965_v39, 0  ;;  %vm4626_vm15 = vmmov %vm4623_vm13 }
 0x742   :  { %1170 = vmatpush1.bf16.msra.mxu1 %v1063_v42  ;;  %v1036_v56 = vrot.slane %v990_v33, 4  ;;  %v1090_v50 = vsel %vm281_vm11, %v968_v47, %v1032_v55  ;;  %vm4625_vm4 = vcmp.ne.s16.totalorder %v3154_v37, 0  ;;  %v973_v16 = vsel %vm4583_vm12, %v970_v11, %v3617_v45 }
 0x743   :  { %1171 = vmatprep.subr.bf16.mxu1 %v1075_v20  ;;  %v1008_v57 = vsel %vm4625_vm4, %v1005_v32, 0  ;;  %vm4627_vm2 = vmmov %vm4625_vm4  ;;  %v989_v1 = vsel %vm164_vm8, %v984_v63, 0  ;;  %v1086_v7 = vsel %vm281_vm11, %v967_v54, %v1031_v52  ;;  %vm4628_vm1 = vcmp.ne.s16.totalorder %v3159_v44, 0 }
 0x744   :  { %v979_v53 = vsel %vm4627_vm2, %v976_v49, 0  ;;  %v1103_v35 = vrot.slane %v1008_v57, 4  ;;  %v978_v58 = vsel %vm4628_vm1, %v973_v16, 0  ;;  %vm4629_vm13 = vmmov %vm4628_vm1  ;;  %v997_v59 = vsel %vm249_vm0, %v3645_v21, 0  ;;  %v1481_v47 = vpop.permute.xlu0 %1480 }
 0x745   :  { %v999_v13 = vpop.permute.xlu1 %998  ;;  %v1035_v60 = vrot.slane %v989_v1, 4  ;;  %v1423_v42 = vsel %vm142_vm7, 0, %v3687_v5  ;;  %vm4630_vm6 = vcmp.ne.s16.totalorder %v3146_v30, 0  ;;  %v1433_v11 = vsel %vm172_vm5, 0, %v3657_v46 }
 0x746   :  { %1172 = vmatpush1.bf16.msra.mxu1 %v1071_v34  ;;  %v1002_v41 = vsel %vm4626_vm15, %v999_v13, %v3622_v48  ;;  %v1098_v48 = vsel %vm281_vm11, %v979_v53, %v1036_v56  ;;  %v1109_v9 = vsel %vm281_vm11, %v997_v59, %v1103_v35  ;;  %v1463_v17 = vsel %vm4583_vm12, %v1459_v6, 0  ;;  %vm4632_vm15 = vmmov %vm4627_vm2  ;;  %v2924_v56 = vld [vmem:[%s4542_s16 + $0x10] ss:$8 sps:$4 sm:$0xff]  }
 0x747   :  { %1173 = vmatprep.subr.bf16.mxu1 %v1082_v38  ;;  %v1007_v45 = vsel %vm4629_vm13, %v1002_v41, 0  ;;  %v1094_v31 = vsel %vm281_vm11, %v978_v58, %v1035_v60  ;;  %v1497_v22 = vrot.slane %v1433_v11, 4  ;;  %vm4631_vm4 = vcmask 121856   ;;  %vm4633_vm2 = vmmov %vm4630_vm6 }
 0x748   :  { %v1102_v61 = vrot.slane %v1007_v45, 4  ;;  %v1441_v13 = vsel %vm4631_vm4, 0, %v1435_v15  ;;  %v1466_v34 = vsel %vm4632_vm15, %v1463_v17, 0  ;;  %vm4634_vm13 = vmmov %vm4631_vm4  ;;  %v1479_v41 = vpop.permute.xlu0 %1478 }
 0x749   :  { %v992_v40 = vpop.permute.xlu1 %991  ;;  %v1443_v39 = vsel %vm4628_vm1, %v1441_v13, 0  ;;  %v1506_v33 = vrot.slane %v1466_v34, 4  ;;  %vm4636_vm4 = vmmov %vm4628_vm1 }
 0x74a   :  { %1174 = vmatpush1.bf16.msra.mxu1 %v1078_v4  ;;  %v995_v43 = vsel %vm249_vm0, %v992_v40, %v3645_v21  ;;  %v1452_v21 = vsel %vm210_vm10, 0, %v1446_v28 }
 0x74b   :  { %1175 = vmatprep.subr.bf16.mxu1 %v1090_v50  ;;  %v1106_v20 = vsel %vm281_vm11, %v995_v43, %v1102_v61  ;;  %v1532_v57 = vsel %vm281_vm11, %v3546_v26, %v1506_v33  ;;  %v1482_v26 = vsel %vm249_vm0, %v1479_v41, %v1481_v47  ;;  %v3895_v41 = vld [vmem:[%s4543_s18 + $0x4] ss:$8 sps:$4 sm:$0xff]  }
 0x74c   :  { %v1508_v59 = vrot.slane %v1482_v26, 4  ;;  %v1486_v61 = vpop.permute.xlu0 %1485  ;;  %2629 = vmatprep.mubr.msk.bf16.mxu0 %vm172_vm5, %v3895_v41 }
 0x74d   :  { %v1430_v23 = vpop.permute.xlu1 %1429 }
 0x74e   :  { %1176 = vmatpush1.bf16.msra.mxu1 %v1086_v7  ;;  %v1431_v62 = vsel %vm172_vm5, %v3657_v46, %v1430_v23 }
 0x74f   :  { %1177 = vmatprep.subr.bf16.mxu1 %v1098_v48  ;;  %v1498_v3 = vrot.slane %v1431_v62, 4 }
 0x751   :  { %v1419_v2 = vpop.permute.xlu1 %1418 }
 0x752   :  { %v1420_v8 = vsel %vm142_vm7, %v3687_v5, %v1419_v2  ;;  %1178 = vmatpush1.bf16.msra.mxu1 %v1094_v31  ;;  %v1425_v5 = vsel %vm164_vm8, %v1423_v42, 0  ;;  %v1547_v42 = vpop.permute.xlu0 %1546 }
 0x753   :  { %v1426_v10 = vsel %vm4630_vm6, %v1420_v8, 0  ;;  %1179 = vmatprep.subr.bf16.mxu1 %v1109_v9  ;;  %v1512_v55 = vsel %vm281_vm11, %v1425_v5, %v1497_v22  ;;  %vm4635_vm6 = vmmov %vm4632_vm15  ;;  %vm4637_vm15 = vcmask 924672   ;;  %v1542_v9 = vld [vmem:[%s4531_s4] sm:$0xf]  ;;  %s4648_s4 = smov 119  }
 0x754   :  { %v1516_v46 = vsel %vm281_vm11, %v1426_v10, %v1498_v3  ;;  %vm4638_vm1 = vmmov %vm4637_vm15 }
 0x755   :  { %v1448_v19 = vpop.permute.xlu1 %1447 }
 0x756   :  { %v1449_v14 = vsel %vm210_vm10, %v1446_v28, %v1448_v19  ;;  %1180 = vmatpush1.bf16.msra.mxu1 %v1106_v20  ;;  %v1454_v28 = vsel %vm164_vm8, %v1452_v21, 0  ;;  %v1127_v21 = vpop.permute.xlu0 %1126 }
 0x757   :  { %v1455_v36 = vsel %vm4633_vm2, %v1449_v14, 0  ;;  %1558 = vmatprep.subr.bf16.mxu1 %v1516_v46  ;;  %v1501_v63 = vrot.slane %v1454_v28, 4 }
 0x758   :  { %v1502_v49 = vrot.slane %v1455_v36, 4 }
 0x759   :  { %1196 = vmatmul.mubr.bf16.vlgmr.msra.gmra.mrb[8].mxu1 %v2921_v24  ;;  %v1437_v38 = vpop.permute.xlu1 %1436  ;;  %v1520_v54 = vsel %vm281_vm11, %v1443_v39, %v1501_v63 }
 0x75a   :  { %v1438_v32 = vsel %vm4634_vm13, %v1435_v15, %v1437_v38  ;;  %1559 = vmatpush1.bf16.msra.mxu1 %v1512_v55  ;;  %2617 = vmatprep.mubr.msk.bf16.mxu1 %vm172_vm5, %v2922_v27  ;;  %v1484_v15 = vsel %vm249_vm0, %v1481_v47, 0  ;;  %vm4639_vm13 = vcmask 908288   ;;  %v3850_v47 = vld [vmem:[%s4532_s0 + $0x8] sm:$0xff]  ;;  %s4643_s0 = smov 8  }
 0x75b   :  { %v1444_v40 = vsel %vm4635_vm6, %v1438_v32, 0  ;;  %v1509_v23 = vrot.slane %v1484_v15, 4  ;;  %vm4640_vm6 = vmmov %vm4639_vm13 }
 0x75c   :  { %v1524_v4 = vsel %vm281_vm11, %v1444_v40, %v1502_v49 }
 0x75d   :  { %1560 = vmatprep.subr.bf16.mxu1 %v1524_v4  ;;  %v1457_v52 = vpop.permute.xlu1 %1456 }
 0x75e   :  { %v1460_v50 = vsel %vm4583_vm12, %v1457_v52, %v1459_v6  ;;  %1561 = vmatpush1.bf16.msra.mxu1 %v1520_v54 }
 0x75f   :  { %v1465_v16 = vsel %vm4636_vm4, %v1460_v50, 0  ;;  %1562 = vmatprep.subr.bf16.mxu1 %v1532_v57  ;;  %vm4641_vm4 = vcmp.ne.s16.totalorder %v3154_v37, 0  ;;  %v1666_v50 = vpop.permute.xlu0 %1665 }
 0x760   :  { %v1505_v53 = vrot.slane %v1465_v16, 4 }
 0x761   :  { %v1470_v1 = vpop.permute.xlu1 %1469  ;;  %1206 = vmatmul.mubr.bf16.gmra.mrb[12].mxu1 %v2924_v56 }
 0x762   :  { %v1474_v7 = vsel %vm4637_vm15, %v1470_v1, 0  ;;  %v1528_v35 = vsel %vm281_vm11, %v3525_v18, %v1505_v53  ;;  %1590 = vmatprep.mubr.bf16.mxu1 %v2936_v0  ;;  %vm4642_vm15 = vcmp.ne.s16.totalorder %v3159_v44, 0  ;;  %v1741_v53 = vld [vmem:[%s4533_s9] sm:$0xff] }
 0x763   :  { %1563 = vmatpush1.bf16.msra.mxu1 %v1528_v35  ;;  %v1477_v58 = vsel %vm4633_vm2, %v1474_v7, 0  ;;  %v1640_v7 = vld [vmem:[%s4535_s14 + $0x88] sm:$0xff]  ;;  %v1623_v35 = vld [vmem:[%s4535_s14] sm:$0xff] }
 0x764   :  { %v1540_v45 = vsel %vm281_vm11, %v1477_v58, %v1509_v23  ;;  %v1639_v23 = vld [vmem:[%s4535_s14 + $0x80] sm:$0xff]  ;;  %v1624_v58 = vld [vmem:[%s4535_s14 + $0x8] sm:$0xff] }
 0x765   :  { %1564 = vmatprep.subr.bf16.mxu1 %v1540_v45  ;;  %v1468_v48 = vpop.permute.xlu1 %1467  ;;  %v2832_v26 = vpack.c.bf16 %v1640_v7, %v1639_v23  ;;  %v1641_v45 = vld [vmem:[%s4535_s14 + $0x90] sm:$0xff]  ;;  %v1654_v7 = vld [vmem:[%s4535_s14 + $0xf8] sm:$0xff] }
 0x766   :  { %v1471_v60 = vsel %vm4638_vm1, %v1468_v48, %v1470_v1  ;;  %v1870_v1 = vld [vmem:[%s4534_s11] sm:$0xff]  ;;  %v1642_v48 = vld [vmem:[%s4535_s14 + $0x98] sm:$0xff]  ;;  %v1653_v23 = vld [vmem:[%s4535_s14 + $0xf0] sm:$0xff] }
 0x767   :  { %v1476_v6 = vsel %vm164_vm8, %v1471_v60, 0  ;;  %v2836_v60 = vpack.c.bf16 %v1642_v48, %v1641_v45  ;;  %vm4030_vm1 = vmneg %vm172_vm5 }
 0x768   :  { %v1536_v18 = vsel %vm281_vm11, %v1476_v6, %v1508_v59  ;;  %v2834_v59 = vpack.c.bf16 %v1624_v58, %v1623_v35  ;;  %v1625_v6 = vld [vmem:[%s4535_s14 + $0x10] sm:$0xff]  ;;  %v2860_v35 = vpack.c.bf16 %v1654_v7, %v1653_v23  ;;  %v1638_v58 = vld [vmem:[%s4535_s14 + $0x78] sm:$0xff] }
 0x769   :  { %1565 = vmatpush1.bf16.msra.mxu1 %v1536_v18  ;;  %v1488_v0 = vpop.permute.xlu1 %1487  ;;  %v1626_v18 = vld [vmem:[%s4535_s14 + $0x18] sm:$0xff] }
 0x76a   :  { %v1489_v62 = vsel %vm4639_vm13, %v1486_v61, %v1488_v0  ;;  %v1492_v2 = vsel %vm4640_vm6, %v1488_v0, 0  ;;  %v1643_v61 = vld [vmem:[%s4535_s14 + $0xa0] sm:$0xff]  ;;  %v1644_v0 = vld [vmem:[%s4535_s14 + $0xa8] sm:$0xff]  ;;  %vm4651_vm13 = vcmask 121856  }
 0x76b   :  { %v1495_v31 = vsel %vm4641_vm4, %v1492_v2, 0  ;;  %v1494_v43 = vsel %vm4642_vm15, %v1489_v62, 0  ;;  %v2838_v62 = vpack.c.bf16 %v1626_v18, %v1625_v6  ;;  %v2840_v2 = vpack.c.bf16 %v1644_v0, %v1643_v61  ;;  %vm4652_vm6 = vmmov %vm4651_vm13 }
 0x76c   :  { %2633 = vmatprep.subr.msk.bf16.mxu1 %vm281_vm11, %v1495_v31  ;;  %v1553_v8 = vsel %vm281_vm11, %v1494_v43, 0  ;;  %v1627_v31 = vld [vmem:[%s4535_s14 + $0x20] sm:$0xff]  ;;  %v1628_v43 = vld [vmem:[%s4535_s14 + $0x28] sm:$0xff]  ;;  %vm4653_vm4 = vmmov %vm4642_vm15  ;;  %vm4654_vm15 = vcmp.ne.s16.totalorder %v3154_v37, 0 }
 0x76d   :  { %1567 = vmatpush1.bf16.msra.mxu1 %v1553_v8  ;;  %v1645_v8 = vld [vmem:[%s4535_s14 + $0xb0] sm:$0xff] }
 0x76e   :  { %2833 = vmatprep.subr.bf16.mxu1 %v2832_v26  ;;  %v1637_v26 = vld [vmem:[%s4535_s14 + $0x70] sm:$0xff] }
 0x76f   :  { %v2862_v45 = vpack.c.bf16 %v1638_v58, %v1637_v26 }
 0x770   :  { %2634 = vmatmul.mubr.msk.bf16.vlgmr.msra.gmra.mrb[16].mxu1 %vm321_vm3, %v1542_v9  ;;  %v1646_v9 = vld [vmem:[%s4535_s14 + $0xb8] sm:$0xff] }
 0x771   :  { %2835 = vmatpush3.bf16.msra.mxu1 %v2834_v59 }
 0x772   :  { %2837 = vmatprep.subr.bf16.mxu1 %v2836_v60 }
 0x775   :  { %2839 = vmatpush3.bf16.msra.mxu1 %v2838_v62 }
 0x776   :  { %2841 = vmatprep.subr.bf16.mxu1 %v2840_v2 }
 0x77a   :  { %v1122_v10 = vpop.permute.xlu1 %1121 }
 0x77e   :  { %v1659_v49 = vpop.permute.xlu1 %1658 }
 0x77f   :  { %v1661_v54 = vmul.f32 %v3850_v47, %v1659_v49  ;;  %v1651_v49 = vld [vmem:[%s4535_s14 + $0xe0] sm:$0xff] }
 0x781   :  { %v1668_v57 = vadd.f32 %v1666_v50, %v1661_v54  ;;  %v1635_v54 = vld [vmem:[%s4535_s14 + $0x60] sm:$0xff] }
 0x783   :  { %v1669_v15 = vmax.f32 %v1668_v57, 0.0 }
 0x785   :  { %v3872_v16 = vpack.c.bf16 %v1669_v15, %v1669_v15 }
 0x82c   :  { %v1197_v11 = vpop.f32.mrb[8].mxu1 }
 0x82d   :  { %v1198_v17 = vadd.f32 %v1197_v11, %v1122_v10  ;;  %v1199_v3 = vpop.f32.mrb[9].mxu1  ;;  %v1629_v11 = vld [vmem:[%s4535_s14 + $0x30] sm:$0xff] }
 0x82e   :  { %v1200_v19 = vadd.f32 %v1199_v3, %v1122_v10  ;;  %v1201_v20 = vpop.f32.mrb[10].mxu1  ;;  %v2844_v10 = vpack.c.bf16 %v1646_v9, %v1645_v8  ;;  %v1647_v3 = vld [vmem:[%s4535_s14 + $0xc0] sm:$0xff] }
 0x82f   :  { %v1202_v24 = vadd.f32 %v1201_v20, %v1127_v21  ;;  %v1203_v5 = vpop.f32.mrb[11].mxu1  ;;  %v1216_v46 = vmax.f32 %v1198_v17, 0.0  ;;  %v1630_v17 = vld [vmem:[%s4535_s14 + $0x38] sm:$0xff] }
 0x830   :  { %v1204_v14 = vadd.f32 %v1203_v5, %v1127_v21  ;;  %v1217_v22 = vmax.f32 %v1200_v19, 0.0  ;;  %v1648_v21 = vld [vmem:[%s4535_s14 + $0xc8] sm:$0xff]  ;;  %v2846_v19 = vpack.c.bf16 %v1630_v17, %v1629_v11  ;;  %v1863_v11 = vld [vmem:[%s4536_s10] sm:$0xff] }
 0x831   :  { %v1218_v27 = vmax.f32 %v1202_v24, 0.0  ;;  %v2848_v20 = vpack.c.bf16 %v1648_v21, %v1647_v3  ;;  %v1631_v24 = vld [vmem:[%s4535_s14 + $0x40] sm:$0xff]  ;;  %v1632_v5 = vld [vmem:[%s4535_s14 + $0x48] sm:$0xff] }
 0x832   :  { %v1219_v13 = vmax.f32 %v1204_v14, 0.0  ;;  %v1649_v14 = vld [vmem:[%s4535_s14 + $0xd0] sm:$0xff] }
 0x833   :  { %v3827_v34 = vpack.c.bf16 %v1218_v27, %v1216_v46  ;;  %v1650_v46 = vld [vmem:[%s4535_s14 + $0xd8] sm:$0xff]  ;;  %v2850_v27 = vpack.c.bf16 %v1632_v5, %v1631_v24 }
 0x834   :  { %v3829_v36 = vpack.c.bf16 %v1219_v13, %v1217_v22  ;;  %v3831_v28 = vpop.f32.mrb[12].mxu1  ;;  %v2852_v22 = vpack.c.bf16 %v1650_v46, %v1649_v14  ;;  %v1633_v13 = vld [vmem:[%s4535_s14 + $0x50] sm:$0xff] }
 0x835   :  { %1224 = vrot.lane.b32.xlu0 %v3827_v34, %s4581_s29  ;;  %v3835_v38 = vpop.f32.mrb[13].mxu1 }
 0x836   :  { %v3837_v55 = vpop.f32.mrb[14].mxu1 }
 0x837   :  { %v3839_v39 = vpop.f32.mrb[15].mxu1 }
 0x839   :  { %1235 = vrot.lane.b32.xlu0 %v3827_v34, %s4599_s24 }
 0x83d   :  { %1244 = vrot.lane.b32.xlu0 %v3827_v34, %s4598_s7 }
 0x841   :  { %1255 = vrot.lane.b32.xlu0 %v3827_v34, %s4579_s2 }
 0x843   :  { %v1592_v33 = vpop.f32.mrb[16].mxu1 }
 0x844   :  { %v3852_v32 = vadd.f32 %v1592_v33, %v1547_v42  ;;  %v1594_v63 = vpop.f32.mrb[17].mxu1  ;;  %v1634_v33 = vld [vmem:[%s4535_s14 + $0x58] sm:$0xff] }
 0x845   :  { %v3854_v40 = vadd.f32 %v1594_v63, %v1547_v42  ;;  %1266 = vrot.lane.b32.xlu0 %v3827_v34, %s4601_s3  ;;  %v1596_v4 = vpop.f32.mrb[18].mxu1  ;;  %v2842_v42 = vpack.c.bf16 %v1628_v43, %v1627_v31  ;;  %v1652_v63 = vld [vmem:[%s4535_s14 + $0xe8] sm:$0xff] }
 0x846   :  { %v1597_v52 = vpop.f32.mrb[19].mxu1  ;;  %v2854_v4 = vpack.c.bf16 %v1634_v33, %v1633_v13 }
 0x847   :  { %v2909_v56 = vpack.i.bf16 %v3852_v32, %v3854_v40  ;;  %2843 = vmatpush3.bf16.msra.mxu1 %v2842_v42  ;;  %v2856_v52 = vpack.c.bf16 %v1652_v63, %v1651_v49 }
 0x848   :  { %2845 = vmatprep.subr.bf16.mxu1 %v2844_v10 }
 0x849   :  { %2910 = vrot.lane.b32.xlu1 %v2909_v56, %s4601_s3  ;;  %1277 = vrot.lane.b32.xlu0 %v3827_v34, %s4600_s26  ;;  %v1636_v56 = vld [vmem:[%s4535_s14 + $0x68] sm:$0xff] }
 0x84a   :  { %v2858_v50 = vpack.c.bf16 %v1636_v56, %v1635_v54 }
 0x84b   :  { %2847 = vmatpush3.bf16.msra.mxu1 %v2846_v19 }
 0x84c   :  { %2849 = vmatprep.subr.bf16.mxu1 %v2848_v20 }
 0x84d   :  { %1226 = vrot.lane.b32.xlu1 %v3829_v36, %s4581_s29  ;;  %1288 = vrot.lane.b32.xlu0 %v3827_v34, %s2942_s22 }
 0x84f   :  { %2851 = vmatpush3.bf16.msra.mxu1 %v2850_v27 }
 0x850   :  { %2853 = vmatprep.subr.bf16.mxu1 %v2852_v22 }
 0x851   :  { %1237 = vrot.lane.b32.xlu1 %v3829_v36, %s4599_s24  ;;  %1297 = vrot.lane.b32.xlu0 %v3827_v34, %s4602_s25 }
 0x853   :  { %2855 = vmatpush3.bf16.msra.mxu1 %v2854_v4 }
 0x854   :  { %2857 = vmatprep.subr.bf16.mxu1 %v2856_v52 }
 0x855   :  { %1246 = vrot.lane.b32.xlu1 %v3829_v36, %s4598_s7  ;;  %1678 = vrot.lane.b32.xlu0 %v3872_v16, %s4643_s0 }
 0x857   :  { %2859 = vmatpush3.bf16.msra.mxu1 %v2858_v50 }
 0x858   :  { %2861 = vmatprep.subr.bf16.mxu1 %v2860_v35 }
 0x859   :  { %1257 = vrot.lane.b32.xlu1 %v3829_v36, %s4579_s2  ;;  %1688 = vrot.lane.b32.xlu0 %v3872_v16, %s4579_s2 }
 0x85b   :  { %2863 = vmatpush3.bf16.msra.mxu1 %v2862_v45  ;;  %v4080_v45 = vld [vmem:[%s4543_s18] ss:$8 sps:$4 sm:$0xff]  }
 0x85c   :  { %2779 = vmatprep.subr.mxu1 %v2947_v51 }
 0x85d   :  { %1268 = vrot.lane.b32.xlu1 %v3829_v36, %s4601_s3  ;;  %1694 = vrot.lane.b32.xlu0 %v3872_v16, %s4601_s3 }
 0x861   :  { %1279 = vrot.lane.b32.xlu1 %v3829_v36, %s4600_s26  ;;  %1700 = vrot.lane.b32.xlu0 %v3872_v16, %s4644_s30 }
 0x865   :  { %1290 = vrot.lane.b32.xlu1 %v3829_v36, %s2942_s22 }
 0x869   :  { %1299 = vrot.lane.b32.xlu1 %v3829_v36, %s4602_s25 }
 0x86d   :  { %1672 = vrot.lane.b32.xlu1 %v3872_v16, %s4645_s5 }
 0x871   :  { %1682 = vrot.lane.b32.xlu1 %v3872_v16, %s4646_s28 }
 0x875   :  { %1706 = vrot.lane.b32.xlu1 %v3872_v16, %s4647_s23 }
 0x879   :  { %1710 = vrot.lane.b32.xlu1 %v3872_v16, %s4648_s4 }
 0x87d   :  { %1744 = vperm.xlu1 %2898, %v1741_v53  }
 0x881   :  { %1873 = vperm.xlu1 %2898, %v1870_v1  }
 0x8a7   :  { %v1225_v57 = vpop.permute.xlu0 %1224 }
 0x8a8   :  { %v1231_v18 = vsel %vm142_vm7, 0, %v1225_v57 }
 0x8a9   :  { %v1233_v8 = vsel %vm164_vm8, %v1231_v18, 0 }
 0x8ab   :  { %v1236_v15 = vpop.permute.xlu0 %1235 }
 0x8af   :  { %v1245_v53 = vpop.permute.xlu0 %1244 }
 0x8b0   :  { %v1251_v17 = vsel %vm4651_vm13, 0, %v1245_v53  ;;  %vm4655_vm13 = vmmov %vm4654_vm15 }
 0x8b1   :  { %v1253_v20 = vsel %vm4653_vm4, %v1251_v17, 0 }
 0x8b3   :  { %v1256_v1 = vpop.permute.xlu0 %1255 }
 0x8b4   :  { %v1262_v24 = vsel %vm210_vm10, 0, %v1256_v1 }
 0x8b5   :  { %v1264_v46 = vsel %vm164_vm8, %v1262_v24, 0 }
 0x8b7   :  { %v1267_v59 = vpop.permute.xlu0 %1266 }
 0x8bb   :  { %v2911_v48 = vpop.permute.xlu1 %2910  ;;  %v1278_v42 = vpop.permute.xlu0 %1277 }
 0x8bc   :  { %v2913_v60 = vunpack.i.h.bf16 %v2911_v48  ;;  %v2912_v6 = vunpack.i.l.bf16 %v2911_v48 }
 0x8be   :  { %v1605_v61 = vsel %vm4583_vm12, %v2913_v60, %v2912_v6  ;;  %v1608_v0 = vsel %vm4583_vm12, %v2912_v6, 0.0 }
 0x8bf   :  { %v4016_v62 = vmax.f32 %v3852_v32, %v1605_v61  ;;  %v4019_v2 = vmax.f32 %v3854_v40, %v1608_v0  ;;  %v1227_v31 = vpop.permute.xlu1 %1226  ;;  %v1289_v21 = vpop.permute.xlu0 %1288 }
 0x8c0   :  { %v1228_v43 = vsel %vm142_vm7, %v1225_v57, %v1227_v31 }
 0x8c1   :  { %2620 = vmatprep.subr.msk.bf16.mxu0 %vm4633_vm2, %v1228_v43  ;;  %v2914_v9 = vpack.i.bf16 %v4016_v62, %v4019_v2 }
 0x8c2   :  { %1335 = vmatpush1.bf16.msra.mxu0 %v1233_v8 }
 0x8c3   :  { %v1238_v10 = vpop.permute.xlu1 %1237  ;;  %2915 = vrot.lane.b32.xlu0 %v2914_v9, %s2942_s22  ;;  %v1298_v27 = vpop.permute.xlu0 %1297 }
 0x8c4   :  { %v1239_v40 = vsel %vm172_vm5, %v1236_v15, %v1238_v10 }
 0x8c5   :  { %1336 = vmatprep.subr.bf16.mxu0 %v1239_v40 }
 0x8c6   :  { %2622 = vmatpush1.bf16.msk.msra.mxu0 %vm4030_vm1, %v1236_v15 }
 0x8c7   :  { %v1247_v3 = vpop.permute.xlu1 %1246  ;;  %1866 = vperm.xlu0 %2897, %v1863_v11   ;;  %v1679_v63 = vpop.permute.xlu0 %1678 }
 0x8c8   :  { %v1248_v19 = vsel %vm4652_vm6, %v1245_v53, %v1247_v3  ;;  %vm4656_vm6 = vmmov %vm4653_vm4  ;;  %vm4657_vm4 = vcmask 924672  }
 0x8c9   :  { %2623 = vmatprep.subr.msk.bf16.mxu0 %vm4654_vm15, %v1248_v19  ;;  %vm4658_vm15 = vmmov %vm4657_vm4 }
 0x8ca   :  { %1339 = vmatpush1.bf16.msra.mxu0 %v1253_v20 }
 0x8cb   :  { %v1258_v5 = vpop.permute.xlu1 %1257  ;;  %v1689_v56 = vpop.permute.xlu0 %1688 }
 0x8cc   :  { %v1259_v14 = vsel %vm210_vm10, %v1256_v1, %v1258_v5  ;;  %v1691_v26 = vsel %vm210_vm10, 0, %v1689_v56 }
 0x8cd   :  { %2624 = vmatprep.subr.msk.bf16.mxu0 %vm4633_vm2, %v1259_v14  ;;  %v1693_v18 = vsel %vm3351_vm14, %v1691_v26, 0 }
 0x8ce   :  { %1341 = vmatpush1.bf16.msra.mxu0 %v1264_v46  ;;  %v1719_v8 = vrot.slane %v1693_v18, 4 }
 0x8cf   :  { %1342 = vmatprep.subr.bf16.mxu0 %v3829_v36  ;;  %v1269_v22 = vpop.permute.xlu1 %1268  ;;  %v1695_v7 = vpop.permute.xlu0 %1694 }
 0x8d0   :  { %v1270_v13 = vsel %vm4583_vm12, %v1267_v59, %v1269_v22  ;;  %v1273_v33 = vsel %vm4583_vm12, %v1269_v22, 0  ;;  %vm4664_vm12 = vcmp.ne.s16.totalorder %v3159_v44, 0 }
 0x8d1   :  { %v1275_v4 = vsel %vm4656_vm6, %v1270_v13, 0 }
 0x8d2   :  { %1343 = vmatpush1.bf16.msra.mxu0 %v3827_v34 }
 0x8d3   :  { %2625 = vmatprep.subr.msk.bf16.mxu0 %vm4655_vm13, %v1273_v33  ;;  %v1280_v49 = vpop.permute.xlu1 %1279  ;;  %vm4659_vm13 = vcmask 908288   ;;  %v1701_v40 = vpop.permute.xlu0 %1700 }
 0x8d4   :  { %v1281_v52 = vsel %vm4657_vm4, %v1278_v42, %v1280_v49  ;;  %v1284_v54 = vsel %vm4658_vm15, %v1280_v49, 0  ;;  %vm4660_vm6 = vmmov %vm4659_vm13  ;;  %vm4661_vm4 = vcmp.ne.s16.totalorder %v3154_v37, 0  ;;  %vm4662_vm15 = vcmask 64512  }
 0x8d5   :  { %v1286_v34 = vsel %vm164_vm8, %v1281_v52, 0  ;;  %v1681_v23 = vsel %vm4662_vm15, 0, %v1679_v63  ;;  %vm4669_vm15 = vcmask 465920  }
 0x8d6   :  { %1345 = vmatpush1.bf16.msra.mxu0 %v1275_v4  ;;  %v1717_v59 = vrot.slane %v1681_v23, 4  ;;  %v1703_v3 = vsel %vm4669_vm15, %v1701_v40, 0  ;;  %v1968_v40 = vld [vmem:[%s4539_s15 + $0x20] sm:$0xff]  ;;  %vm4680_vm15 = vcmp.ne.s16.totalorder %v3154_v37, 0 }
 0x8d7   :  { %2626 = vmatprep.subr.msk.bf16.mxu0 %vm4633_vm2, %v1284_v54  ;;  %v1291_v36 = vpop.permute.xlu1 %1290  ;;  %vm4663_vm2 = vcmask 72704   ;;  %v1705_v24 = vsel %vm3351_vm14, %v1703_v3, 0  ;;  %v1975_v3 = vld [vmem:[%s4539_s15 + $0x58] sm:$0xff] }
 0x8d8   :  { %v1292_v57 = vsel %vm249_vm0, %v1289_v21, %v1291_v36 }
 0x8da   :  { %1347 = vmatpush1.bf16.msra.mxu0 %v1286_v34 }
 0x8db   :  { %2627 = vmatprep.subr.msk.bf16.mxu0 %vm249_vm0, %v1291_v36  ;;  %v1300_v50 = vpop.permute.xlu1 %1299 }
 0x8dc   :  { %v1301_v15 = vsel %vm4659_vm13, %v1298_v27, %v1300_v50  ;;  %v1304_v53 = vsel %vm4660_vm6, %v1300_v50, 0  ;;  %vm4665_vm13 = vcmask 515072   ;;  %vm4666_vm6 = vcmask 56320  }
 0x8dd   :  { %v1306_v58 = vsel %vm4664_vm12, %v1301_v15, 0  ;;  %v1697_v60 = vsel %vm4665_vm13, %v1695_v7, 0  ;;  %vm4667_vm12 = vmmov 0   ;;  %vm4676_vm13 = vcmp.ne.s16.totalorder %v3146_v30, 0 }
 0x8de   :  { %1349 = vmatpush1.bf16.msra.mxu0 %v1292_v57  ;;  %v1699_v31 = vsel %vm3360_vm9, %v1697_v60, 0 }
 0x8df   :  { %2628 = vmatprep.subr.msk.bf16.mxu0 %vm4661_vm4, %v1304_v53  ;;  %v1673_v1 = vpop.permute.xlu1 %1672  ;;  %v1721_v42 = vrot.slane %v1699_v31, 4  ;;  %vm4668_vm4 = vcmask 457728  }
 0x8e0   :  { %v1675_v35 = vsel %vm4663_vm2, 0, %v1673_v1  ;;  %vm4670_vm2 = vcmask 449536  }
 0x8e1   :  { %v1677_v48 = vsel %vm3351_vm14, %v1675_v35, 0  ;;  %v1734_v19 = vsel %vm281_vm11, %v3872_v16, %v1721_v42  ;;  %v1740_v16 = vld [vmem:[%s4537_s8] sm:$0xf]  ;;  %vm4672_vm14 = vcmask 523264  }
 0x8e2   :  { %1351 = vmatpush1.bf16.msra.mxu0 %v1306_v58  ;;  %v1726_v0 = vsel %vm281_vm11, %v1677_v48, %v1717_v59  ;;  %v1878_v58 = vld [vmem:[%s4538_s12] sm:$0xff]  ;;  %s4673_s12 = smov 17  }
 0x8e3   :  { %v1683_v6 = vpop.permute.xlu1 %1682  ;;  %2765 = vmatprep.subr.bf16.mxu0 %v2947_v51 }
 0x8e4   :  { %v1685_v61 = vsel %vm4666_vm6, 0, %v1683_v6  ;;  %v2934_v6 = vld [vmem:[%s4591_s27 + $0x18] sm:$0xff]  ;;  %vm4677_vm6 = vmmov %vm4676_vm13 }
 0x8e5   :  { %1367 = vmatmul.mubr.bf16.vlgmr.msra.gmra.mrb[8].mxu0 %v4080_v45  ;;  %v1687_v43 = vsel %vm3360_vm9, %v1685_v61, 0  ;;  %v4142_v18 = vpack.c.bf16 %v2934_v6, %v2934_v6  ;;  %v1965_v61 = vld [vmem:[%s4539_s15 + $0x8] sm:$0xff] }
 0x8e6   :  { %2766 = vmatpush3.bf16.msra.mxu0 %v1726_v0  ;;  %2775 = vmatprep.mubr.msk.bf16.mxu0 %vm4667_vm12, %v2947_v51  ;;  %v1730_v10 = vsel %vm281_vm11, %v1687_v43, %v1719_v8  ;;  %v1967_v0 = vld [vmem:[%s4539_s15 + $0x18] sm:$0xff]  ;;  %v1966_v43 = vld [vmem:[%s4539_s15 + $0x10] sm:$0xff]  ;;  %v1969_v8 = vld [vmem:[%s4539_s15 + $0x28] sm:$0xff] }
 0x8e7   :  { %v1707_v9 = vpop.permute.xlu1 %1706  ;;  %2767 = vmatprep.subr.bf16.mxu0 %v2947_v51  ;;  %v2864_v31 = vpack.c.bf16 %v1967_v0, %v1965_v61 }
 0x8e8   :  { %v1709_v11 = vsel %vm4668_vm4, %v1707_v9, 0  ;;  %v1971_v9 = vld [vmem:[%s4539_s15 + $0x38] sm:$0xff] }
 0x8e9   :  { %v1723_v21 = vrot.slane %v1709_v11, 4  ;;  %v1970_v11 = vld [vmem:[%s4539_s15 + $0x30] sm:$0xff] }
 0x8ea   :  { %2768 = vmatpush3.bf16.msra.mxu0 %v1730_v10  ;;  %v2868_v10 = vpack.c.bf16 %v1971_v9, %v1969_v8 }
 0x8eb   :  { %2769 = vmatprep.subr.bf16.mxu0 %v2947_v51  ;;  %v1711_v17 = vpop.permute.xlu1 %1710  ;;  %v1738_v5 = vsel %vm281_vm11, %v1705_v24, %v1723_v21  ;;  %v2870_v21 = vpack.c.bf16 %v1970_v11, %v1968_v40  ;;  %v1974_v24 = vld [vmem:[%s4539_s15 + $0x50] sm:$0xff] }
 0x8ec   :  { %v1713_v20 = vsel %vm4670_vm2, %v1711_v17, 0  ;;  %v1973_v17 = vld [vmem:[%s4539_s15 + $0x48] sm:$0xff]  ;;  %vm4681_vm2 = vcmp.ne.s16.totalorder %v3159_v44, 0 }
 0x8ed   :  { %v1715_v14 = vsel %vm3360_vm9, %v1713_v20, 0  ;;  %vm4671_vm9 = vcmask 64512   ;;  %v1972_v20 = vld [vmem:[%s4539_s15 + $0x40] sm:$0xff] }
 0x8ee   :  { %2770 = vmatpush3.bf16.msra.mxu0 %v1734_v19  ;;  %v1751_v46 = vsel %vm281_vm11, %v1715_v14, 0  ;;  %v2872_v19 = vpack.c.bf16 %v1975_v3, %v1973_v17  ;;  %v1979_v14 = vld [vmem:[%s4539_s15 + $0x78] sm:$0xff] }
 0x8ef   :  { %2771 = vmatprep.subr.bf16.mxu0 %v2947_v51 }
 0x8f2   :  { %2772 = vmatpush3.bf16.msra.mxu0 %v1738_v5  ;;  %v1977_v5 = vld [vmem:[%s4539_s15 + $0x68] sm:$0xff] }
 0x8f3   :  { %2773 = vmatprep.subr.bf16.mxu0 %v2947_v51 }
 0x8f6   :  { %2774 = vmatpush3.bf16.msra.mxu0 %v1751_v46  ;;  %v2874_v46 = vpack.c.bf16 %v1974_v24, %v1972_v20 }
 0x8f7   :  { %2865 = vmatprep.subr.bf16.mxu0 %v2864_v31 }
 0x8f9   :  { %2776 = vmatmul.mubr.msk.bf16.vlgmr.msra.gmra.mrb[12].mxu0 %vm321_vm3, %v1740_v16  ;;  %v2876_v16 = vpack.c.bf16 %v1979_v14, %v1977_v5  ;;  %vm4674_vm3 = vmmov %vm4672_vm14 }
 0x8fa   :  { %2047 = vmatprep.mubr.f32.mxu0 %v2947_v51 }
 0x8fc   :  { %v1745_v57 = vpop.permute.xlu1 %1744 }
 0x900   :  { %v1874_v7 = vpop.permute.xlu1 %1873 }
 0x935   :  { %v2916_v12 = vpop.permute.xlu0 %2915 }
 0x936   :  { %v2918_v27 = vunpack.i.h.bf16 %v2916_v12  ;;  %v2917_v22 = vunpack.i.l.bf16 %v2916_v12  ;;  %v1976_v12 = vld [vmem:[%s4539_s15 + $0x60] sm:$0xff] }
 0x938   :  { %v1617_v25 = vsel %vm249_vm0, %v2918_v27, %v2917_v22  ;;  %v1620_v13 = vsel %vm249_vm0, %v2917_v22, 0.0  ;;  %v1978_v27 = vld [vmem:[%s4539_s15 + $0x70] sm:$0xff] }
 0x939   :  { %v1621_v33 = vmax.f32 %v4016_v62, %v1617_v25  ;;  %v1622_v49 = vmax.f32 %v4019_v2, %v1620_v13  ;;  %v2878_v22 = vpack.c.bf16 %v1978_v27, %v1976_v12  ;;  %v1956_v25 = vld [vmem:[%s4540_s13] sm:$0xff]  ;;  %s4675_s13 = smov 1  }
 0x93b   :  { %1857 = vmatprep.mubr.f32.mxu1 %v1622_v49 }
 0x93c   :  { %1858 = vmatmul.mubr.f32.vlgmr.msra.gmra.mrb[20].mxu1 %v1621_v33 }
 0x93d   :  { %2781 = vmatprep.mubr.msk.f32.mxu1 %vm4667_vm12, %v2947_v51  ;;  %vm4678_vm12 = vcmask 121856  }
 0x93e   :  { %vm4679_vm4 = vmmov %vm4678_vm12 }
 0x946   :  { %v1867_v23 = vpop.permute.xlu0 %1866 }
 0x9b8   :  { %v4124_v63 = vpop.f32.mrb[8].mxu0 }
 0x9b9   :  { %v4126_v4 = vpop.f32.mrb[9].mxu0 }
 0x9ba   :  { %v4128_v52 = vpop.f32.mrb[10].mxu0 }
 0x9bb   :  { %v4130_v54 = vpop.f32.mrb[11].mxu0 }
 0x9cc   :  { %v1787_v36 = vpop.f32.mrb[12].mxu0 }
 0x9cd   :  { %v2777_v34 = vpop.f32.mrb[13].mxu0  ;;  %v1788_v15 = vadd.f32 %v1787_v36, %v1745_v57  ;;  %v2935_v36 = vld [vmem:[%s4591_s27 + $0x10] sm:$0xff] }
 0x9ce   :  { %v1790_v56 = vpop.f32.mrb[14].mxu0  ;;  %v4202_v34 = vpack.c.bf16 %v2935_v36, %v2935_v36 }
 0x9cf   :  { %v2778_v50 = vpop.f32.mrb[15].mxu0 }
 0xa0f   :  { %v2741_v62 = vpop.f32.mrb[20].mxu1 }
 0xa10   :  { %v2742_v2 = vpop.f32.mrb[21].mxu1 }
 0xa11   :  { %v2743_v53 = vadd.f32 %v2742_v2, %v2741_v62 }
 0xa13   :  { %v1860_v1 = vadd.f32 %v2743_v53, %v1788_v15  ;;  %v2329_v15 = vld [vmem:[%s4541_s17 + $0x8] sm:$0xff] }
 0xa14   :  { %v2928_v53 = vld [vmem:[%s4542_s16 + $0x4] ss:$8 sps:$4 sm:$0xff]  }
 0xa15   :  { %v1869_v51 = vmul.f32 %v1867_v23, %v1860_v1  ;;  %v2328_v1 = vld [vmem:[%s4541_s17] sm:$0xff] }
 0xa17   :  { %v1876_v35 = vadd.f32 %v1874_v7, %v1869_v51 }
 0xa19   :  { %v1877_v26 = vmax.f32 %v1876_v35, 0.0 }
 0xa1b   :  { %2780 = vmatpush3.msra.mxu1 %v1877_v26 }
 0xa1c   :  { %2782 = vmatmul.mubr.msk.f32.vlgmr.msra.gmra.mrb[22].mxu1 %vm4671_vm9, %v1878_v58  ;;  %vm4682_vm9 = vcmask 1039360  }
 0xa1d   :  { %2655 = vmatprep.mubr.msk.bf16.mxu1 %vm172_vm5, %v3895_v41  ;;  %v1964_v41 = vld [vmem:[%s4539_s15] sm:$0xff] }
 0xa1e   :  { %v2866_v42 = vpack.c.bf16 %v1966_v43, %v1964_v41 }
 0xa20   :  { %2867 = vmatpush1.bf16.msra.mxu0 %v2866_v42 }
 0xa21   :  { %2869 = vmatprep.subr.bf16.mxu0 %v2868_v10 }
 0xa24   :  { %2871 = vmatpush1.bf16.msra.mxu0 %v2870_v21 }
 0xa25   :  { %2873 = vmatprep.subr.bf16.mxu0 %v2872_v19 }
 0xa28   :  { %2875 = vmatpush1.bf16.msra.mxu0 %v2874_v46 }
 0xa29   :  { %2877 = vmatprep.subr.bf16.mxu0 %v2876_v16 }
 0xa2c   :  { %2879 = vmatpush1.bf16.msra.mxu0 %v2878_v22 }
 0xaef   :  { %v1948_v48 = vpop.f32.mrb[22].mxu1 }
 0xaf0   :  { %v1952_v59 = vsel %vm4672_vm14, %v1948_v48, 0.0  ;;  %v2783_v60 = vpop.f32.mrb[23].mxu1  ;;  %vm4683_vm14 = vmmov %vm4682_vm9 }
 0xaf1   :  { %1953 = vadd.xlane.f32.xlu0 %v1952_v59 }
 0xb07   :  { %2144 = vrot.lane.b32.xlu0 %v4142_v18, %s4673_s12 }
 0xb0b   :  { %2162 = vrot.lane.b32.xlu0 %v4142_v18, %s4598_s7 }
 0xb7e   :  { %v1954_v13 = vpop.xlane.xlu0 %1953 }
 0xb7f   :  { %v1955_v33 = vmul.f32 0.015625, %v1954_v13 }
 0xb81   :  { %v1957_v49 = vadd.f32 %v1956_v25, %v1955_v33 }
 0xb82   :  { %v2145_v48 = vpop.permute.xlu0 %2144 }
 0xb83   :  { %1960 = vperm.xlu1 %2898, %v1957_v49  }
 0xb86   :  { %v2163_v6 = vpop.permute.xlu0 %2162 }
 0xb87   :  { %2142 = vrot.lane.b32.xlu1 %v4202_v34, %s4673_s12 }
 0xb8b   :  { %2160 = vrot.lane.b32.xlu1 %v4202_v34, %s4598_s7 }
 0xb8f   :  { %2153 = vrot.lane.b32.xlu1 %v4202_v34, %s4599_s24 }
 0xc02   :  { %v1961_v56 = vpop.permute.xlu1 %1960 }
 0xc03   :  { %v1963_v50 = vmul.f32 %v3850_v47, %v1961_v56 }
 0xc05   :  { %2637 = vmatmul.mubr.msk.f32.vlgmr.msra.gmra.mrb[6].mxu0 %vm4674_vm3, %v1963_v50  ;;  %vm4684_vm3 = vmmov %vm4681_vm2 }
 0xc06   :  { %2642 = vmatprep.mubr.msk.bf16.mxu0 %vm172_vm5, %v2928_v53  ;;  %v2143_v23 = vpop.permute.xlu1 %2142 }
 0xc0a   :  { %v4280_v51 = vpop.permute.xlu1 %2160 }
 0xc0e   :  { %v4282_v7 = vpop.permute.xlu1 %2153 }
 0xcd8   :  { %v2049_v62 = vpop.f32.mrb[6].mxu0 }
 0xcd9   :  { %v4212_v57 = vpack.c.bf16 %v2049_v62, %v2049_v62  ;;  %v2051_v2 = vpop.f32.mrb[7].mxu0 }
 0xcda   :  { %v4234_v47 = vpack.c.bf16 %v2051_v2, %v2051_v2 }
 0xcdb   :  { %2076 = vrot.lane.b32.xlu0 %v4212_v57, %s4598_s7  ;;  %2069 = vrot.lane.b32.xlu1 %v4212_v57, %s4599_s24 }
 0xcdf   :  { %2155 = vrot.lane.b32.xlu0 %v4142_v18, %s4599_s24  ;;  %2058 = vrot.lane.b32.xlu1 %v4212_v57, %s4673_s12 }
 0xce3   :  { %2109 = vrot.lane.b32.xlu0 %v4212_v57, %s4600_s26  ;;  %2087 = vrot.lane.b32.xlu1 %v4212_v57, %s4675_s13 }
 0xce7   :  { %2127 = vrot.lane.b32.xlu0 %v4212_v57, %s4602_s25  ;;  %2098 = vrot.lane.b32.xlu1 %v4212_v57, %s4601_s3 }
 0xceb   :  { %2173 = vrot.lane.b32.xlu0 %v4142_v18, %s4675_s13  ;;  %2120 = vrot.lane.b32.xlu1 %v4212_v57, %s2942_s22 }
 0xcef   :  { %2193 = vrot.lane.b32.xlu0 %v4202_v34, %s4600_s26  ;;  %2071 = vrot.lane.b32.xlu1 %v4234_v47, %s4599_s24 }
 0xcf3   :  { %2182 = vrot.lane.b32.xlu0 %v4202_v34, %s4601_s3  ;;  %2060 = vrot.lane.b32.xlu1 %v4234_v47, %s4673_s12 }
 0xcf7   :  { %2211 = vrot.lane.b32.xlu0 %v4202_v34, %s4602_s25  ;;  %2089 = vrot.lane.b32.xlu1 %v4234_v47, %s4675_s13 }
 0xcfb   :  { %2204 = vrot.lane.b32.xlu0 %v4202_v34, %s2942_s22  ;;  %2078 = vrot.lane.b32.xlu1 %v4234_v47, %s4598_s7 }
 0xcff   :  { %2339 = vperm.xlu0 %2897, %v2329_v15   ;;  %2100 = vrot.lane.b32.xlu1 %v4234_v47, %s4601_s3 }
 0xd03   :  { %2122 = vrot.lane.b32.xlu1 %v4234_v47, %s2942_s22 }
 0xd07   :  { %2111 = vrot.lane.b32.xlu1 %v4234_v47, %s4600_s26 }
 0xd0b   :  { %2129 = vrot.lane.b32.xlu1 %v4234_v47, %s4602_s25 }
 0xd0f   :  { %2171 = vrot.lane.b32.xlu1 %v4202_v34, %s4675_s13 }
 0xd13   :  { %2195 = vrot.lane.b32.xlu1 %v4142_v18, %s4600_s26 }
 0xd17   :  { %2184 = vrot.lane.b32.xlu1 %v4142_v18, %s4601_s3 }
 0xd1b   :  { %2213 = vrot.lane.b32.xlu1 %v4142_v18, %s4602_s25 }
 0xd1f   :  { %2206 = vrot.lane.b32.xlu1 %v4142_v18, %s2942_s22 }
 0xd23   :  { %2334 = vperm.xlu1 %2898, %v2328_v1  }
 0xd4d   :  { %v2070_v35 = vpop.permute.xlu1 %2069  ;;  %v2077_v0 = vpop.permute.xlu0 %2076 }
 0xd4e   :  { %v2075_v43 = vsel %vm172_vm5, 0, %v2070_v35  ;;  %v2083_v46 = vsel %vm4678_vm12, 0, %v2077_v0  ;;  %vm4687_vm12 = vcmask 924672  }
 0xd4f   :  { %v2223_v40 = vrot.slane %v2075_v43, 4  ;;  %v2085_v33 = vsel %vm4681_vm2, %v2083_v46, 0  ;;  %vm4690_vm2 = vcmp.ne.s16.totalorder %v3146_v30, 0 }
 0xd51   :  { %v2059_v26 = vpop.permute.xlu1 %2058  ;;  %v2156_v21 = vpop.permute.xlu0 %2155 }
 0xd52   :  { %v2065_v41 = vsel %vm142_vm7, 0, %v2059_v26  ;;  %v2157_v46 = vsel %vm172_vm5, %v4282_v7, %v2156_v21 }
 0xd53   :  { %v2067_v9 = vsel %vm164_vm8, %v2065_v41, 0 }
 0xd54   :  { %v2252_v20 = vsel %vm281_vm11, %v2067_v9, %v2223_v40 }
 0xd55   :  { %v2088_v58 = vpop.permute.xlu1 %2087  ;;  %v2110_v25 = vpop.permute.xlu0 %2109 }
 0xd56   :  { %v2094_v11 = vsel %vm210_vm10, 0, %v2088_v58 }
 0xd57   :  { %v2096_v24 = vsel %vm164_vm8, %v2094_v11, 0 }
 0xd58   :  { %v2227_v16 = vrot.slane %v2096_v24, 4 }
 0xd59   :  { %v2099_v59 = vpop.permute.xlu1 %2098 }
 0xd5a   :  { %v2260_v56 = vsel %vm281_vm11, %v2085_v33, %v2227_v16 }
 0xd5d   :  { %v2121_v60 = vpop.permute.xlu1 %2120 }
 0xd61   :  { %v2072_v61 = vpop.permute.xlu1 %2071 }
 0xd62   :  { %v2073_v31 = vsel %vm172_vm5, %v2070_v35, %v2072_v61  ;;  %v2128_v35 = vpop.permute.xlu0 %2127 }
 0xd63   :  { %v2224_v42 = vrot.slane %v2073_v31, 4  ;;  %v2146_v31 = vsel %vm142_vm7, %v2143_v23, %v2145_v48 }
 0xd65   :  { %v2061_v8 = vpop.permute.xlu1 %2060 }
 0xd66   :  { %v2062_v10 = vsel %vm142_vm7, %v2059_v26, %v2061_v8  ;;  %v2174_v9 = vpop.permute.xlu0 %2173 }
 0xd67   :  { %v2068_v17 = vsel %vm4676_vm13, %v2062_v10, 0  ;;  %vm4685_vm13 = vmmov %vm4680_vm15 }
 0xd68   :  { %v2256_v3 = vsel %vm281_vm11, %v2068_v17, %v2224_v42 }
 0xd69   :  { %2376 = vmatprep.subr.bf16.mxu0 %v2256_v3  ;;  %v2090_v19 = vpop.permute.xlu1 %2089 }
 0xd6a   :  { %v2091_v5 = vsel %vm210_vm10, %v2088_v58, %v2090_v19  ;;  %2377 = vmatpush1.bf16.msra.mxu0 %v2252_v20  ;;  %v2149_v58 = vsel %vm142_vm7, 0, %v2143_v23  ;;  %v2152_v23 = vsel %vm4690_vm2, %v2146_v31, 0  ;;  %v2194_v16 = vpop.permute.xlu0 %2193 }
 0xd6b   :  { %v2097_v14 = vsel %vm4677_vm6, %v2091_v5, 0  ;;  %v2151_v43 = vsel %vm164_vm8, %v2149_v58, 0  ;;  %vm4686_vm6 = vmmov %vm4679_vm4  ;;  %v2239_v24 = vrot.slane %v2152_v23, 4 }
 0xd6c   :  { %v2228_v27 = vrot.slane %v2097_v14, 4  ;;  %v2164_v8 = vsel %vm4686_vm6, %v4280_v51, %v2163_v6  ;;  %v2238_v3 = vrot.slane %v2151_v43, 4 }
 0xd6d   :  { %v2079_v12 = vpop.permute.xlu1 %2078 }
 0xd6e   :  { %v2080_v22 = vsel %vm4679_vm4, %v2077_v0, %v2079_v12  ;;  %vm4688_vm4 = vmmov %vm4687_vm12 }
 0xd6f   :  { %v2086_v13 = vsel %vm4680_vm15, %v2080_v22, 0  ;;  %vm4689_vm15 = vmmov %vm4686_vm6 }
 0xd70   :  { %v2264_v49 = vsel %vm281_vm11, %v2086_v13, %v2228_v27  ;;  %v2167_v40 = vsel %vm4689_vm15, 0, %v4280_v51  ;;  %vm4697_vm15 = vmmov %vm4690_vm2 }
 0xd71   :  { %v2101_v36 = vpop.permute.xlu1 %2100  ;;  %2378 = vmatprep.subr.bf16.mxu0 %v2264_v49  ;;  %v2169_v51 = vsel %vm4684_vm3, %v2167_v40, 0 }
 0xd72   :  { %v2102_v50 = vsel %vm4682_vm9, %v2099_v59, %v2101_v36  ;;  %v2105_v62 = vsel %vm4683_vm14, %v2101_v36, 0  ;;  %2379 = vmatpush1.bf16.msra.mxu0 %v2260_v56  ;;  %vm4691_vm9 = vmmov %vm4690_vm2  ;;  %v2242_v33 = vrot.slane %v2169_v51, 4  ;;  %v2159_v36 = vsel %vm172_vm5, 0, %v4282_v7 }
 0xd73   :  { %v2107_v2 = vsel %vm4684_vm3, %v2102_v50, 0  ;;  %v2108_v15 = vsel %vm4685_vm13, %v2105_v62, 0  ;;  %vm4692_vm14 = vmmov %vm4685_vm13  ;;  %vm4693_vm13 = vcmask 908288   ;;  %v2245_v50 = vrot.slane %v4142_v18, 4 }
 0xd74   :  { %v2231_v53 = vrot.slane %v2107_v2, 4  ;;  %v2232_v1 = vrot.slane %v2108_v15, 4  ;;  %v2170_v19 = vsel %vm4692_vm14, %v2164_v8, 0  ;;  %vm4694_vm6 = vmmov %vm4693_vm13  ;;  %v2183_v15 = vpop.permute.xlu0 %2182  ;;  %vm4698_vm2 = vcmask 924672  }
 0xd75   :  { %v2123_v26 = vpop.permute.xlu1 %2122  ;;  %v2243_v22 = vrot.slane %v2170_v19, 4 }
 0xd76   :  { %v2272_v61 = vsel %vm281_vm11, %v4234_v47, %v2232_v1  ;;  %v2268_v59 = vsel %vm281_vm11, %v4212_v57, %v2231_v53  ;;  %v2124_v0 = vsel %vm249_vm0, %v2121_v60, %v2123_v26  ;;  %v2126_v41 = vsel %vm249_vm0, %v2123_v26, 0 }
 0xd77   :  { %2380 = vmatprep.subr.bf16.mxu0 %v2272_v61  ;;  %v2234_v47 = vrot.slane %v2124_v0, 4  ;;  %v2235_v10 = vrot.slane %v2126_v41, 4  ;;  %v2295_v56 = vsel %vm281_vm11, %v2157_v46, %v2243_v22  ;;  %v2291_v1 = vsel %vm281_vm11, %v2159_v36, %v2242_v33  ;;  %v2931_v46 = vld [vmem:[%s4542_s16 + $0x14] ss:$8 sps:$4 sm:$0xff]  }
 0xd78   :  { %2381 = vmatpush1.bf16.msra.mxu0 %v2268_v59 }
 0xd79   :  { %v2112_v42 = vpop.permute.xlu1 %2111 }
 0xd7a   :  { %v2113_v57 = vsel %vm4687_vm12, %v2110_v25, %v2112_v42  ;;  %v2116_v60 = vsel %vm4688_vm4, %v2112_v42, 0  ;;  %vm4695_vm12 = vmmov %vm4684_vm3  ;;  %vm4701_vm3 = vcmask 1039360  }
 0xd7b   :  { %v2118_v48 = vsel %vm164_vm8, %v2113_v57, 0  ;;  %v2119_v6 = vsel %vm4691_vm9, %v2116_v60, 0  ;;  %vm4696_vm4 = vmmov %vm4692_vm14 }
 0xd7c   :  { %v2280_v11 = vsel %vm281_vm11, %v2119_v6, %v2235_v10  ;;  %v2276_v17 = vsel %vm281_vm11, %v2118_v48, %v2234_v47  ;;  %vm4699_vm9 = vmmov %vm4698_vm2 }
 0xd7d   :  { %v2130_v20 = vpop.permute.xlu1 %2129  ;;  %2382 = vmatprep.subr.bf16.mxu0 %v2280_v11  ;;  %vm4700_vm14 = vmmov %vm4697_vm15 }
 0xd7e   :  { %v2131_v5 = vsel %vm4693_vm13, %v2128_v35, %v2130_v20  ;;  %v2134_v14 = vsel %vm4694_vm6, %v2130_v20, 0  ;;  %2383 = vmatpush1.bf16.msra.mxu0 %v2276_v17  ;;  %v2244_v35 = vrot.slane %v4202_v34, 4  ;;  %vm4702_vm13 = vmmov %vm4701_vm3 }
 0xd7f   :  { %v2136_v12 = vsel %vm4695_vm12, %v2131_v5, 0  ;;  %v2137_v27 = vsel %vm4696_vm4, %v2134_v14, 0  ;;  %vm4703_vm6 = vmmov %vm4695_vm12  ;;  %v2930_v14 = vld [vmem:[%s4542_s16] ss:$8 sps:$4 sm:$0xff]  }
 0xd80   :  { %v2288_v25 = vsel %vm281_vm11, %v2137_v27, %v2239_v24  ;;  %v2284_v13 = vsel %vm281_vm11, %v2136_v12, %v2238_v3  ;;  %vm4704_vm12 = vmmov %vm4696_vm4  ;;  %vm4705_vm4 = vcmask 908288  }
 0xd81   :  { %v2172_v49 = vpop.permute.xlu1 %2171  ;;  %2384 = vmatprep.subr.bf16.mxu0 %v2288_v25 }
 0xd82   :  { %v2175_v21 = vsel %vm210_vm10, %v2172_v49, %v2174_v9  ;;  %2385 = vmatpush1.bf16.msra.mxu0 %v2284_v13  ;;  %v2178_v62 = vsel %vm210_vm10, 0, %v2172_v49  ;;  %v2212_v9 = vpop.permute.xlu0 %2211 }
 0xd83   :  { %v2181_v2 = vsel %vm4697_vm15, %v2175_v21, 0  ;;  %2386 = vmatprep.subr.bf16.mxu0 %v2295_v56  ;;  %v2180_v7 = vsel %vm164_vm8, %v2178_v62, 0  ;;  %vm4706_vm15 = vmmov %vm4705_vm4 }
 0xd84   :  { %v2303_v18 = vsel %vm281_vm11, %v2181_v2, %v2245_v50  ;;  %v2299_v34 = vsel %vm281_vm11, %v2180_v7, %v2244_v35  ;;  %v1310_v35 = vld [vmem:[%s4544_s19] sm:$0xff]  ;;  %v1311_v7 = vld [vmem:[%s4544_s19 + $0x8] sm:$0xff] }
 0xd85   :  { %v2196_v53 = vpop.permute.xlu1 %2195 }
 0xd86   :  { %v2197_v26 = vsel %vm4698_vm2, %v2194_v16, %v2196_v53  ;;  %v2200_v58 = vsel %vm4699_vm9, %v2196_v53, 0  ;;  %2387 = vmatpush1.bf16.msra.mxu0 %v2291_v1  ;;  %vm4707_vm2 = vmmov %vm4703_vm6  ;;  %v2205_v3 = vpop.permute.xlu0 %2204  ;;  %v2933_v16 = vld [vmem:[%s4542_s16 + $0x10] ss:$8 sps:$4 sm:$0xff]  }
 0xd87   :  { %v2202_v61 = vsel %vm164_vm8, %v2197_v26, 0  ;;  %v2203_v59 = vsel %vm4700_vm14, %v2200_v58, 0  ;;  %2388 = vmatprep.subr.bf16.mxu0 %v2303_v18  ;;  %vm4708_vm9 = vmmov %vm4704_vm12  ;;  %v1117_v26 = vld [vmem:[%s4541_s17 + $0x10] sm:$0xff]  ;;  %v1118_v58 = vld [vmem:[%s4541_s17 + $0x18] sm:$0xff] }
 0xd88   :  { %v2248_v41 = vrot.slane %v2202_v61, 4  ;;  %v2249_v31 = vrot.slane %v2203_v59, 4 }
 0xd89   :  { %v2185_v0 = vpop.permute.xlu1 %2184 }
 0xd8a   :  { %v2186_v43 = vsel %vm4701_vm3, %v2183_v15, %v2185_v0  ;;  %v2189_v8 = vsel %vm4702_vm13, %v2185_v0, 0  ;;  %2389 = vmatpush1.bf16.msra.mxu0 %v2299_v34  ;;  %v2340_v13 = vpop.permute.xlu0 %2339  ;;  %vm4711_vm3 = vmmov %vm4707_vm2 }
 0xd8b   :  { %v2191_v42 = vsel %vm4703_vm6, %v2186_v43, 0  ;;  %v2192_v47 = vsel %vm4704_vm12, %v2189_v8, 0  ;;  %vm4713_vm13 = vmmov %vm4708_vm9 }
 0xd8c   :  { %v2311_v10 = vsel %vm281_vm11, %v2192_v47, %v2249_v31  ;;  %v2307_v57 = vsel %vm281_vm11, %v2191_v42, %v2248_v41  ;;  %vm4717_vm12 = vmmov %vm4708_vm9 }
 0xd8d   :  { %v2214_v60 = vpop.permute.xlu1 %2213  ;;  %2390 = vmatprep.subr.bf16.mxu0 %v2311_v10 }
 0xd8e   :  { %v2215_v40 = vsel %vm4705_vm4, %v2212_v9, %v2214_v60  ;;  %v2218_v23 = vsel %vm4706_vm15, %v2214_v60, 0  ;;  %2391 = vmatpush1.bf16.msra.mxu0 %v2307_v57  ;;  %vm4719_vm4 = vcmask 924672  }
 0xd8f   :  { %v2220_v48 = vsel %vm4707_vm2, %v2215_v40, 0  ;;  %v2221_v6 = vsel %vm4708_vm9, %v2218_v23, 0  ;;  %vm4720_vm15 = vmmov %vm4719_vm4  ;;  %vm4722_vm9 = vcmask 908288  }
 0xd90   :  { %v2315_v11 = vrot.slane %v2220_v48, 4  ;;  %v2316_v17 = vrot.slane %v2221_v6, 4 }
 0xd91   :  { %v2207_v19 = vpop.permute.xlu1 %2206 }
 0xd92   :  { %v2208_v20 = vsel %vm249_vm0, %v2205_v3, %v2207_v19  ;;  %v2210_v51 = vsel %vm249_vm0, %v2207_v19, 0 }
 0xd93   :  { %v2322_v24 = vsel %vm281_vm11, %v2210_v51, %v2316_v17  ;;  %v2319_v5 = vsel %vm281_vm11, %v2208_v20, %v2315_v11  ;;  %vm4709_vm11 = vmmov %vm4700_vm14  ;;  %vm4710_vm14 = vcmask 121856  }
 0xd94   :  { %2392 = vmatprep.subr.bf16.mxu0 %v2322_v24 }
 0xd95   :  { %2393 = vmatpush1.bf16.msra.mxu0 %v2319_v5 }
 0xd98   :  { %2409 = vmatmul.mubr.bf16.vlgmr.msra.gmra.mrb[16].mxu0 %v2930_v14 }
 0xd99   :  { %2643 = vmatprep.mubr.msk.bf16.mxu0 %vm172_vm5, %v2931_v46 }
 0xda0   :  { %2419 = vmatmul.mubr.bf16.gmra.mrb[20].mxu0 %v2933_v16 }
 0xda2   :  { %v2335_v12 = vpop.permute.xlu1 %2334 }
 0xe6b   :  { %v2410_v27 = vpop.f32.mrb[16].mxu0 }
 0xe6c   :  { %v2411_v22 = vadd.f32 %v2410_v27, %v2335_v12  ;;  %v2412_v25 = vpop.f32.mrb[17].mxu0 }
 0xe6d   :  { %v2413_v33 = vadd.f32 %v2412_v25, %v2335_v12  ;;  %v2414_v49 = vpop.f32.mrb[18].mxu0 }
 0xe6e   :  { %v2415_v36 = vadd.f32 %v2414_v49, %v2340_v13  ;;  %v2416_v21 = vpop.f32.mrb[19].mxu0  ;;  %v2429_v50 = vmax.f32 %v2411_v22, 0.0 }
 0xe6f   :  { %v2417_v56 = vadd.f32 %v2416_v21, %v2340_v13  ;;  %v2430_v2 = vmax.f32 %v2413_v33, 0.0 }
 0xe70   :  { %v2431_v62 = vmax.f32 %v2415_v36, 0.0 }
 0xe71   :  { %v2432_v15 = vmax.f32 %v2417_v56, 0.0 }
 0xe72   :  { %v4400_v53 = vpack.c.bf16 %v2431_v62, %v2429_v50 }
 0xe73   :  { %v2434_v1 = vpack.c.bf16 %v2432_v15, %v2430_v2  ;;  %v4438_v18 = vpop.f32.mrb[20].mxu0 }
 0xe74   :  { %2437 = vrot.lane.b32.xlu1 %v4400_v53, %s4673_s12  ;;  %v4440_v61 = vpop.f32.mrb[21].mxu0 }
 0xe75   :  { %2439 = vrot.lane.b32.xlu0 %v2434_v1, %s4673_s12  ;;  %v4442_v59 = vpop.f32.mrb[22].mxu0 }
 0xe76   :  { %v4444_v0 = vpop.f32.mrb[23].mxu0 }
 0xe78   :  { %2448 = vrot.lane.b32.xlu1 %v4400_v53, %s4599_s24 }
 0xe79   :  { %2450 = vrot.lane.b32.xlu0 %v2434_v1, %s4599_s24 }
 0xe7c   :  { %2457 = vrot.lane.b32.xlu1 %v4400_v53, %s4598_s7 }
 0xe7d   :  { %2459 = vrot.lane.b32.xlu0 %v2434_v1, %s4598_s7 }
 0xe80   :  { %2468 = vrot.lane.b32.xlu1 %v4400_v53, %s4675_s13 }
 0xe81   :  { %2470 = vrot.lane.b32.xlu0 %v2434_v1, %s4675_s13 }
 0xe84   :  { %2479 = vrot.lane.b32.xlu1 %v4400_v53, %s4601_s3 }
 0xe85   :  { %2481 = vrot.lane.b32.xlu0 %v2434_v1, %s4601_s3 }
 0xe88   :  { %2490 = vrot.lane.b32.xlu1 %v4400_v53, %s4600_s26 }
 0xe89   :  { %2492 = vrot.lane.b32.xlu0 %v2434_v1, %s4600_s26 }
 0xe8c   :  { %2501 = vrot.lane.b32.xlu1 %v4400_v53, %s2942_s22 }
 0xe8d   :  { %2503 = vrot.lane.b32.xlu0 %v2434_v1, %s2942_s22 }
 0xe90   :  { %2510 = vrot.lane.b32.xlu1 %v4400_v53, %s4602_s25 }
 0xe91   :  { %2512 = vrot.lane.b32.xlu0 %v2434_v1, %s4602_s25 }
 0xe94   :  { %1314 = vperm.xlu1 %2898, %v1310_v35  }
 0xe95   :  { %1319 = vperm.xlu0 %2897, %v1311_v7  }
 0xe98   :  { %2527 = vperm.xlu1 %2898, %v1310_v35  }
 0xe99   :  { %2532 = vperm.xlu0 %2897, %v1311_v7  }
 0xe9c   :  { %1131 = vperm.xlu1 %2898, %v1117_v26  }
 0xe9d   :  { %1136 = vperm.xlu0 %2897, %v1118_v58  }
 0xea0   :  { %2344 = vperm.xlu1 %2898, %v1117_v26  }
 0xea1   :  { %2349 = vperm.xlu0 %2897, %v1118_v58  }
 0xee6   :  { %v2438_v34 = vpop.permute.xlu1 %2437 }
 0xee7   :  { %v2444_v41 = vsel %vm142_vm7, 0, %v2438_v34  ;;  %v2440_v31 = vpop.permute.xlu0 %2439 }
 0xee8   :  { %v2446_v43 = vsel %vm164_vm8, %v2444_v41, 0  ;;  %v2441_v8 = vsel %vm142_vm7, %v2438_v34, %v2440_v31  ;;  %vm4712_vm7 = vmmov %vm4710_vm14 }
 0xee9   :  { %2646 = vmatprep.subr.msk.bf16.mxu1 %vm4709_vm11, %v2441_v8 }
 0xeea   :  { %2548 = vmatpush1.bf16.msra.mxu1 %v2446_v43  ;;  %v2449_v9 = vpop.permute.xlu1 %2448 }
 0xeeb   :  { %v2451_v42 = vpop.permute.xlu0 %2450 }
 0xeec   :  { %v2452_v47 = vsel %vm172_vm5, %v2449_v9, %v2451_v42  ;;  %vm4714_vm5 = vmmov %vm4709_vm11 }
 0xeed   :  { %2549 = vmatprep.subr.bf16.mxu1 %v2452_v47  ;;  %vm4723_vm11 = vmmov %vm4722_vm9 }
 0xeee   :  { %2648 = vmatpush1.bf16.msk.msra.mxu1 %vm4030_vm1, %v2449_v9  ;;  %v2458_v10 = vpop.permute.xlu1 %2457  ;;  %vm4715_vm1 = vcmask 1039360  }
 0xeef   :  { %v2464_v57 = vsel %vm4710_vm14, 0, %v2458_v10  ;;  %v2460_v60 = vpop.permute.xlu0 %2459  ;;  %vm4716_vm6 = vmmov %vm4715_vm1 }
 0xef0   :  { %v2466_v40 = vsel %vm4711_vm3, %v2464_v57, 0  ;;  %v2461_v23 = vsel %vm4712_vm7, %v2458_v10, %v2460_v60  ;;  %vm4724_vm14 = vmmov %vm4717_vm12 }
 0xef1   :  { %2649 = vmatprep.subr.msk.bf16.mxu1 %vm4713_vm13, %v2461_v23 }
 0xef2   :  { %2552 = vmatpush1.bf16.msra.mxu1 %v2466_v40  ;;  %v2469_v48 = vpop.permute.xlu1 %2468 }
 0xef3   :  { %v2475_v6 = vsel %vm210_vm10, 0, %v2469_v48  ;;  %v2471_v11 = vpop.permute.xlu0 %2470 }
 0xef4   :  { %v2477_v32 = vsel %vm164_vm8, %v2475_v6, 0  ;;  %v2472_v17 = vsel %vm210_vm10, %v2469_v48, %v2471_v11  ;;  %vm4718_vm10 = vmmov %vm4707_vm2 }
 0xef5   :  { %2650 = vmatprep.subr.msk.bf16.mxu1 %vm4714_vm5, %v2472_v17  ;;  %vm4721_vm2 = vmmov %vm4714_vm5 }
 0xef6   :  { %2554 = vmatpush1.bf16.msra.mxu1 %v2477_v32  ;;  %v2480_v3 = vpop.permute.xlu1 %2479 }
 0xef7   :  { %v2482_v19 = vpop.permute.xlu0 %2481  ;;  %2555 = vmatprep.subr.bf16.mxu1 %v2434_v1 }
 0xef8   :  { %v2483_v20 = vsel %vm4715_vm1, %v2480_v3, %v2482_v19  ;;  %v2486_v51 = vsel %vm4716_vm6, %v2482_v19, 0 }
 0xef9   :  { %v2488_v14 = vsel %vm4718_vm10, %v2483_v20, 0 }
 0xefa   :  { %2556 = vmatpush1.bf16.msra.mxu1 %v4400_v53  ;;  %v2491_v24 = vpop.permute.xlu1 %2490 }
 0xefb   :  { %v2493_v5 = vpop.permute.xlu0 %2492  ;;  %2651 = vmatprep.subr.msk.bf16.mxu1 %vm4717_vm12, %v2486_v51 }
 0xefc   :  { %v2494_v46 = vsel %vm4719_vm4, %v2491_v24, %v2493_v5  ;;  %v2497_v16 = vsel %vm4720_vm15, %v2493_v5, 0 }
 0xefd   :  { %v2499_v22 = vsel %vm164_vm8, %v2494_v46, 0 }
 0xefe   :  { %2558 = vmatpush1.bf16.msra.mxu1 %v2488_v14  ;;  %v2502_v12 = vpop.permute.xlu1 %2501 }
 0xeff   :  { %v2504_v27 = vpop.permute.xlu0 %2503  ;;  %2652 = vmatprep.subr.msk.bf16.mxu1 %vm4721_vm2, %v2497_v16 }
 0xf00   :  { %v2505_v33 = vsel %vm249_vm0, %v2502_v12, %v2504_v27 }
 0xf02   :  { %2560 = vmatpush1.bf16.msra.mxu1 %v2499_v22  ;;  %v2511_v25 = vpop.permute.xlu1 %2510 }
 0xf03   :  { %v2513_v13 = vpop.permute.xlu0 %2512  ;;  %2653 = vmatprep.subr.msk.bf16.mxu1 %vm249_vm0, %v2504_v27 }
 0xf04   :  { %v2514_v49 = vsel %vm4722_vm9, %v2511_v25, %v2513_v13  ;;  %v2517_v36 = vsel %vm4723_vm11, %v2513_v13, 0 }
 0xf05   :  { %v2519_v30 = vsel %vm4711_vm3, %v2514_v49, 0 }
 0xf06   :  { %2562 = vmatpush1.bf16.msra.mxu1 %v2505_v33 }
 0xf07   :  { %2654 = vmatprep.subr.msk.bf16.mxu1 %vm4724_vm14, %v2517_v36 }
 0xf0a   :  { %2564 = vmatpush1.bf16.msra.mxu1 %v2519_v30 }
 0xf0d   :  { %2580 = vmatmul.mubr.bf16.vlgmr.msra.gmra.mrb[24].mxu1 %v4080_v45 }
 0xf13   :  { %v1315_v29 = vpop.permute.xlu1 %1314 }
 0xf14   :  { %v1320_v21 = vpop.permute.xlu0 %1319  ;;  %v1369_v50 = vadd.f32 %v4124_v63, %v1315_v29  ;;  %v1371_v62 = vadd.f32 %v4126_v4, %v1315_v29 }
 0xf15   :  { %v1373_v15 = vadd.f32 %v4128_v52, %v1320_v21  ;;  %v1375_v53 = vadd.f32 %v4130_v54, %v1320_v21 }
 0xf16   :  { %v1377_v1 = vmax.f32 %v1369_v50, 0.0  ;;  %v1378_v35 = vmax.f32 %v1371_v62, 0.0 }
 0xf17   :  { %v2528_v56 = vpop.permute.xlu1 %2527  ;;  %v1379_v26 = vmax.f32 %v1373_v15, 0.0  ;;  %v1380_v58 = vmax.f32 %v1375_v53, 0.0 }
 0xf18   :  { %v2533_v2 = vpop.permute.xlu0 %2532 }
 0xf1b   :  { %v1132_v37 = vpop.permute.xlu1 %1131 }
 0xf1c   :  { %v1208_v44 = vadd.f32 %v3831_v28, %v1132_v37  ;;  %v1210_v7 = vadd.f32 %v3835_v38, %v1132_v37  ;;  %v1137_v45 = vpop.permute.xlu0 %1136 }
 0xf1d   :  { %v1212_v34 = vadd.f32 %v3837_v55, %v1137_v45  ;;  %v1214_v63 = vadd.f32 %v3839_v39, %v1137_v45 }
 0xf1e   :  { %v1381_v4 = vadd.f32 %v1377_v1, %v1208_v44  ;;  %v1382_v41 = vadd.f32 %v1378_v35, %v1210_v7 }
 0xf1f   :  { %v1383_v31 = vadd.f32 %v1379_v26, %v1212_v34  ;;  %v1384_v52 = vadd.f32 %v1380_v58, %v1214_v63  ;;  %v2345_v28 = vpop.permute.xlu1 %2344 }
 0xf20   :  { %1385 = vst [vmem:[%s4545_s20] sm:$0xff] %v1381_v4  ;;  %1386 = vst [vmem:[%s4545_s20 + $0x8] sm:$0xff] %v1382_v41  ;;  %v2350_v54 = vpop.permute.xlu0 %2349  ;;  %v2421_v9 = vadd.f32 %v4438_v18, %v2345_v28  ;;  %v2423_v57 = vadd.f32 %v4440_v61, %v2345_v28 }
 0xf21   :  { %1387 = vst [vmem:[%s4545_s20 + $0x10] sm:$0xff] %v1383_v31  ;;  %1388 = vst [vmem:[%s4545_s20 + $0x18] sm:$0xff] %v1384_v52  ;;  %v2425_v23 = vadd.f32 %v4442_v59, %v2350_v54  ;;  %v2427_v11 = vadd.f32 %v4444_v0, %v2350_v54 }
 0xfe0   :  { %v2581_v38 = vpop.f32.mrb[24].mxu1 }
 0xfe1   :  { %v2582_v55 = vadd.f32 %v2581_v38, %v2528_v56  ;;  %v2583_v39 = vpop.f32.mrb[25].mxu1 }
 0xfe2   :  { %v2584_v43 = vadd.f32 %v2583_v39, %v2528_v56  ;;  %v2585_v8 = vpop.f32.mrb[26].mxu1 }
 0xfe3   :  { %v2590_v42 = vmax.f32 %v2582_v55, 0.0  ;;  %v2586_v47 = vadd.f32 %v2585_v8, %v2533_v2  ;;  %v2587_v10 = vpop.f32.mrb[27].mxu1 }
 0xfe4   :  { %v2591_v60 = vmax.f32 %v2584_v43, 0.0  ;;  %v2588_v40 = vadd.f32 %v2587_v10, %v2533_v2 }
 0xfe5   :  { %v2594_v48 = vadd.f32 %v2590_v42, %v2421_v9  ;;  %v2592_v6 = vmax.f32 %v2586_v47, 0.0 }
 0xfe6   :  { %v2595_v32 = vadd.f32 %v2591_v60, %v2423_v57  ;;  %v2593_v17 = vmax.f32 %v2588_v40, 0.0 }
 0xfe7   :  { %2656 = vst [vmem:[%s4545_s20 + $0x20] sm:$0xff] %v2594_v48  ;;  %v2596_v18 = vadd.f32 %v2592_v6, %v2425_v23 }
 0xfe8   :  { %2657 = vst [vmem:[%s4545_s20 + $0x28] sm:$0xff] %v2595_v32  ;;  %v2597_v61 = vadd.f32 %v2593_v17, %v2427_v11 }
 0xfe9   :  { %2658 = vst [vmem:[%s4545_s20 + $0x30] sm:$0xff] %v2596_v18 }
 0xfea   :  { %2659 = vst [vmem:[%s4545_s20 + $0x38] sm:$0xff] %v2597_v61 }

</bundles_post_ra>
